<compile_context>
chip_gen: v5e
topology: v5e:2x2
jax: 0.10.0
libtpu: 0.0.40
codegen_flags: <defaults>
</compile_context>

<pallas_src>
import functools
import math

import jax
import jax.numpy as jnp
from jax import lax
from jax.experimental import pallas as pl
from jax.experimental.pallas import tpu as pltpu

_BN_EPS = 1e-5


def _round_up(n, m):
    return ((n + m - 1) // m) * m


def _vmem_limit_bytes():
    """Generation-aware VMEM budget (v5e/v6e: 128 MiB phys, v7x: 64 MiB/TC)."""
    try:
        cap = int(pltpu.get_tpu_info().vmem_capacity_bytes)
        return min((cap * 3) // 4, 100 * 1024 * 1024)
    except Exception:
        return 48 * 1024 * 1024


# ----------------------------------------------------------------------------
# Pallas kernel: full GatedConvBlock for one batch element
# ----------------------------------------------------------------------------
def _gated_block_kernel(cols1_ref, w1_ref, b1_ref, w2_ref, b2_ref, pool_ref,
                        o_ref, *, H, W, Cout):
    """cols1: (H*W, K1p) bf16   layer-1 im2col (K padded to 128-multiple)
    w1    : (K1p, 2*Cout) bf16  packed [conv1 | conv2] weights, BN folded
    b1    : (1, 2*Cout)   f32   folded BN shift
    w2    : (9*Cout, 2*Cout) bf16, b2: (1, 2*Cout) f32
    pool  : (H*W//4, H*W) bf16  constant 2x2 average-pool matrix
    o     : (H//2, W//2, Cout)  bf16
    """
    C = Cout

    # ---- GatingBlock 1: both conv branches in one bf16 MXU matmul ----------
    acc1 = jnp.dot(cols1_ref[...], w1_ref[...],
                   preferred_element_type=jnp.float32)            # (H*W, 2C)
    acc1 = acc1 + b1_ref[...]
    h = (jax.nn.sigmoid(acc1[:, :C]) * acc1[:, C:]).astype(jnp.bfloat16)
    h3 = h.reshape(H, W, C)                                       # (H, W, C)

    # ---- zero-pad h entirely on-chip (no HBM round-trip / no jnp.pad) ------
    # Side pad of 16 keeps the sublane concatenation bf16-tile aligned; the
    # 3x3 windows are then read at sublane offsets 15/16/17.
    P = 16
    z_tb = jnp.zeros((1, W, C), jnp.bfloat16)
    z_lr = jnp.zeros((H + 2, P, C), jnp.bfloat16)
    hp = jnp.concatenate([z_tb, h3, z_tb], axis=0)                # (H+2, W, C)
    hp = jnp.concatenate([z_lr, hp, z_lr], axis=1)                # (H+2, W+2P, C)

    # ---- GatingBlock 2: in-kernel im2col + one large-K bf16 MXU matmul -----
    cols2 = jnp.concatenate(
        [hp[dy:dy + H, P - 1 + dx:P - 1 + dx + W, :].reshape(H * W, C)
         for dy in range(3) for dx in range(3)],
        axis=1)                                                   # (H*W, 9C)
    acc2 = jnp.dot(cols2, w2_ref[...], preferred_element_type=jnp.float32)
    acc2 = acc2 + b2_ref[...]
    y = (jax.nn.sigmoid(acc2[:, :C]) * acc2[:, C:]).astype(jnp.bfloat16)

    # ---- fused 2x2 average pool: constant bf16 pooling matmul --------------
    p = jnp.dot(pool_ref[...], y, preferred_element_type=jnp.float32)
    o_ref[...] = p.reshape(H // 2, W // 2, C).astype(o_ref.dtype)


# ----------------------------------------------------------------------------
# Host-side helpers
# ----------------------------------------------------------------------------
def _im2col_3x3(x):
    """(B, H, W, C) -> (B, H*W, 9*C); taps ordered (dy, dx) row-major, C-minor."""
    B, H, W, C = x.shape
    xp = jnp.pad(x, ((0, 0), (1, 1), (1, 1), (0, 0)))
    cols = jnp.concatenate(
        [xp[:, dy:dy + H, dx:dx + W, :] for dy in range(3) for dx in range(3)],
        axis=-1)
    return cols.reshape(B, H * W, 9 * C)


def _pool_matrix(H, W):
    """Constant (H*W//4, H*W) bf16 matrix implementing 2x2 average pooling."""
    R, M = (H // 2) * (W // 2), H * W
    r = jnp.arange(R)[:, None]
    m = jnp.arange(M)[None, :]
    sel = ((m // W) // 2 == r // (W // 2)) & ((m % W) // 2 == r % (W // 2))
    return jnp.where(sel, 0.25, 0.0).astype(jnp.bfloat16)


def gated_conv_block(x, params):
    """Fused GatedConvBlock: 2x GatingBlock (3x3/s1/p1) + 2x2 avg pool.

    x: (B, H, W, Cin) NHWC bf16. Returns (B, H//2, W//2, Cout) f32.
    """
    B, H, W, Cin = x.shape
    w1p, b1 = params["g1"]["w_packed"], params["g1"]["b_packed"]
    w2p, b2 = params["g2"]["w_packed"], params["g2"]["b_packed"]
    Cout = w1p.shape[1] // 2
    K1p = w1p.shape[0]
    assert w2p.shape[0] == 9 * Cout
    # TODO(synk): odd H/W (PyTorch AvgPool2d floors) is not handled.
    assert H % 2 == 0 and W % 2 == 0, "fused avg-pool expects even H and W"
    HW = H * W

    cols1 = _im2col_3x3(x)                       # tiny at Cin=4
    if K1p > 9 * Cin:
        cols1 = jnp.pad(cols1, ((0, 0), (0, 0), (0, K1p - 9 * Cin)))
    pool_mat = _pool_matrix(H, W)

    kernel = functools.partial(_gated_block_kernel, H=H, W=W, Cout=Cout)
    out = pl.pallas_call(
        kernel,
        out_shape=jax.ShapeDtypeStruct((B, H // 2, W // 2, Cout), jnp.bfloat16),
        grid=(B,),
        in_specs=[
            # per-batch-element layer-1 im2col block (lane-dense)
            pl.BlockSpec((None, HW, K1p), lambda b: (b, 0, 0)),
            # weights / biases / pool matrix: constant index maps -> DMA'd once
            pl.BlockSpec((K1p, 2 * Cout), lambda b: (0, 0)),
            pl.BlockSpec((1, 2 * Cout), lambda b: (0, 0)),
            pl.BlockSpec((9 * Cout, 2 * Cout), lambda b: (0, 0)),
            pl.BlockSpec((1, 2 * Cout), lambda b: (0, 0)),
            pl.BlockSpec((HW // 4, HW), lambda b: (0, 0)),
        ],
        out_specs=pl.BlockSpec((None, H // 2, W // 2, Cout),
                               lambda b: (b, 0, 0, 0)),
        compiler_params=pltpu.CompilerParams(
            dimension_semantics=("parallel",),
            vmem_limit_bytes=_vmem_limit_bytes()),
    )(cols1, w1p, b1, w2p, b2, pool_mat)
    return out.astype(jnp.float32)


# ----------------------------------------------------------------------------
# Parameters (kaiming-uniform convs, BN folded in inference mode)
# ----------------------------------------------------------------------------
def _make_gating_params(key, cin, cout, k_pad=None):
    k1, k2 = jax.random.split(key)
    fan_in = cin * 9
    bound = math.sqrt(6.0 / fan_in)                # nn.init.kaiming_uniform_
    w1 = jax.random.uniform(k1, (9, cin, cout), jnp.float32, -bound, bound)
    w2 = jax.random.uniform(k2, (9, cin, cout), jnp.float32, -bound, bound)
    # Fold inference-mode BatchNorm (gamma=1, beta=0, mean=0, var=1).
    scale = 1.0 / math.sqrt(1.0 + _BN_EPS)
    w1 = w1 * scale
    w2 = w2 * scale
    wp = jnp.concatenate([w1, w2], axis=-1).reshape(9 * cin, 2 * cout)
    if k_pad is not None and k_pad > 9 * cin:
        wp = jnp.pad(wp, ((0, k_pad - 9 * cin), (0, 0)))
    return {
        "w_packed": wp.astype(jnp.bfloat16),
        "b_packed": jnp.zeros((1, 2 * cout), jnp.float32),
        "w1": w1, "w2": w2,                        # f32 copies for the reference
    }


def init_params(key, in_channels, out_channels):
    k1, k2 = jax.random.split(key)
    return {
        "g1": _make_gating_params(k1, in_channels, out_channels,
                                  k_pad=_round_up(9 * in_channels, 128)),
        "g2": _make_gating_params(k2, out_channels, out_channels, k_pad=None),
    }


# ----------------------------------------------------------------------------
# Forward pass (GatedConvBlock.forward, pool_size=(2,2), pool_type='avg')
# ----------------------------------------------------------------------------
def forward(x_nchw, params):
    """x: (B, Cin, H, W) -> (B, Cout, H//2, W//2) f32."""
    x = jnp.transpose(x_nchw, (0, 2, 3, 1)).astype(jnp.bfloat16)   # NHWC bf16
    y = gated_conv_block(x, params)
    return jnp.transpose(y, (0, 3, 1, 2))                          # back to NCHW


# ----------------------------------------------------------------------------
# Pure-JAX reference (mirrors the bf16 casts of the kernel path)
# ----------------------------------------------------------------------------
def _ref_gating(x, w1, w2):
    cin, cout = w1.shape[1], w1.shape[2]

    def conv(w):
        wk = (w.astype(jnp.bfloat16).astype(jnp.float32)
              .reshape(3, 3, cin, cout))                           # HWIO
        return lax.conv_general_dilated(
            x, wk, (1, 1), ((1, 1), (1, 1)),
            dimension_numbers=("NHWC", "HWIO", "NHWC"),
            precision=lax.Precision.HIGHEST)

    return jax.nn.sigmoid(conv(w1)) * conv(w2)


def _avg_pool2x2(x):
    B, H, W, C = x.shape
    return x.reshape(B, H // 2, 2, W // 2, 2, C).mean(axis=(2, 4))


def ref_forward(x_nchw, params):
    x = jnp.transpose(x_nchw, (0, 2, 3, 1))
    x = x.astype(jnp.bfloat16).astype(jnp.float32)
    h = _ref_gating(x, params["g1"]["w1"], params["g1"]["w2"])
    h = h.astype(jnp.bfloat16).astype(jnp.float32)
    y = _ref_gating(h, params["g2"]["w1"], params["g2"]["w2"])
    y = y.astype(jnp.bfloat16).astype(jnp.float32)     # kernel pools bf16 values
    y = _avg_pool2x2(y)
    y = y.astype(jnp.bfloat16).astype(jnp.float32)     # kernel writes bf16
    return jnp.transpose(y, (0, 3, 1, 2))


# ----------------------------------------------------------------------------
if __name__ == "__main__":
    key = jax.random.PRNGKey(0)
    kx, kp = jax.random.split(key)

    B, CIN, H, W = 2, 4, 16, 16
    COUT = 128                                   # lane-dense output channels
    x = jax.random.normal(kx, (B, CIN, H, W), jnp.float32)
    params = init_params(kp, CIN, COUT)

    out = jax.jit(forward)(x, params)
    out = jax.block_until_ready(out)
    assert out.shape == (B, COUT, H // 2, W // 2), out.shape

    ref = ref_forward(x, params)
    err = float(jnp.max(jnp.abs(out - ref)))
    scale = float(jnp.max(jnp.abs(ref)))
    assert err <= 2e-2 * (1.0 + scale), f"mismatch vs reference: {err} (scale {scale})"

    print("KERNEL_OK")
</pallas_src>

<mosaic_0001>
module attributes {stable_mosaic.version = 11 : i64} {
  func.func @_gated_block_kernel(%arg0: i32, %arg1: memref<1x256x128xbf16, #tpu.memory_space<vmem>>, %arg2: memref<128x256xbf16, #tpu.memory_space<vmem>>, %arg3: memref<1x256xf32, #tpu.memory_space<vmem>>, %arg4: memref<1152x256xbf16, #tpu.memory_space<vmem>>, %arg5: memref<1x256xf32, #tpu.memory_space<vmem>>, %arg6: memref<64x256xbf16, #tpu.memory_space<vmem>>, %arg7: memref<1x8x8x128xbf16, #tpu.memory_space<vmem>>) attributes {dimension_semantics = [#tpu.dimension_semantics<parallel>], iteration_bounds = array<i64: 2>, scalar_prefetch = 0 : i64, scratch_operands = 0 : i64, tpu.core_type = #tpu.core_type<tc>, window_params = [{transform_indices = @transform_0, window_bounds = array<i64: 1, 256, 128>}, {pipeline_mode = #tpu.pipeline_mode<synchronous>, transform_indices = @transform_1, window_bounds = array<i64: 128, 256>}, {pipeline_mode = #tpu.pipeline_mode<synchronous>, transform_indices = @transform_2, window_bounds = array<i64: 1, 256>}, {pipeline_mode = #tpu.pipeline_mode<synchronous>, transform_indices = @transform_3, window_bounds = array<i64: 1152, 256>}, {pipeline_mode = #tpu.pipeline_mode<synchronous>, transform_indices = @transform_4, window_bounds = array<i64: 1, 256>}, {pipeline_mode = #tpu.pipeline_mode<synchronous>, transform_indices = @transform_5, window_bounds = array<i64: 64, 256>}, {transform_indices = @transform_6, window_bounds = array<i64: 1, 8, 8, 128>}]} {
    %c0 = arith.constant 0 : index
    %c0_0 = arith.constant 0 : index
    %c0_1 = arith.constant 0 : index
    %0 = vector.load %arg1[%c0, %c0_0, %c0_1] : memref<1x256x128xbf16, #tpu.memory_space<vmem>>, vector<1x256x128xbf16>
    %1 = vector.shape_cast %0 : vector<1x256x128xbf16> to vector<256x128xbf16>
    %c0_2 = arith.constant 0 : index
    %c0_3 = arith.constant 0 : index
    %2 = vector.load %arg2[%c0_2, %c0_3] : memref<128x256xbf16, #tpu.memory_space<vmem>>, vector<128x256xbf16>
    %cst = arith.constant dense<0.000000e+00> : vector<256x256xf32>
    %3 = tpu.matmul %1, %2, %cst {dimension_numbers = #tpu.dot_dimension_numbers<[1], [0], [0], [1], [0, 0, 1, 1], [], []>} : vector<256x128xbf16>, vector<128x256xbf16>, vector<256x256xf32> -> vector<256x256xf32>
    %c0_4 = arith.constant 0 : index
    %c0_5 = arith.constant 0 : index
    %4 = vector.load %arg3[%c0_4, %c0_5] : memref<1x256xf32, #tpu.memory_space<vmem>>, vector<1x256xf32>
    %5 = vector.broadcast %4 : vector<1x256xf32> to vector<256x256xf32>
    %6 = arith.addf %3, %5 : vector<256x256xf32>
    %7 = vector.extract_strided_slice %6 {offsets = [0, 0], sizes = [256, 128], strides = [1, 1]} : vector<256x256xf32> to vector<256x128xf32>
    %8 = arith.negf %7 : vector<256x128xf32>
    %9 = math.exp %8 : vector<256x128xf32>
    %cst_6 = arith.constant 1.000000e+00 : f32
    %10 = vector.broadcast %cst_6 : f32 to vector<256x128xf32>
    %11 = arith.addf %10, %9 : vector<256x128xf32>
    %12 = arith.divf %10, %11 : vector<256x128xf32>
    %13 = vector.extract_strided_slice %6 {offsets = [0, 128], sizes = [256, 128], strides = [1, 1]} : vector<256x256xf32> to vector<256x128xf32>
    %14 = arith.mulf %12, %13 : vector<256x128xf32>
    %15 = arith.truncf %14 : vector<256x128xf32> to vector<256x128xbf16>
    %16 = vector.shape_cast %15 : vector<256x128xbf16> to vector<16x16x128xbf16>
    %cst_7 = arith.constant 0.000000e+00 : bf16
    %17 = vector.broadcast %cst_7 : bf16 to vector<1x16x128xbf16>
    %cst_8 = arith.constant 0.000000e+00 : bf16
    %18 = vector.broadcast %cst_8 : bf16 to vector<18x16x128xbf16>
    %19 = tpu.concatenate %17, %16, %17 in 0 : vector<1x16x128xbf16>, vector<16x16x128xbf16>, vector<1x16x128xbf16> -> vector<18x16x128xbf16>
    %20 = tpu.concatenate %18, %19, %18 in 1 : vector<18x16x128xbf16>, vector<18x16x128xbf16>, vector<18x16x128xbf16> -> vector<18x48x128xbf16>
    %21 = vector.extract_strided_slice %20 {offsets = [0, 15, 0], sizes = [16, 16, 128], strides = [1, 1, 1]} : vector<18x48x128xbf16> to vector<16x16x128xbf16>
    %22 = vector.shape_cast %21 : vector<16x16x128xbf16> to vector<256x128xbf16>
    %23 = vector.extract_strided_slice %20 {offsets = [0, 16, 0], sizes = [16, 16, 128], strides = [1, 1, 1]} : vector<18x48x128xbf16> to vector<16x16x128xbf16>
    %24 = vector.shape_cast %23 : vector<16x16x128xbf16> to vector<256x128xbf16>
    %25 = vector.extract_strided_slice %20 {offsets = [0, 17, 0], sizes = [16, 16, 128], strides = [1, 1, 1]} : vector<18x48x128xbf16> to vector<16x16x128xbf16>
    %26 = vector.shape_cast %25 : vector<16x16x128xbf16> to vector<256x128xbf16>
    %27 = vector.extract_strided_slice %20 {offsets = [1, 15, 0], sizes = [16, 16, 128], strides = [1, 1, 1]} : vector<18x48x128xbf16> to vector<16x16x128xbf16>
    %28 = vector.shape_cast %27 : vector<16x16x128xbf16> to vector<256x128xbf16>
    %29 = vector.extract_strided_slice %20 {offsets = [1, 16, 0], sizes = [16, 16, 128], strides = [1, 1, 1]} : vector<18x48x128xbf16> to vector<16x16x128xbf16>
    %30 = vector.shape_cast %29 : vector<16x16x128xbf16> to vector<256x128xbf16>
    %31 = vector.extract_strided_slice %20 {offsets = [1, 17, 0], sizes = [16, 16, 128], strides = [1, 1, 1]} : vector<18x48x128xbf16> to vector<16x16x128xbf16>
    %32 = vector.shape_cast %31 : vector<16x16x128xbf16> to vector<256x128xbf16>
    %33 = vector.extract_strided_slice %20 {offsets = [2, 15, 0], sizes = [16, 16, 128], strides = [1, 1, 1]} : vector<18x48x128xbf16> to vector<16x16x128xbf16>
    %34 = vector.shape_cast %33 : vector<16x16x128xbf16> to vector<256x128xbf16>
    %35 = vector.extract_strided_slice %20 {offsets = [2, 16, 0], sizes = [16, 16, 128], strides = [1, 1, 1]} : vector<18x48x128xbf16> to vector<16x16x128xbf16>
    %36 = vector.shape_cast %35 : vector<16x16x128xbf16> to vector<256x128xbf16>
    %37 = vector.extract_strided_slice %20 {offsets = [2, 17, 0], sizes = [16, 16, 128], strides = [1, 1, 1]} : vector<18x48x128xbf16> to vector<16x16x128xbf16>
    %38 = vector.shape_cast %37 : vector<16x16x128xbf16> to vector<256x128xbf16>
    %39 = tpu.concatenate %22, %24, %26, %28, %30, %32, %34, %36, %38 in 1 : vector<256x128xbf16>, vector<256x128xbf16>, vector<256x128xbf16>, vector<256x128xbf16>, vector<256x128xbf16>, vector<256x128xbf16>, vector<256x128xbf16>, vector<256x128xbf16>, vector<256x128xbf16> -> vector<256x1152xbf16>
    %c0_9 = arith.constant 0 : index
    %c0_10 = arith.constant 0 : index
    %40 = vector.load %arg4[%c0_9, %c0_10] : memref<1152x256xbf16, #tpu.memory_space<vmem>>, vector<1152x256xbf16>
    %cst_11 = arith.constant dense<0.000000e+00> : vector<256x256xf32>
    %41 = tpu.matmul %39, %40, %cst_11 {dimension_numbers = #tpu.dot_dimension_numbers<[1], [0], [0], [1], [0, 0, 1, 1], [], []>} : vector<256x1152xbf16>, vector<1152x256xbf16>, vector<256x256xf32> -> vector<256x256xf32>
    %c0_12 = arith.constant 0 : index
    %c0_13 = arith.constant 0 : index
    %42 = vector.load %arg5[%c0_12, %c0_13] : memref<1x256xf32, #tpu.memory_space<vmem>>, vector<1x256xf32>
    %43 = vector.broadcast %42 : vector<1x256xf32> to vector<256x256xf32>
    %44 = arith.addf %41, %43 : vector<256x256xf32>
    %45 = vector.extract_strided_slice %44 {offsets = [0, 0], sizes = [256, 128], strides = [1, 1]} : vector<256x256xf32> to vector<256x128xf32>
    %46 = arith.negf %45 : vector<256x128xf32>
    %47 = math.exp %46 : vector<256x128xf32>
    %cst_14 = arith.constant 1.000000e+00 : f32
    %48 = vector.broadcast %cst_14 : f32 to vector<256x128xf32>
    %49 = arith.addf %48, %47 : vector<256x128xf32>
    %50 = arith.divf %48, %49 : vector<256x128xf32>
    %51 = vector.extract_strided_slice %44 {offsets = [0, 128], sizes = [256, 128], strides = [1, 1]} : vector<256x256xf32> to vector<256x128xf32>
    %52 = arith.mulf %50, %51 : vector<256x128xf32>
    %53 = arith.truncf %52 : vector<256x128xf32> to vector<256x128xbf16>
    %c0_15 = arith.constant 0 : index
    %c0_16 = arith.constant 0 : index
    %54 = vector.load %arg6[%c0_15, %c0_16] : memref<64x256xbf16, #tpu.memory_space<vmem>>, vector<64x256xbf16>
    %cst_17 = arith.constant dense<0.000000e+00> : vector<64x128xf32>
    %55 = tpu.matmul %54, %53, %cst_17 {dimension_numbers = #tpu.dot_dimension_numbers<[1], [0], [0], [1], [0, 0, 1, 1], [], []>} : vector<64x256xbf16>, vector<256x128xbf16>, vector<64x128xf32> -> vector<64x128xf32>
    %56 = vector.shape_cast %55 : vector<64x128xf32> to vector<8x8x128xf32>
    %57 = arith.truncf %56 : vector<8x8x128xf32> to vector<8x8x128xbf16>
    %c0_18 = arith.constant 0 : index
    %c0_19 = arith.constant 0 : index
    %c0_20 = arith.constant 0 : index
    %c0_21 = arith.constant 0 : index
    %58 = vector.load %arg7[%c0_18, %c0_19, %c0_20, %c0_21] : memref<1x8x8x128xbf16, #tpu.memory_space<vmem>>, vector<1x8x8x128xbf16>
    %59 = vector.shape_cast %58 : vector<1x8x8x128xbf16> to vector<8x8x128xbf16>
    %60 = vector.shape_cast %57 : vector<8x8x128xbf16> to vector<1x8x8x128xbf16>
    tpu.vector_store %arg7[%c0_18, %c0_19, %c0_20, %c0_21], %60 {strides = array<i32>} : memref<1x8x8x128xbf16, #tpu.memory_space<vmem>>, vector<1x8x8x128xbf16>,
    return
  }
  func.func @transform_0(%arg0: i32) -> (i32, i32, i32) {
    %c0_i32 = arith.constant 0 : i32
    %c0_i32_0 = arith.constant 0 : i32
    %c0_i32_1 = arith.constant 0 : i32
    return %arg0, %c0_i32, %c0_i32_0 : i32, i32, i32
  }
  func.func @transform_1(%arg0: i32) -> (i32, i32) {
    %c0_i32 = arith.constant 0 : i32
    %c0_i32_0 = arith.constant 0 : i32
    %c0_i32_1 = arith.constant 0 : i32
    return %c0_i32, %c0_i32_0 : i32, i32
  }
  func.func @transform_2(%arg0: i32) -> (i32, i32) {
    %c0_i32 = arith.constant 0 : i32
    %c0_i32_0 = arith.constant 0 : i32
    %c0_i32_1 = arith.constant 0 : i32
    return %c0_i32, %c0_i32_0 : i32, i32
  }
  func.func @transform_3(%arg0: i32) -> (i32, i32) {
    %c0_i32 = arith.constant 0 : i32
    %c0_i32_0 = arith.constant 0 : i32
    %c0_i32_1 = arith.constant 0 : i32
    return %c0_i32, %c0_i32_0 : i32, i32
  }
  func.func @transform_4(%arg0: i32) -> (i32, i32) {
    %c0_i32 = arith.constant 0 : i32
    %c0_i32_0 = arith.constant 0 : i32
    %c0_i32_1 = arith.constant 0 : i32
    return %c0_i32, %c0_i32_0 : i32, i32
  }
  func.func @transform_5(%arg0: i32) -> (i32, i32) {
    %c0_i32 = arith.constant 0 : i32
    %c0_i32_0 = arith.constant 0 : i32
    %c0_i32_1 = arith.constant 0 : i32
    return %c0_i32, %c0_i32_0 : i32, i32
  }
  func.func @transform_6(%arg0: i32) -> (i32, i32, i32, i32) {
    %c0_i32 = arith.constant 0 : i32
    %c0_i32_0 = arith.constant 0 : i32
    %c0_i32_1 = arith.constant 0 : i32
    %c0_i32_2 = arith.constant 0 : i32
    return %arg0, %c0_i32, %c0_i32_0, %c0_i32_1 : i32, i32, i32, i32
  }
}

</mosaic_0001>

<bundles_post_ra>
// kernel: forward.1
= control target key start
LH: loop header
LB: loop body
LE: loop exit
PB: predicated region body
PF: predicated region fallthrough
CT: control target
= control target key end

     0   :  { %s6303_s21 = smov 0   ;;  %s10071_s0 = inlined_call_operand.vmem [shape: bf16[2,256,128], index: 0, kind: input, shape index: {}]   ;;  %s10072_s1 = inlined_call_operand.vmem [shape: bf16[128,256], index: 1, kind: input, shape index: {}]   ;;  %s10073_s2 = inlined_call_operand.vmem [shape: f32[1,256], index: 2, kind: input, shape index: {}]   ;;  %s10074_s3 = inlined_call_operand.vmem [shape: bf16[1152,256], index: 3, kind: input, shape index: {}]   ;;  %s10075_s4 = inlined_call_operand.vmem [shape: f32[1,256], index: 4, kind: input, shape index: {}]   ;;  %s10076_s5 = inlined_call_operand.vmem [shape: bf16[64,256], index: 5, kind: input, shape index: {}]   ;;  %s10077_s6 = inlined_call_operand.vmem [shape: bf16[2,8,8,128], index: 6, kind: output, shape index: {}]  }
   0x1 LB: > { %s4957_s22 = sadd.s32 4294967295, %s6265_s21   ;;  %p4961_p0 = scmp.ge.s32.totalorder %s6265_s21, 1  ;;  %s6265_s21 = sphi %s6303_s21, %s16_s21  }
   0x2   : > { %p212_p1 = scmp.lt.s32.totalorder %s6265_s21, 3 }
   0x4   : > { %p213_p2 = pnand %p4961_p0, %p212_p1 }
   0x6   : > { %216 = sbr.rel (%p213_p2) target bundleno = 1845 (0x735), region = 44 }
   0xb   : > { %v5088_v0 = vld [vmem:[%s10072_s1 + $0x70] sm:$0xf]  ;;  %v5801_v1 = vld [vmem:[%s10072_s1 + $0x74] sm:$0xf0]  ;;  %v5800_v2 = vld [vmem:[%s10072_s1 + $0x74] sm:$0xf] }
   0xc   : > { %v5089_v3 = vor.u32 %v5801_v1, %v5088_v0  ;;  %v5090_v4 = vld [vmem:[%s10072_s1 + $0x78] sm:$0xf0]  ;;  %v5080_v5 = vld [vmem:[%s10072_s1 + $0x60] sm:$0xf]  ;;  %v5799_v6 = vld [vmem:[%s10072_s1 + $0x64] sm:$0xf0] }
   0xd   : > { %v5093_v7 = vor.u32 %v5800_v2, %v5090_v4  ;;  %v5798_v8 = vld [vmem:[%s10072_s1 + $0x64] sm:$0xf]  ;;  %v5082_v9 = vld [vmem:[%s10072_s1 + $0x68] sm:$0xf0]  ;;  %v5081_v10 = vor.u32 %v5799_v6, %v5080_v5  ;;  %v5072_v12 = vld [vmem:[%s10072_s1 + $0x50] sm:$0xf] }
   0xe   : > { %483 = vmatpush.bf16.msra.mxu0 %v5089_v3  ;;  %5977 = vmatpush.bf16.msra.mxu2 %v5089_v3  ;;  %v5085_v11 = vor.u32 %v5798_v8, %v5082_v9  ;;  %v5797_v13 = vld [vmem:[%s10072_s1 + $0x54] sm:$0xf0]  ;;  %v5796_v14 = vld [vmem:[%s10072_s1 + $0x54] sm:$0xf]  ;;  %v5074_v15 = vld [vmem:[%s10072_s1 + $0x58] sm:$0xf0] }
   0xf   : > { %572 = vmatpush.bf16.msra.mxu1 %v5093_v7  ;;  %5985 = vmatpush.bf16.msra.mxu3 %v5093_v7  ;;  %v5073_v16 = vor.u32 %v5797_v13, %v5072_v12  ;;  %v5077_v17 = vor.u32 %v5796_v14, %v5074_v15  ;;  %v5064_v18 = vld [vmem:[%s10072_s1 + $0x40] sm:$0xf]  ;;  %v5795_v19 = vld [vmem:[%s10072_s1 + $0x44] sm:$0xf0]  ;;  %v5794_v20 = vld [vmem:[%s10072_s1 + $0x44] sm:$0xf] }
  0x10   : > { %v5066_v21 = vld [vmem:[%s10072_s1 + $0x48] sm:$0xf0]  ;;  %v5065_v22 = vor.u32 %v5795_v19, %v5064_v18  ;;  %v5056_v24 = vld [vmem:[%s10072_s1 + $0x30] sm:$0xf]  ;;  %v5793_v25 = vld [vmem:[%s10072_s1 + $0x34] sm:$0xf0] }
  0x11   : > { %v5069_v23 = vor.u32 %v5794_v20, %v5066_v21  ;;  %v5792_v26 = vld [vmem:[%s10072_s1 + $0x34] sm:$0xf]  ;;  %v5058_v27 = vld [vmem:[%s10072_s1 + $0x38] sm:$0xf0]  ;;  %v5057_v28 = vor.u32 %v5793_v25, %v5056_v24  ;;  %v5048_v30 = vld [vmem:[%s10072_s1 + $0x20] sm:$0xf] }
  0x12   : > { %484 = vmatpush.bf16.msra.mxu0 %v5081_v10  ;;  %5978 = vmatpush.bf16.msra.mxu2 %v5081_v10  ;;  %v5061_v29 = vor.u32 %v5792_v26, %v5058_v27  ;;  %v5791_v31 = vld [vmem:[%s10072_s1 + $0x24] sm:$0xf0]  ;;  %p242_p3 = scmp.lt.s32.totalorder %s4957_s22, 1  ;;  %v5790_v32 = vld [vmem:[%s10072_s1 + $0x24] sm:$0xf] }
  0x13   : > { %573 = vmatpush.bf16.msra.mxu1 %v5085_v11  ;;  %5986 = vmatpush.bf16.msra.mxu3 %v5085_v11  ;;  %v5050_v33 = vld [vmem:[%s10072_s1 + $0x28] sm:$0xf0]  ;;  %v5049_v34 = vor.u32 %v5791_v31, %v5048_v30  ;;  %v5040_v36 = vld [vmem:[%s10072_s1 + $0x10] sm:$0xf]  ;;  %v5789_v37 = vld [vmem:[%s10072_s1 + $0x14] sm:$0xf0] }
  0x14   : > { %v5053_v35 = vor.u32 %v5790_v32, %v5050_v33  ;;  %s10569_s22 = smov (!%p242_p3, %s4957_s22), 1  ;;  %v5788_v38 = vld [vmem:[%s10072_s1 + $0x14] sm:$0xf]  ;;  %v5042_v39 = vld [vmem:[%s10072_s1 + $0x18] sm:$0xf0]  ;;  %v5041_v40 = vor.u32 %v5789_v37, %v5040_v36 }
  0x15   : > { %v5045_v41 = vor.u32 %v5788_v38, %v5042_v39  ;;  %v5032_v42 = vld [vmem:[%s10072_s1] sm:$0xf]  ;;  %v5787_v43 = vld [vmem:[%s10072_s1 + $0x4] sm:$0xf0]  ;;  %s5768_s15 = sshll.u32 %s10569_s22, 7 }
  0x16   : > { %485 = vmatpush.bf16.msra.mxu0 %v5073_v16  ;;  %5979 = vmatpush.bf16.msra.mxu2 %v5073_v16  ;;  %v5786_v44 = vld [vmem:[%s10072_s1 + $0x4] sm:$0xf]  ;;  %v5034_v45 = vld [vmem:[%s10072_s1 + $0x8] sm:$0xf0]  ;;  %v5033_v46 = vor.u32 %v5787_v43, %v5032_v42  ;;  %s6417_s24 = scalar_lea.vmem %s10071_s0, %s5768_s15  ;;  %v5184_v56 = vld [vmem:[%s10074_s3 + $0x70] sm:$0xf] }
  0x17   : > { %574 = vmatpush.bf16.msra.mxu1 %v5077_v17  ;;  %5987 = vmatpush.bf16.msra.mxu3 %v5077_v17  ;;  %v5037_v47 = vor.u32 %v5786_v44, %v5034_v45  ;;  %v5770_v48 = vld [vmem:[%s6417_s24] sm:$0xff]  ;;  %v5771_v49 = vld [vmem:[%s6417_s24 + $0x8] sm:$0xff]  ;;  %v5772_v50 = vld [vmem:[%s6417_s24 + $0x10] sm:$0xff]  ;;  %v10078_v44 = vmov 0   ;;  %vm1429_vm13 = vsmask.f32 256 }
  0x18   : > { %v5773_v51 = vld [vmem:[%s6417_s24 + $0x18] sm:$0xff]  ;;  %v5784_v52 = vld [vmem:[%s6417_s24 + $0x70] sm:$0xff]  ;;  %v5774_v53 = vld [vmem:[%s6417_s24 + $0x20] sm:$0xff]  ;;  %v6531_v45 = vrot.slane %v10078_v44, 7 }
  0x19   : > { %v5785_v54 = vld [vmem:[%s6417_s24 + $0x78] sm:$0xff]  ;;  %v5775_v55 = vld [vmem:[%s6417_s24 + $0x28] sm:$0xff]  ;;  %v5248_v59 = vld [vmem:[%s10074_s3 + $0xf0] sm:$0xf] }
  0x1a   : > { %486 = vmatpush.bf16.msra.mxu0 %v5065_v22  ;;  %5980 = vmatpush.bf16.msra.mxu2 %v5065_v22  ;;  %v5817_v57 = vld [vmem:[%s10074_s3 + $0x74] sm:$0xf0]  ;;  %v5776_v61 = vld [vmem:[%s6417_s24 + $0x30] sm:$0xff]  ;;  %v5176_v63 = vld [vmem:[%s10074_s3 + $0x60] sm:$0xf]  ;;  %10215 = vst [vmem:[#allocation2_spill] sm:$0xff] %v6531_v45 }
  0x1b   : > { %575 = vmatpush.bf16.msra.mxu1 %v5069_v23  ;;  %5988 = vmatpush.bf16.msra.mxu3 %v5069_v23  ;;  %v5185_v58 = vor.u32 %v5817_v57, %v5184_v56  ;;  %v5833_v60 = vld [vmem:[%s10074_s3 + $0xf4] sm:$0xf0]  ;;  %v5815_v0 = vld [vmem:[%s10074_s3 + $0x64] sm:$0xf0]  ;;  %v5240_v2 = vld [vmem:[%s10074_s3 + $0xe0] sm:$0xf] }
  0x1c   : > { %v5249_v62 = vor.u32 %v5833_v60, %v5248_v59  ;;  %v5177_v1 = vor.u32 %v5815_v0, %v5176_v63  ;;  %v5831_v3 = vld [vmem:[%s10074_s3 + $0xe4] sm:$0xf0]  ;;  %v5168_v5 = vld [vmem:[%s10074_s3 + $0x50] sm:$0xf]  ;;  %v5813_v6 = vld [vmem:[%s10074_s3 + $0x54] sm:$0xf0] }
  0x1d   : > { %v5241_v4 = vor.u32 %v5831_v3, %v5240_v2  ;;  %v5169_v7 = vor.u32 %v5813_v6, %v5168_v5  ;;  %v5232_v8 = vld [vmem:[%s10074_s3 + $0xd0] sm:$0xf]  ;;  %v5829_v9 = vld [vmem:[%s10074_s3 + $0xd4] sm:$0xf0]  ;;  %v5160_v11 = vld [vmem:[%s10074_s3 + $0x40] sm:$0xf] }
  0x1e   : > { %487 = vmatpush.bf16.msra.mxu0 %v5057_v28  ;;  %5981 = vmatpush.bf16.msra.mxu2 %v5057_v28  ;;  %v5233_v10 = vor.u32 %v5829_v9, %v5232_v8  ;;  %v5811_v12 = vld [vmem:[%s10074_s3 + $0x44] sm:$0xf0]  ;;  %v5224_v14 = vld [vmem:[%s10074_s3 + $0xc0] sm:$0xf]  ;;  %v5152_v17 = vld [vmem:[%s10074_s3 + $0x30] sm:$0xf] }
  0x1f   : > { %576 = vmatpush.bf16.msra.mxu1 %v5061_v29  ;;  %5989 = vmatpush.bf16.msra.mxu3 %v5061_v29  ;;  %v5161_v13 = vor.u32 %v5811_v12, %v5160_v11  ;;  %v5827_v15 = vld [vmem:[%s10074_s3 + $0xc4] sm:$0xf0]  ;;  %v5809_v18 = vld [vmem:[%s10074_s3 + $0x34] sm:$0xf0]  ;;  %v5216_v20 = vld [vmem:[%s10074_s3 + $0xb0] sm:$0xf] }
  0x20   : > { %v5225_v16 = vor.u32 %v5827_v15, %v5224_v14  ;;  %v5153_v19 = vor.u32 %v5809_v18, %v5152_v17  ;;  %v5825_v21 = vld [vmem:[%s10074_s3 + $0xb4] sm:$0xf0]  ;;  %v5144_v24 = vld [vmem:[%s10074_s3 + $0x20] sm:$0xf]  ;;  %v5807_v25 = vld [vmem:[%s10074_s3 + $0x24] sm:$0xf0] }
  0x21   : > { %v5777_v22 = vld [vmem:[%s6417_s24 + $0x38] sm:$0xff]  ;;  %v5217_v23 = vor.u32 %v5825_v21, %v5216_v20  ;;  %v5145_v26 = vor.u32 %v5807_v25, %v5144_v24  ;;  %v5208_v27 = vld [vmem:[%s10074_s3 + $0xa0] sm:$0xf]  ;;  %v5823_v28 = vld [vmem:[%s10074_s3 + $0xa4] sm:$0xf0] }
  0x22   : > { %488 = vmatpush.bf16.msra.mxu0 %v5049_v34  ;;  %5982 = vmatpush.bf16.msra.mxu2 %v5049_v34  ;;  %v5209_v29 = vor.u32 %v5823_v28, %v5208_v27  ;;  %v5136_v30 = vld [vmem:[%s10074_s3 + $0x10] sm:$0xf]  ;;  %v5805_v31 = vld [vmem:[%s10074_s3 + $0x14] sm:$0xf0]  ;;  %v5128_v36 = vld [vmem:[%s10074_s3] sm:$0xf] }
  0x23   : > { %577 = vmatpush.bf16.msra.mxu1 %v5053_v35  ;;  %5990 = vmatpush.bf16.msra.mxu3 %v5053_v35  ;;  %v5137_v32 = vor.u32 %v5805_v31, %v5136_v30  ;;  %v5200_v33 = vld [vmem:[%s10074_s3 + $0x90] sm:$0xf]  ;;  %v5821_v34 = vld [vmem:[%s10074_s3 + $0x94] sm:$0xf0]  ;;  %v5803_v37 = vld [vmem:[%s10074_s3 + $0x4] sm:$0xf0] }
  0x24   : > { %v5201_v35 = vor.u32 %v5821_v34, %v5200_v33  ;;  %v301_v38 = vld [vmem:[%s10073_s2] sm:$0x3]  ;;  %v5129_v39 = vor.u32 %v5803_v37, %v5128_v36  ;;  %v5779_v57 = vld [vmem:[%s6417_s24 + $0x48] sm:$0xff]  ;;  %v5780_v21 = vld [vmem:[%s6417_s24 + $0x50] sm:$0xff] }
  0x25   : > { %v6528_v43 = vperm.slane %v301_v38, 0  ;;  %v6545_v8 = vperm.slane %v301_v38, 1  ;;  %v5312_v36 = vld [vmem:[%s10074_s3 + $0x170] sm:$0xf]  ;;  %v5849_v37 = vld [vmem:[%s10074_s3 + $0x174] sm:$0xf0] }
  0x26   : > { %489 = vmatpush.bf16.msra.mxu0 %v5041_v40  ;;  %5983 = vmatpush.bf16.msra.mxu2 %v5041_v40  ;;  %v5192_v40 = vld [vmem:[%s10074_s3 + $0x80] sm:$0xf] }
  0x27   : > { %578 = vmatpush.bf16.msra.mxu1 %v5045_v41  ;;  %5991 = vmatpush.bf16.msra.mxu3 %v5045_v41  ;;  %v5819_v41 = vld [vmem:[%s10074_s3 + $0x84] sm:$0xf0] }
  0x28   : > { %v5193_v42 = vor.u32 %v5819_v41, %v5192_v40  ;;  %v5376_v40 = vld [vmem:[%s10074_s3 + $0x1f0] sm:$0xf]  ;;  %v5865_v41 = vld [vmem:[%s10074_s3 + $0x1f4] sm:$0xf0] }
  0x2a   : > { %490 = vmatpush.bf16.msra.mxu0 %v5033_v46  ;;  %5984 = vmatpush.bf16.msra.mxu2 %v5033_v46  ;;  %v5778_v46 = vld [vmem:[%s6417_s24 + $0x40] sm:$0xff] }
  0x2b   : > { %579 = vmatpush.bf16.msra.mxu1 %v5037_v47  ;;  %5992 = vmatpush.bf16.msra.mxu3 %v5037_v47 }
  0x2d   : > { %491 = vmatmul.bf16.vlgmr.msra.gmra.mxu0 %v5770_v48  ;;  %561 = vmatmul.bf16.vlgmr.msra.gmra.mxu2 %v5784_v52 }
  0x2e   : > { %580 = vmatmul.bf16.vlgmr.msra.gmra.mxu1 %v5770_v48  ;;  %650 = vmatmul.bf16.vlgmr.msra.gmra.mxu3 %v5784_v52 }
  0x2f   : > { %2522 = vmatpush.bf16.msrb.mxu2 %v5185_v58  ;;  %2611 = vmatpush.bf16.msrb.mxu3 %v5249_v62 }
  0x33   : > { %2523 = vmatpush.bf16.msrb.mxu2 %v5177_v1  ;;  %2612 = vmatpush.bf16.msrb.mxu3 %v5241_v4 }
  0x37   : > { %2524 = vmatpush.bf16.msrb.mxu2 %v5169_v7  ;;  %2613 = vmatpush.bf16.msrb.mxu3 %v5233_v10 }
  0x3b   : > { %2525 = vmatpush.bf16.msrb.mxu2 %v5161_v13  ;;  %2614 = vmatpush.bf16.msrb.mxu3 %v5225_v16 }
  0x3d   : > { %496 = vmatmul.bf16.gmra.mxu0 %v5771_v49  ;;  %566 = vmatmul.bf16.gmra.mxu2 %v5785_v54 }
  0x3e   : > { %585 = vmatmul.bf16.gmra.mxu1 %v5771_v49  ;;  %655 = vmatmul.bf16.gmra.mxu3 %v5785_v54 }
  0x3f   : > { %2526 = vmatpush.bf16.msrb.mxu2 %v5153_v19  ;;  %2615 = vmatpush.bf16.msrb.mxu3 %v5217_v23 }
  0x43   : > { %2527 = vmatpush.bf16.msrb.mxu2 %v5145_v26  ;;  %2616 = vmatpush.bf16.msrb.mxu3 %v5209_v29 }
  0x47   : > { %2528 = vmatpush.bf16.msrb.mxu2 %v5137_v32  ;;  %2617 = vmatpush.bf16.msrb.mxu3 %v5201_v35 }
  0x4b   : > { %2529 = vmatpush.bf16.msrb.mxu2 %v5129_v39  ;;  %2618 = vmatpush.bf16.msrb.mxu3 %v5193_v42 }
  0x4d   : > { %501 = vmatmul.bf16.gmra.mxu0 %v5772_v50 }
  0x4e   : > { %590 = vmatmul.bf16.gmra.mxu1 %v5772_v50  ;;  %2530 = vmatmul.bf16.vlgmr.msrb.gmra.mxu2 %v6531_v45 }
  0x4f   : > { %2619 = vmatmul.bf16.vlgmr.msrb.gmra.mxu3 %v10078_v44 }
  0x5d   : > { %506 = vmatmul.bf16.gmra.mxu0 %v5773_v51 }
  0x5e   : > { %595 = vmatmul.bf16.gmra.mxu1 %v5773_v51 }
  0x6d   : > { %511 = vmatmul.bf16.gmra.mxu0 %v5774_v53 }
  0x6e   : > { %600 = vmatmul.bf16.gmra.mxu1 %v5774_v53 }
  0x7d   : > { %516 = vmatmul.bf16.gmra.mxu0 %v5775_v55 }
  0x7e   : > { %605 = vmatmul.bf16.gmra.mxu1 %v5775_v55 }
  0x8d   : > { %521 = vmatmul.bf16.gmra.mxu0 %v5776_v61 }
  0x8e   : > { %610 = vmatmul.bf16.gmra.mxu1 %v5776_v61 }
  0x9d   : > { %526 = vmatmul.bf16.gmra.mxu0 %v5777_v22 }
  0x9e   : > { %615 = vmatmul.bf16.gmra.mxu1 %v5777_v22 }
  0xaa   : > { %v492_v47 = vpop.f32.mrf.mxu0 }
  0xab   : > { %v493_v48 = vadd.f32 %v492_v47, %v6528_v43  ;;  %v581_v49 = vpop.f32.mrf.mxu1 }
  0xac   : > { %v582_v18 = vadd.f32 %v581_v49, %v6545_v8  ;;  %v5313_v49 = vor.u32 %v5849_v37, %v5312_v36 }
  0xad   : > { %v5094_v50 = vmul.f32 -1.442695, %v493_v48  ;;  %531 = vmatmul.bf16.gmra.mxu0 %v5778_v46 }
  0xae   : > { %620 = vmatmul.bf16.gmra.mxu1 %v5778_v46  ;;  %2700 = vmatpush.bf16.msrb.mxu0 %v5313_v49 }
  0xaf   : > { %6002 = vpow2.f32 %v5094_v50 }
  0xb2   : > { %v494_v51 = vpop.f32.mrf.mxu0 }
  0xb3   : > { %v495_v52 = vadd.f32 %v494_v51, %v6528_v43  ;;  %v583_v53 = vpop.f32.mrf.mxu1 }
  0xb4   : > { %v584_v33 = vadd.f32 %v583_v53, %v6545_v8 }
  0xb5   : > { %v6003_v54 = vpop.eup %6002  ;;  %v5095_v55 = vmul.f32 -1.442695, %v495_v52  ;;  %v5377_v52 = vor.u32 %v5865_v41, %v5376_v40 }
  0xb6   : > { %v757_v56 = vadd.f32 1.0, %v6003_v54 }
  0xb7   : > { %6004 = vpow2.f32 %v5095_v55  ;;  %2789 = vmatpush.bf16.msrb.mxu1 %v5377_v52 }
  0xb8   : > { %6006 = vrcp.f32 %v757_v56  ;;  %v800_v5 = vand.u32 2147483648, %v757_v56  ;;  %v798_v9 = vand.u32 2147483647, %v757_v56  ;;  %vm794_vm1 = vweird.f32 %v757_v56 }
  0xba   : > { %v497_v58 = vpop.f32.mrf.mxu0  ;;  %v801_v16 = vor.u32 1.1754944e-38, %v800_v5  ;;  %vm799_vm3 = vcmp.eq.f32.partialorder %v798_v9, 8.507059e+37  ;;  %v5272_v9 = vld [vmem:[%s10074_s3 + $0x120] sm:$0xf] }
  0xbb   : > { %v498_v59 = vadd.f32 %v497_v58, %v6528_v43  ;;  %v6540_v60 = vpop.f32.mrf.mxu1  ;;  %v5847_v58 = vld [vmem:[%s10074_s3 + $0x164] sm:$0xf0] }
  0xbd   : > { %v6005_v61 = vpop.eup %6004  ;;  %v5096_v62 = vmul.f32 -1.442695, %v498_v59  ;;  %536 = vmatmul.bf16.gmra.mxu0 %v5779_v57 }
  0xbe   : > { %v6007_v63 = vpop.eup %6006  ;;  %v758_v0 = vadd.f32 1.0, %v6005_v61  ;;  %625 = vmatmul.bf16.gmra.mxu1 %v5779_v57  ;;  %v5304_v57 = vld [vmem:[%s10074_s3 + $0x160] sm:$0xf] }
  0xbf   : > { %v790_v1 = vmul.f32 %v6007_v63, %v757_v56  ;;  %6008 = vpow2.f32 %v5096_v62  ;;  %vm795_vm0 = vweird.f32 %v6007_v63  ;;  %v5305_v62 = vor.u32 %v5847_v58, %v5304_v57 }
  0xc0   : > { %6010 = vrcp.f32 %v758_v0  ;;  %vm796_vm2 = vmor %vm794_vm1, %vm795_vm0  ;;  %v815_v22 = vand.u32 2147483648, %v758_v0  ;;  %v813_v25 = vand.u32 2147483647, %v758_v0  ;;  %vm809_vm5 = vweird.f32 %v758_v0 }
  0xc1   : > { %v791_v2 = vsub.f32 1.0, %v790_v1  ;;  %2701 = vmatpush.bf16.msrb.mxu0 %v5305_v62 }
  0xc2   : > { %v499_v3 = vpop.f32.mrf.mxu0  ;;  %v816_v34 = vor.u32 1.1754944e-38, %v815_v22  ;;  %vm814_vm7 = vcmp.eq.f32.partialorder %v813_v25, 8.507059e+37  ;;  %v5861_v22 = vld [vmem:[%s10074_s3 + $0x1d4] sm:$0xf0] }
  0xc3   : > { %v792_v4 = vmul.f32 %v6007_v63, %v791_v2  ;;  %v500_v6 = vadd.f32 %v499_v3, %v6528_v43  ;;  %v6543_v7 = vpop.f32.mrf.mxu1 }
  0xc5   : > { %v6009_v10 = vpop.eup %6008  ;;  %v793_v11 = vadd.f32 %v6007_v63, %v792_v4  ;;  %v5097_v12 = vmul.f32 -1.442695, %v500_v6 }
  0xc6   : > { %v6011_v13 = vpop.eup %6010  ;;  %v6547_v14 = vadd.f32 1.0, %v6009_v10 }
  0xc7   : > { %v797_v15 = vsel %vm796_vm2, %v6007_v63, %v793_v11  ;;  %v805_v17 = vmul.f32 %v6011_v13, %v758_v0  ;;  %6012 = vpow2.f32 %v5097_v12  ;;  %vm810_vm4 = vweird.f32 %v6011_v13  ;;  %v5368_v63 = vld [vmem:[%s10074_s3 + $0x1e0] sm:$0xf]  ;;  %v5863_v0 = vld [vmem:[%s10074_s3 + $0x1e4] sm:$0xf0] }
  0xc8   : > { %6014 = vrcp.f32 %v6547_v14  ;;  %v802_v19 = vsel %vm799_vm3, %v801_v16, %v797_v15  ;;  %vm811_vm6 = vmor %vm809_vm5, %vm810_vm4  ;;  %v828_v50 = vand.u32 2147483647, %v6547_v14  ;;  %vm824_vm9 = vweird.f32 %v6547_v14  ;;  %v5845_v15 = vld [vmem:[%s10074_s3 + $0x154] sm:$0xf0] }
  0xc9   : > { %v806_v20 = vsub.f32 1.0, %v805_v17  ;;  %v1269_v28 = vmul.f32 %v802_v19, %v582_v18  ;;  %v830_v61 = vand.u32 2147483648, %v6547_v14  ;;  %v5369_v5 = vor.u32 %v5863_v0, %v5368_v63  ;;  %v5781_v18 = vld [vmem:[%s6417_s24 + $0x58] sm:$0xff] }
  0xca   : > { %v502_v23 = vpop.f32.mrf.mxu0  ;;  %v587_v19 = vadd.f32 %v6540_v60, %v6545_v8  ;;  %vm829_vm11 = vcmp.eq.f32.partialorder %v828_v50, 8.507059e+37 }
  0xcb   : > { %v807_v24 = vmul.f32 %v6011_v13, %v806_v20  ;;  %v503_v26 = vadd.f32 %v502_v23, %v6528_v43  ;;  %v6553_v27 = vpop.f32.mrf.mxu1  ;;  %v1301_v42 = vpack.c.bf16 %v1269_v28, %v1269_v28  ;;  %v831_v16 = vor.u32 1.1754944e-38, %v830_v61  ;;  %2790 = vmatpush.bf16.msrb.mxu1 %v5369_v5  ;;  %v5857_v61 = vld [vmem:[%s10074_s3 + $0x1b4] sm:$0xf0] }
  0xcd   : > { %v6013_v29 = vpop.eup %6012  ;;  %v808_v30 = vadd.f32 %v6011_v13, %v807_v24  ;;  %v5098_v31 = vmul.f32 -1.442695, %v503_v26  ;;  %541 = vmatmul.bf16.gmra.mxu0 %v5780_v21  ;;  %v1365_v59 = vunpack.c.l.b16 %v1301_v42 }
  0xce   : > { %v6555_v32 = vpop.eup %6014  ;;  %v6558_v35 = vadd.f32 1.0, %v6013_v29  ;;  %630 = vmatmul.bf16.gmra.mxu1 %v5780_v21  ;;  %v5360_v21 = vld [vmem:[%s10074_s3 + $0x1d0] sm:$0xf] }
  0xcf   : > { %v812_v38 = vsel %vm811_vm6, %v6011_v13, %v808_v30  ;;  %v820_v39 = vmul.f32 %v6555_v32, %v6547_v14  ;;  %6016 = vpow2.f32 %v5098_v31  ;;  %vm825_vm8 = vweird.f32 %v6555_v32  ;;  %v5296_v14 = vld [vmem:[%s10074_s3 + $0x150] sm:$0xf]  ;;  %v5288_v31 = vld [vmem:[%s10074_s3 + $0x140] sm:$0xf] }
  0xd0   : > { %v817_v46 = vsel %vm814_vm7, %v816_v34, %v812_v38  ;;  %6018 = vrcp.f32 %v6558_v35  ;;  %vm6598_vm10 = vmor %vm824_vm9, %vm825_vm8  ;;  %v843_v17 = vand.u32 2147483647, %v6558_v35  ;;  %v845_v24 = vand.u32 2147483648, %v6558_v35  ;;  %v5352_v38 = vld [vmem:[%s10074_s3 + $0x1c0] sm:$0xf] }
  0xd1   : > { %v1270_v47 = vmul.f32 %v817_v46, %v584_v33  ;;  %v821_v48 = vsub.f32 1.0, %v820_v39  ;;  %v5297_v60 = vor.u32 %v5845_v15, %v5296_v14  ;;  %v5361_v36 = vor.u32 %v5861_v22, %v5360_v21  ;;  %v5859_v39 = vld [vmem:[%s10074_s3 + $0x1c4] sm:$0xf0]  ;;  %v5336_v15 = vld [vmem:[%s10074_s3 + $0x1a0] sm:$0xf] }
  0xd2   : > { %v504_v51 = vpop.f32.mrf.mxu0  ;;  %vm839_vm14 = vweird.f32 %v6558_v35  ;;  %vm844_vm0 = vcmp.eq.f32.partialorder %v843_v17, 8.507059e+37  ;;  %v5353_v52 = vor.u32 %v5859_v39, %v5352_v38  ;;  %v5853_v38 = vld [vmem:[%s10074_s3 + $0x194] sm:$0xf0]  ;;  %v592_v39 = vadd.f32 %v6553_v27, %v6545_v8  ;;  %v5835_v27 = vld [vmem:[%s10074_s3 + $0x104] sm:$0xf0] }
  0xd3   : > { %v1302_v53 = vpack.c.bf16 %v1270_v47, %v1270_v47  ;;  %v822_v54 = vmul.f32 %v6555_v32, %v821_v48  ;;  %v505_v55 = vadd.f32 %v504_v51, %v6528_v43  ;;  %v6579_v56 = vpop.f32.mrf.mxu1  ;;  %2702 = vmatpush.bf16.msrb.mxu0 %v5297_v60  ;;  %v589_v47 = vadd.f32 %v6543_v7, %v6545_v8  ;;  %v5280_v7 = vld [vmem:[%s10074_s3 + $0x130] sm:$0xf] }
  0xd4   : > { %v846_v48 = vor.u32 1.1754944e-38, %v845_v24  ;;  %2791 = vmatpush.bf16.msrb.mxu1 %v5361_v36  ;;  %v5782_v36 = vld [vmem:[%s6417_s24 + $0x60] sm:$0xff] }
  0xd5   : > { %v6017_v1 = vpop.eup %6016  ;;  %v1366_v2 = vunpack.c.l.b16 %v1302_v53  ;;  %v823_v3 = vadd.f32 %v6555_v32, %v822_v54  ;;  %v5099_v4 = vmul.f32 -1.442695, %v505_v55  ;;  %v5841_v53 = vld [vmem:[%s10074_s3 + $0x134] sm:$0xf0] }
  0xd6   : > { %v6019_v6 = vpop.eup %6018  ;;  %v6602_v10 = vadd.f32 1.0, %v6017_v1  ;;  %v5281_v58 = vor.u32 %v5841_v53, %v5280_v7 }
  0xd7   : > { %v6604_v11 = vpack.c.b16 %v1366_v2, %v1365_v59  ;;  %v827_v12 = vsel %vm6598_vm10, %v6555_v32, %v823_v3  ;;  %v835_v13 = vmul.f32 %v6019_v6, %v6558_v35  ;;  %vm840_vm12 = vweird.f32 %v6019_v6  ;;  %v5843_v32 = vld [vmem:[%s10074_s3 + $0x144] sm:$0xf0]  ;;  %v5344_v59 = vld [vmem:[%s10074_s3 + $0x1b0] sm:$0xf] }
  0xd8   : > { %6020 = vrcp.f32 %v6602_v10  ;;  %v832_v23 = vsel %vm829_vm11, %v831_v16, %v827_v12  ;;  %v5289_v37 = vor.u32 %v5843_v32, %v5288_v31  ;;  %vm841_vm15 = vmor %vm839_vm14, %vm840_vm12  ;;  %2792 = vmatpush.bf16.msrb.mxu1 %v5353_v52  ;;  %v5839_v12 = vld [vmem:[%s10074_s3 + $0x124] sm:$0xf0]  ;;  %vm854_vm2 = vweird.f32 %v6602_v10 }
  0xd9   : > { %10218 = vst [vmem:[#allocation3_spill] sm:$0xff] %v6604_v11  ;;  %v836_v20 = vsub.f32 1.0, %v835_v13  ;;  %6022 = vpow2.f32 %v5099_v4  ;;  %2624 = vmatmul.bf16.gmra.mxu3 %v6604_v11  ;;  %v1439_v26 = vshrl.u32 %v6604_v11, 16  ;;  %v1442_v34 = vshll.u32 %v6604_v11, 16  ;;  %v5855_v16 = vld [vmem:[%s10074_s3 + $0x1a4] sm:$0xf0] }
  0xda   : > { %v507_v25 = vpop.f32.mrf.mxu0  ;;  %v1271_v40 = vmul.f32 %v832_v23, %v587_v19  ;;  %2703 = vmatpush.bf16.msrb.mxu0 %v5289_v37  ;;  %v860_v13 = vand.u32 2147483648, %v6602_v10  ;;  %v5273_v14 = vor.u32 %v5839_v12, %v5272_v9  ;;  %v858_v22 = vand.u32 2147483647, %v6602_v10  ;;  %v5328_v37 = vld [vmem:[%s10074_s3 + $0x190] sm:$0xf] }
  0xdb   : > { %v837_v28 = vmul.f32 %v6019_v6, %v836_v20  ;;  %v508_v29 = vadd.f32 %v507_v25, %v6528_v43  ;;  %v6631_v30 = vpop.f32.mrf.mxu1  ;;  %v1441_v33 = vrot.slane %v1439_v26, 7  ;;  %v5337_v60 = vor.u32 %v5855_v16, %v5336_v15 }
  0xdc   : > { %v1303_v62 = vpack.c.bf16 %v1271_v40, %v1271_v40  ;;  %v861_v32 = vor.u32 1.1754944e-38, %v860_v13  ;;  %vm859_vm4 = vcmp.eq.f32.partialorder %v858_v22, 8.507059e+37  ;;  %v5329_v7 = vor.u32 %v5853_v38, %v5328_v37 }
  0xdd   : > { %v838_v41 = vadd.f32 %v6019_v6, %v837_v28  ;;  %v5100_v42 = vmul.f32 -1.442695, %v508_v29  ;;  %546 = vmatmul.bf16.gmra.mxu0 %v5781_v18  ;;  %v1444_v49 = vor.u32 %v1442_v34, %v1441_v33  ;;  %v5264_v28 = vld [vmem:[%s10074_s3 + $0x110] sm:$0xf]  ;;  %v594_v12 = vadd.f32 %v6579_v56, %v6545_v8 }
  0xde   : > { %v6649_v46 = vpop.eup %6020  ;;  %635 = vmatmul.bf16.gmra.mxu1 %v5781_v18  ;;  %2704 = vmatpush.bf16.msrb.mxu0 %v5281_v58  ;;  %v1367_v18 = vunpack.c.l.b16 %v1303_v62  ;;  %v5851_v58 = vld [vmem:[%s10074_s3 + $0x184] sm:$0xf0] }
  0xdf   : > { %v6023_v50 = vpop.eup %6022  ;;  %v842_v51 = vsel %vm841_vm15, %v6019_v6, %v838_v41  ;;  %v850_v35 = vmul.f32 %v6649_v46, %v6602_v10  ;;  %6024 = vpow2.f32 %v5100_v42  ;;  %v6668_v57 = vsel %vm1429_vm13, %v6531_v45, %v1444_v49  ;;  %v5837_v10 = vld [vmem:[%s10074_s3 + $0x114] sm:$0xf0] }
  0xe0   : > { %v847_v54 = vsel %vm844_vm0, %v846_v48, %v842_v51  ;;  %v6664_v55 = vadd.f32 1.0, %v6023_v50  ;;  %10219 = vst [vmem:[#allocation4_spill] sm:$0xff] %v6668_v57  ;;  %2535 = vmatmul.bf16.gmra.mxu2 %v6668_v57  ;;  %v5345_v6 = vor.u32 %v5857_v61, %v5344_v59  ;;  %vm855_vm1 = vweird.f32 %v6649_v46  ;;  %v5256_v51 = vld [vmem:[%s10074_s3 + $0x100] sm:$0xf] }
  0xe1   : > { %v1272_v63 = vmul.f32 %v847_v54, %v589_v47  ;;  %v851_v0 = vsub.f32 1.0, %v850_v35  ;;  %vm6705_vm3 = vmor %vm854_vm2, %vm855_vm1  ;;  %v5265_v42 = vor.u32 %v5837_v10, %v5264_v28  ;;  %v5257_v53 = vor.u32 %v5835_v27, %v5256_v51  ;;  %v5320_v54 = vld [vmem:[%s10074_s3 + $0x180] sm:$0xf] }
  0xe2   : > { %6026 = vrcp.f32 %v6664_v55  ;;  %v509_v1 = vpop.f32.mrf.mxu0  ;;  %2793 = vmatpush.bf16.msrb.mxu1 %v5345_v6  ;;  %2705 = vmatpush.bf16.msrb.mxu0 %v5273_v14  ;;  %v875_v48 = vand.u32 2147483648, %v6664_v55  ;;  %v873_v62 = vand.u32 2147483647, %v6664_v55  ;;  %vm869_vm6 = vweird.f32 %v6664_v55 }
  0xe3   : > { %v1304_v2 = vpack.c.bf16 %v1272_v63, %v1272_v63  ;;  %v852_v3 = vmul.f32 %v6649_v46, %v851_v0  ;;  %v510_v4 = vadd.f32 %v509_v1, %v6528_v43  ;;  %v6680_v5 = vpop.f32.mrf.mxu1  ;;  %v5321_v9 = vor.u32 %v5851_v58, %v5320_v54 }
  0xe4   : > { %v876_v13 = vor.u32 1.1754944e-38, %v875_v48  ;;  %vm874_vm8 = vcmp.eq.f32.partialorder %v873_v62, 8.507059e+37  ;;  %v5783_v48 = vld [vmem:[%s6417_s24 + $0x68] sm:$0xff]  ;;  %s5769_s24 = sshll.u32 %s10569_s22, 5 }
  0xe5   : > { %v6025_v17 = vpop.eup %6024  ;;  %v1368_v19 = vunpack.c.l.b16 %v1304_v2  ;;  %v853_v20 = vadd.f32 %v6649_v46, %v852_v3  ;;  %v5101_v21 = vmul.f32 -1.442695, %v510_v4  ;;  %s251_s7 = scalar_lea.vmem %s10077_s6, %s5769_s24 }
  0xe6   : > { %v6699_v23 = vadd.f32 1.0, %v6025_v17  ;;  %2794 = vmatpush.bf16.msrb.mxu1 %v5337_v60  ;;  %2706 = vmatpush.bf16.msrb.mxu0 %v5265_v42 }
  0xe7   : > { %v6701_v24 = vpack.c.b16 %v1368_v19, %v1367_v18  ;;  %6028 = vpow2.f32 %v5101_v21  ;;  %v857_v31 = vsel %vm6705_vm3, %v6649_v46, %v853_v20 }
  0xe8   : > { %v6027_v29 = vpop.eup %6026  ;;  %6030 = vrcp.f32 %v6699_v23  ;;  %v862_v46 = vsel %vm859_vm4, %v861_v32, %v857_v31  ;;  %v890_v22 = vand.u32 2147483648, %v6699_v23  ;;  %vm884_vm10 = vweird.f32 %v6699_v23 }
  0xe9   : > { %10220 = vst [vmem:[#allocation5_spill] sm:$0xff] %v6701_v24  ;;  %v865_v33 = vmul.f32 %v6027_v29, %v6664_v55  ;;  %2629 = vmatmul.bf16.gmra.mxu3 %v6701_v24  ;;  %v1447_v41 = vshrl.u32 %v6701_v24, 16  ;;  %v1450_v52 = vshll.u32 %v6701_v24, 16  ;;  %vm870_vm5 = vweird.f32 %v6027_v29 }
  0xea   : > { %v512_v40 = vpop.f32.mrf.mxu0  ;;  %v1273_v1 = vmul.f32 %v862_v46, %v592_v39  ;;  %2795 = vmatpush.bf16.msrb.mxu1 %v5329_v7  ;;  %vm871_vm7 = vmor %vm869_vm6, %vm870_vm5  ;;  %2707 = vmatpush.bf16.msrb.mxu0 %v5257_v53  ;;  %v888_v10 = vand.u32 2147483647, %v6699_v23  ;;  %v891_v42 = vor.u32 1.1754944e-38, %v890_v22  ;;  %v597_v46 = vadd.f32 %v6631_v30, %v6545_v8 }
  0xeb   : > { %v866_v47 = vsub.f32 1.0, %v865_v33  ;;  %v513_v49 = vadd.f32 %v512_v40, %v6528_v43  ;;  %v6733_v50 = vpop.f32.mrf.mxu1  ;;  %v1449_v35 = vrot.slane %v1447_v41, 7  ;;  %v599_v30 = vadd.f32 %v6680_v5, %v6545_v8 }
  0xec   : > { %v1305_v16 = vpack.c.bf16 %v1273_v1, %v1273_v1  ;;  %vm889_vm12 = vcmp.eq.f32.partialorder %v888_v10, 8.507059e+37 }
  0xed   : > { %v6029_v59 = vpop.eup %6028  ;;  %v867_v61 = vmul.f32 %v6027_v29, %v866_v47  ;;  %v5102_v63 = vmul.f32 -1.442695, %v513_v49  ;;  %551 = vmatmul.bf16.gmra.mxu0 %v5782_v36  ;;  %v1452_v3 = vor.u32 %v1450_v52, %v1449_v35 }
  0xee   : > { %v6031_v0 = vpop.eup %6030  ;;  %v6752_v2 = vadd.f32 1.0, %v6029_v59  ;;  %640 = vmatmul.bf16.gmra.mxu1 %v5782_v36  ;;  %v562_v36 = vpop.f32.mrf.mxu2  ;;  %v1369_v37 = vunpack.c.l.b16 %v1305_v16 }
  0xef   : > { %v868_v4 = vadd.f32 %v6027_v29, %v867_v61  ;;  %v880_v6 = vmul.f32 %v6031_v0, %v6699_v23  ;;  %6032 = vpow2.f32 %v5102_v63  ;;  %v6763_v15 = vsel %vm1429_vm13, %v6531_v45, %v1452_v3  ;;  %2796 = vmatpush.bf16.msrb.mxu1 %v5321_v9 }
  0xf0   : > { %6034 = vrcp.f32 %v6752_v2  ;;  %10223 = vst [vmem:[#allocation6_spill] sm:$0xff] %v6763_v15  ;;  %2540 = vmatmul.bf16.gmra.mxu2 %v6763_v15  ;;  %vm885_vm9 = vweird.f32 %v6031_v0  ;;  %v905_v51 = vand.u32 2147483648, %v6752_v2  ;;  %v903_v7 = vand.u32 2147483647, %v6752_v2 }
  0xf1   : > { %v872_v55 = vsel %vm871_vm7, %v6027_v29, %v868_v4  ;;  %v881_v14 = vsub.f32 1.0, %v880_v6  ;;  %vm6772_vm11 = vmor %vm884_vm10, %vm885_vm9  ;;  %v563_v59 = vadd.f32 %v562_v36, %v6528_v43  ;;  %vm899_vm15 = vweird.f32 %v6752_v2 }
  0xf2   : > { %v877_v17 = vsel %vm874_vm8, %v876_v13, %v872_v55  ;;  %v514_v18 = vpop.f32.mrf.mxu0  ;;  %v906_v1 = vor.u32 1.1754944e-38, %v905_v51  ;;  %vm904_vm1 = vcmp.eq.f32.partialorder %v903_v7, 8.507059e+37  ;;  %v1578_v7 = vrot.slane %v1442_v34, 1 }
  0xf3   : > { %v1274_v19 = vmul.f32 %v877_v17, %v594_v12  ;;  %v882_v56 = vmul.f32 %v6031_v0, %v881_v14  ;;  %v515_v20 = vadd.f32 %v514_v18, %v6528_v43  ;;  %v6767_v21 = vpop.f32.mrf.mxu1  ;;  %v5122_v5 = vmul.f32 -1.442695, %v563_v59 }
  0xf4   : > { %vm1574_vm9 = vsmask.f32 7424 }
  0xf5   : > { %v6033_v25 = vpop.eup %6032  ;;  %v1306_v60 = vpack.c.bf16 %v1274_v19, %v1274_v19  ;;  %v883_v28 = vadd.f32 %v6031_v0, %v882_v56  ;;  %v5103_v33 = vmul.f32 -1.442695, %v515_v20 }
  0xf6   : > { %v6035_v29 = vpop.eup %6034  ;;  %v6776_v32 = vadd.f32 1.0, %v6033_v25  ;;  %v6804_v55 = vpop.f32.mrf.mxu2 }
  0xf7   : > { %v1370_v38 = vunpack.c.l.b16 %v1306_v60  ;;  %v887_v39 = vsel %vm6772_vm11, %v6031_v0, %v883_v28  ;;  %v895_v40 = vmul.f32 %v6035_v29, %v6752_v2  ;;  %vm900_vm14 = vweird.f32 %v6035_v29 }
  0xf8   : > { %6036 = vrcp.f32 %v6776_v32  ;;  %v892_v49 = vsel %vm889_vm12, %v891_v42, %v887_v39  ;;  %vm901_vm0 = vmor %vm899_vm15, %vm900_vm14  ;;  %v920_v36 = vand.u32 2147483648, %v6776_v32  ;;  %vm914_vm3 = vweird.f32 %v6776_v32 }
  0xf9   : > { %v6782_v23 = vpack.c.b16 %v1370_v38, %v1369_v37  ;;  %v896_v47 = vsub.f32 1.0, %v895_v40  ;;  %6038 = vpow2.f32 %v5103_v33  ;;  %v1275_v61 = vmul.f32 %v892_v49, %v597_v46 }
  0xfa   : > { %v517_v27 = vpop.f32.mrf.mxu0  ;;  %v918_v40 = vand.u32 2147483647, %v6776_v32  ;;  %v921_v51 = vor.u32 1.1754944e-38, %v920_v36 }
  0xfb   : > { %10226 = vst [vmem:[#allocation7_spill] sm:$0xff] %v6782_v23  ;;  %v897_v35 = vmul.f32 %v6035_v29, %v896_v47  ;;  %2634 = vmatmul.bf16.gmra.mxu3 %v6782_v23  ;;  %v518_v53 = vadd.f32 %v517_v27, %v6528_v43  ;;  %v6791_v54 = vpop.f32.mrf.mxu1  ;;  %v1455_v58 = vshrl.u32 %v6782_v23, 16  ;;  %v1458_v4 = vshll.u32 %v6782_v23, 16 }
  0xfc   : > { %v1307_v14 = vpack.c.bf16 %v1275_v61, %v1275_v61  ;;  %vm919_vm5 = vcmp.eq.f32.partialorder %v918_v40, 8.507059e+37 }
  0xfd   : > { %v898_v62 = vadd.f32 %v6035_v29, %v897_v35  ;;  %v5104_v63 = vmul.f32 -1.442695, %v518_v53  ;;  %556 = vmatmul.bf16.gmra.mxu0 %v5783_v48  ;;  %v1457_v3 = vrot.slane %v1455_v58, 7 }
  0xfe   : > { %v6037_v0 = vpop.eup %6036  ;;  %645 = vmatmul.bf16.gmra.mxu1 %v5783_v48  ;;  %v1371_v10 = vunpack.c.l.b16 %v1307_v14  ;;  %v567_v53 = vpop.f32.mrf.mxu2  ;;  %v1579_v14 = vor.u32 %v1578_v7, %v1439_v26 }
  0xff   : > { %v902_v6 = vsel %vm901_vm0, %v6035_v29, %v898_v62  ;;  %v910_v9 = vmul.f32 %v6037_v0, %v6776_v32  ;;  %6040 = vpow2.f32 %v5104_v63  ;;  %v6039_v12 = vpop.eup %6038  ;;  %v1460_v2 = vor.u32 %v1458_v4, %v1457_v3 }
 0x100   : > { %v907_v13 = vsel %vm904_vm1, %v906_v1, %v902_v6  ;;  %6042 = vpow2.f32 %v5122_v5  ;;  %v6806_v18 = vadd.f32 1.0, %v6039_v12  ;;  %vm915_vm2 = vweird.f32 %v6037_v0 }
 0x101   : > { %v1276_v16 = vmul.f32 %v907_v13, %v599_v30  ;;  %v911_v17 = vsub.f32 1.0, %v910_v9  ;;  %v6810_v19 = vsel %vm1429_vm13, %v6531_v45, %v1460_v2  ;;  %vm6824_vm4 = vmor %vm914_vm3, %vm915_vm2  ;;  %v6836_v32 = vrot.slane %v10078_v44, 1 }
 0x102   : > { %10227 = vst [vmem:[#allocation8_spill] sm:$0xff] %v6810_v19  ;;  %v519_v56 = vpop.f32.mrf.mxu0  ;;  %6044 = vrcp.f32 %v6806_v18  ;;  %2545 = vmatmul.bf16.gmra.mxu2 %v6810_v19  ;;  %v602_v30 = vadd.f32 %v6733_v50, %v6545_v8  ;;  %v935_v34 = vand.u32 2147483648, %v6806_v18  ;;  %v933_v6 = vand.u32 2147483647, %v6806_v18 }
 0x103   : > { %v1308_v20 = vpack.c.bf16 %v1276_v16, %v1276_v16  ;;  %v912_v22 = vmul.f32 %v6037_v0, %v911_v17  ;;  %v6814_v25 = vpop.f32.mrf.mxu1  ;;  %v520_v60 = vadd.f32 %v519_v56, %v6528_v43  ;;  %10231 = vst [vmem:[#allocation10_spill] sm:$0xff] %v6836_v32  ;;  %vm929_vm7 = vweird.f32 %v6806_v18 }
 0x104   : > { %vm934_vm10 = vcmp.eq.f32.partialorder %v933_v6, 8.507059e+37  ;;  %v568_v40 = vadd.f32 %v567_v53, %v6528_v43  ;;  %v607_v6 = vadd.f32 %v6791_v54, %v6545_v8 }
 0x105   : > { %v6041_v28 = vpop.eup %6040  ;;  %v1372_v29 = vunpack.c.l.b16 %v1308_v20  ;;  %v913_v31 = vadd.f32 %v6037_v0, %v912_v22  ;;  %v5105_v38 = vmul.f32 -1.442695, %v520_v60  ;;  %v936_v20 = vor.u32 1.1754944e-38, %v935_v34 }
 0x106   : > { %v6043_v33 = vpop.eup %6042  ;;  %v6818_v37 = vadd.f32 1.0, %v6041_v28  ;;  %v1581_v60 = vrot.slane %v1450_v52, 1  ;;  %v604_v28 = vadd.f32 %v6767_v21, %v6545_v8  ;;  %v6884_v21 = vsel %vm1574_vm9, %v1579_v14, %v6836_v32  ;;  %v569_v42 = vpop.f32.mrf.mxu2 }
 0x107   : > { %v6820_v39 = vpack.c.b16 %v1372_v29, %v1371_v10  ;;  %v917_v47 = vsel %vm6824_vm4, %v6037_v0, %v913_v31  ;;  %v6831_v48 = vadd.f32 1.0, %v6043_v33  ;;  %10233 = vst [vmem:[#allocation12_spill] sm:$0xff] %v6884_v21 }
 0x108   : > { %6046 = vrcp.f32 %v6818_v37  ;;  %v6045_v46 = vpop.eup %6044  ;;  %v922_v63 = vsel %vm919_vm5, %v921_v51, %v917_v47  ;;  %vm944_vm12 = vweird.f32 %v6818_v37  ;;  %v950_v51 = vand.u32 2147483648, %v6818_v37 }
 0x109   : > { %10228 = vst [vmem:[#allocation9_spill] sm:$0xff] %v6820_v39  ;;  %6048 = vpow2.f32 %v5105_v38  ;;  %v1463_v49 = vshrl.u32 %v6820_v39, 16  ;;  %v925_v27 = vmul.f32 %v6045_v46, %v6806_v18  ;;  %v1466_v1 = vshll.u32 %v6820_v39, 16 }
 0x10a   : > { %v522_v35 = vpop.f32.mrf.mxu0  ;;  %6050 = vrcp.f32 %v6831_v48  ;;  %vm930_vm6 = vweird.f32 %v6045_v46  ;;  %v1277_v13 = vmul.f32 %v922_v63, %v602_v30  ;;  %v948_v7 = vand.u32 2147483647, %v6818_v37 }
 0x10b   : > { %2639 = vmatmul.bf16.gmra.mxu3 %v6820_v39  ;;  %v523_v59 = vadd.f32 %v522_v35, %v6528_v43  ;;  %v6844_v61 = vpop.f32.mrf.mxu1  ;;  %v1465_v62 = vrot.slane %v1463_v49, 7  ;;  %v926_v0 = vsub.f32 1.0, %v925_v27  ;;  %vm931_vm8 = vmor %vm929_vm7, %vm930_vm6  ;;  %v570_v63 = vadd.f32 %v569_v42, %v6528_v43 }
 0x10c   : > { %v1309_v29 = vpack.c.bf16 %v1277_v13, %v1277_v13  ;;  %vm949_vm15 = vcmp.eq.f32.partialorder %v948_v7, 8.507059e+37  ;;  %vm1214_vm4 = vweird.f32 %v6831_v48 }
 0x10d   : > { %v5106_v3 = vmul.f32 -1.442695, %v523_v59  ;;  %2708 = vmatmul.bf16.vlgmr.msrb.gmra.mxu0 %v6836_v32  ;;  %v927_v5 = vmul.f32 %v6045_v46, %v926_v0  ;;  %v1468_v9 = vor.u32 %v1466_v1, %v1465_v62  ;;  %v6902_v0 = vor.u32 %v1581_v60, %v1447_v41 }
 0x10e   : > { %v6852_v50 = vpop.eup %6046  ;;  %2797 = vmatmul.bf16.vlgmr.msrb.gmra.mxu1 %v6668_v57  ;;  %v1373_v62 = vunpack.c.l.b16 %v1309_v29  ;;  %v5125_v60 = vmul.f32 -1.442695, %v570_v63 }
 0x10f   : > { %v6049_v12 = vpop.eup %6048  ;;  %v940_v2 = vmul.f32 %v6852_v50, %v6818_v37  ;;  %6052 = vpow2.f32 %v5106_v3  ;;  %v928_v16 = vadd.f32 %v6045_v46, %v927_v5  ;;  %v6867_v56 = vsel %vm1429_vm13, %v6531_v45, %v1468_v9 }
 0x110   : > { %v6863_v17 = vadd.f32 1.0, %v6049_v12  ;;  %10232 = vst [vmem:[#allocation11_spill] sm:$0xff] %v6867_v56  ;;  %v6874_v10 = vpop.eup %6050  ;;  %vm945_vm11 = vweird.f32 %v6852_v50  ;;  %v5124_v5 = vmul.f32 -1.442695, %v568_v40  ;;  %v951_v9 = vor.u32 1.1754944e-38, %v950_v51 }
 0x111   : > { %v941_v22 = vsub.f32 1.0, %v940_v2  ;;  %v932_v26 = vsel %vm931_vm8, %v6045_v46, %v928_v16  ;;  %v1210_v59 = vmul.f32 %v6874_v10, %v6831_v48  ;;  %vm6895_vm14 = vmor %vm944_vm12, %vm945_vm11  ;;  %v609_v12 = vadd.f32 %v6814_v25, %v6545_v8 }
 0x112   : > { %6054 = vrcp.f32 %v6863_v17  ;;  %v524_v18 = vpop.f32.mrf.mxu0  ;;  %v937_v31 = vsel %vm934_vm10, %v936_v20, %v932_v26  ;;  %2550 = vmatmul.bf16.gmra.mxu2 %v6867_v56  ;;  %v6917_v2 = vadd.f32 %v6844_v61, %v6545_v8  ;;  %v963_v25 = vand.u32 2147483647, %v6863_v17 }
 0x113   : > { %v942_v33 = vmul.f32 %v6852_v50, %v941_v22  ;;  %v525_v36 = vadd.f32 %v524_v18, %v6528_v43  ;;  %v6879_v38 = vpop.f32.mrf.mxu1  ;;  %v1278_v52 = vmul.f32 %v937_v31, %v604_v28  ;;  %v1211_v14 = vsub.f32 1.0, %v1210_v59 }
 0x114   : > { %v965_v28 = vand.u32 2147483648, %v6863_v17  ;;  %vm959_vm0 = vweird.f32 %v6863_v17  ;;  %vm964_vm3 = vcmp.eq.f32.partialorder %v963_v25, 8.507059e+37  ;;  %vm1215_vm5 = vweird.f32 %v6874_v10 }
 0x115   : > { %v6053_v46 = vpop.eup %6052  ;;  %v943_v47 = vadd.f32 %v6852_v50, %v942_v33  ;;  %v5107_v27 = vmul.f32 -1.442695, %v525_v36  ;;  %v1310_v35 = vpack.c.bf16 %v1278_v52, %v1278_v52  ;;  %v1212_v40 = vmul.f32 %v6874_v10, %v1211_v14  ;;  %vm6961_vm8 = vmor %vm1214_vm4, %vm1215_vm5 }
 0x116   : > { %v6891_v30 = vadd.f32 1.0, %v6053_v46 }
 0x117   : > { %6056 = vpow2.f32 %v5107_v27  ;;  %v1374_v3 = vunpack.c.l.b16 %v1310_v35  ;;  %v947_v37 = vsel %vm6895_vm14, %v6852_v50, %v943_v47  ;;  %v966_v47 = vor.u32 1.1754944e-38, %v965_v28 }
 0x118   : > { %v6055_v34 = vpop.eup %6054  ;;  %6058 = vrcp.f32 %v6891_v30  ;;  %v952_v16 = vsel %vm949_vm15, %v951_v9, %v947_v37  ;;  %v1213_v63 = vadd.f32 %v6874_v10, %v1212_v40  ;;  %vm974_vm6 = vweird.f32 %v6891_v30 }
 0x119   : > { %v955_v13 = vmul.f32 %v6055_v34, %v6863_v17  ;;  %v6913_v41 = vpack.c.b16 %v1374_v3, %v1373_v62  ;;  %6060 = vpow2.f32 %v5124_v5  ;;  %vm960_vm1 = vweird.f32 %v6055_v34 }
 0x11a   : > { %v527_v50 = vpop.f32.mrf.mxu0  ;;  %v1279_v33 = vmul.f32 %v952_v16, %v607_v6  ;;  %vm961_vm2 = vmor %vm959_vm0, %vm960_vm1  ;;  %v1218_v3 = vand.u32 2147483647, %v6831_v48  ;;  %v1217_v40 = vsel %vm6961_vm8, %v6874_v10, %v1213_v63 }
 0x11b   : > { %10236 = vst [vmem:[#allocation13_spill] sm:$0xff] %v6913_v41  ;;  %v956_v20 = vsub.f32 1.0, %v955_v13  ;;  %v528_v22 = vadd.f32 %v527_v50, %v6528_v43  ;;  %v6920_v54 = vpop.f32.mrf.mxu1  ;;  %2644 = vmatmul.bf16.gmra.mxu3 %v6913_v41  ;;  %v1471_v26 = vshrl.u32 %v6913_v41, 16  ;;  %v1474_v46 = vshll.u32 %v6913_v41, 16 }
 0x11c   : > { %v1311_v59 = vpack.c.bf16 %v1279_v33, %v1279_v33  ;;  %v1220_v13 = vand.u32 2147483648, %v6831_v48  ;;  %vm1219_vm11 = vcmp.eq.f32.partialorder %v1218_v3, 8.507059e+37 }
 0x11d   : > { %v6057_v61 = vpop.eup %6056  ;;  %v957_v18 = vmul.f32 %v6055_v34, %v956_v20  ;;  %v5108_v29 = vmul.f32 -1.442695, %v528_v22  ;;  %2713 = vmatmul.bf16.gmra.mxu0 %v6884_v21  ;;  %v1473_v52 = vrot.slane %v1471_v26, 7  ;;  %v978_v20 = vand.u32 2147483647, %v6891_v30 }
 0x11e   : > { %v6928_v31 = vpop.eup %6058  ;;  %v6930_v36 = vadd.f32 1.0, %v6057_v61  ;;  %2802 = vmatmul.bf16.gmra.mxu1 %v6763_v15  ;;  %v980_v22 = vand.u32 2147483648, %v6891_v30 }
 0x11f   : > { %v958_v42 = vadd.f32 %v6055_v34, %v957_v18  ;;  %v970_v17 = vmul.f32 %v6928_v31, %v6891_v30  ;;  %6062 = vpow2.f32 %v5108_v29  ;;  %v1476_v35 = vor.u32 %v1474_v46, %v1473_v52  ;;  %v6061_v7 = vpop.eup %6060  ;;  %v651_v18 = vpop.f32.mrf.mxu3 }
 0x120   : > { %6064 = vrcp.f32 %v6930_v36  ;;  %vm975_vm7 = vweird.f32 %v6928_v31  ;;  %v1221_v29 = vor.u32 1.1754944e-38, %v1220_v13  ;;  %v652_v30 = vadd.f32 %v651_v18, %v6545_v8 }
 0x121   : > { %v962_v51 = vsel %vm961_vm2, %v6055_v34, %v958_v42  ;;  %v971_v27 = vsub.f32 1.0, %v970_v17  ;;  %v6949_v34 = vsel %vm1429_vm13, %v6531_v45, %v1476_v35  ;;  %6066 = vpow2.f32 %v5125_v60  ;;  %vm6975_vm10 = vmor %vm974_vm6, %vm975_vm7 }
 0x122   : > { %v967_v62 = vsel %vm964_vm3, %v966_v47, %v962_v51  ;;  %v529_v53 = vpop.f32.mrf.mxu0  ;;  %10237 = vst [vmem:[#allocation14_spill] sm:$0xff] %v6949_v34  ;;  %2555 = vmatmul.bf16.gmra.mxu2 %v6949_v34  ;;  %v1375_v60 = vunpack.c.l.b16 %v1311_v59  ;;  %v6987_v17 = vadd.f32 1.0, %v6061_v7  ;;  %vm979_vm12 = vcmp.eq.f32.partialorder %v978_v20, 8.507059e+37 }
 0x123   : > { %v1280_v37 = vmul.f32 %v967_v62, %v609_v12  ;;  %v972_v5 = vmul.f32 %v6928_v31, %v971_v27  ;;  %v530_v6 = vadd.f32 %v529_v53, %v6528_v43  ;;  %v6952_v9 = vpop.f32.mrf.mxu1  ;;  %v981_v51 = vor.u32 1.1754944e-38, %v980_v22 }
 0x124   : > { %v993_v59 = vand.u32 2147483647, %v6930_v36  ;;  %v995_v10 = vand.u32 2147483648, %v6930_v36  ;;  %v1222_v53 = vsel %vm1219_vm11, %v1221_v29, %v1217_v40  ;;  %v614_v12 = vadd.f32 %v6879_v38, %v6545_v8 }
 0x125   : > { %v6063_v50 = vpop.eup %6062  ;;  %v1312_v14 = vpack.c.bf16 %v1280_v37, %v1280_v37  ;;  %v973_v16 = vadd.f32 %v6928_v31, %v972_v5  ;;  %v5109_v61 = vmul.f32 -1.442695, %v530_v6  ;;  %v6999_v37 = vmul.f32 %v1222_v53, %v652_v30 }
 0x126   : > { %v6065_v25 = vpop.eup %6064  ;;  %v6969_v28 = vadd.f32 1.0, %v6063_v50  ;;  %v7004_v5 = vsel %vm1574_vm9, %v6902_v0, %v6836_v32  ;;  %vm989_vm15 = vweird.f32 %v6930_v36  ;;  %v996_v20 = vor.u32 1.1754944e-38, %v995_v10 }
 0x127   : > { %v1376_v33 = vunpack.c.l.b16 %v1312_v14  ;;  %v985_v52 = vmul.f32 %v6065_v25, %v6930_v36  ;;  %v977_v42 = vsel %vm6975_vm10, %v6928_v31, %v973_v16  ;;  %v6067_v35 = vpop.eup %6066  ;;  %vm990_vm14 = vweird.f32 %v6065_v25  ;;  %10243 = vst [vmem:[#allocation16_spill] sm:$0xff] %v7004_v5  ;;  %v7023_v18 = vpop.f32.mrf.mxu3 }
 0x128   : > { %6068 = vrcp.f32 %v6969_v28  ;;  %v982_v31 = vsel %vm979_vm12, %v981_v51, %v977_v42  ;;  %vm991_vm0 = vmor %vm989_vm15, %vm990_vm14  ;;  %vm994_vm1 = vcmp.eq.f32.partialorder %v993_v59, 8.507059e+37  ;;  %v1584_v29 = vrot.slane %v1458_v4, 1 }
 0x129   : > { %v6990_v47 = vpack.c.b16 %v1376_v33, %v1375_v60  ;;  %v986_v27 = vsub.f32 1.0, %v985_v52  ;;  %6070 = vpow2.f32 %v5109_v61  ;;  %v1281_v16 = vmul.f32 %v982_v31, %v6917_v2 }
 0x12a   : > { %v532_v62 = vpop.f32.mrf.mxu0  ;;  %6072 = vrcp.f32 %v6987_v17  ;;  %v7037_v59 = vadd.f32 1.0, %v6067_v35  ;;  %v1008_v10 = vand.u32 2147483647, %v6969_v28  ;;  %v1585_v53 = vor.u32 %v1584_v29, %v1455_v58 }
 0x12b   : > { %10242 = vst [vmem:[#allocation15_spill] sm:$0xff] %v6990_v47  ;;  %v987_v63 = vmul.f32 %v6065_v25, %v986_v27  ;;  %v533_v7 = vadd.f32 %v532_v62, %v6528_v43  ;;  %v6995_v3 = vpop.f32.mrf.mxu1  ;;  %2649 = vmatmul.bf16.gmra.mxu3 %v6990_v47  ;;  %v1479_v6 = vshrl.u32 %v6990_v47, 16  ;;  %v1482_v38 = vshll.u32 %v6990_v47, 16 }
 0x12c   : > { %v1313_v40 = vpack.c.bf16 %v1281_v16, %v1281_v16  ;;  %vm1004_vm3 = vweird.f32 %v6969_v28  ;;  %vm1009_vm5 = vcmp.eq.f32.partialorder %v1008_v10, 8.507059e+37  ;;  %vm1244_vm7 = vweird.f32 %v6987_v17 }
 0x12d   : > { %v988_v13 = vadd.f32 %v6065_v25, %v987_v63  ;;  %v5110_v50 = vmul.f32 -1.442695, %v533_v7  ;;  %2718 = vmatmul.bf16.gmra.mxu0 %v7004_v5  ;;  %v1481_v0 = vrot.slane %v1479_v6, 7 }
 0x12e   : > { %v7011_v14 = vpop.eup %6068  ;;  %2807 = vmatmul.bf16.gmra.mxu1 %v6810_v19 }
 0x12f   : > { %v992_v22 = vsel %vm991_vm0, %v6065_v25, %v988_v13  ;;  %v1000_v36 = vmul.f32 %v7011_v14, %v6969_v28  ;;  %6074 = vpow2.f32 %v5110_v50  ;;  %v6071_v60 = vpop.eup %6070  ;;  %v1484_v2 = vor.u32 %v1482_v38, %v1481_v0 }
 0x130   : > { %v997_v61 = vsel %vm994_vm1, %v996_v20, %v992_v22  ;;  %v7027_v52 = vadd.f32 1.0, %v6071_v60  ;;  %v7029_v25 = vpop.eup %6072  ;;  %vm1005_vm2 = vweird.f32 %v7011_v14  ;;  %v1010_v13 = vand.u32 2147483648, %v6969_v28 }
 0x131   : > { %v1282_v33 = vmul.f32 %v997_v61, %v614_v12  ;;  %v1001_v48 = vsub.f32 1.0, %v1000_v36  ;;  %v7033_v42 = vsel %vm1429_vm13, %v6531_v45, %v1484_v2  ;;  %v1240_v35 = vmul.f32 %v7029_v25, %v6987_v17  ;;  %vm7057_vm4 = vmor %vm1004_vm3, %vm1005_vm2 }
 0x132   : > { %10244 = vst [vmem:[#allocation17_spill] sm:$0xff] %v7033_v42  ;;  %v534_v30 = vpop.f32.mrf.mxu0  ;;  %6076 = vrcp.f32 %v7027_v52  ;;  %2560 = vmatmul.bf16.gmra.mxu2 %v7033_v42  ;;  %v1377_v12 = vunpack.c.l.b16 %v1313_v40  ;;  %v617_v36 = vadd.f32 %v6920_v54, %v6545_v8  ;;  %v7069_v28 = vsel %vm1574_vm9, %v1585_v53, %v6836_v32 }
 0x133   : > { %v1314_v51 = vpack.c.bf16 %v1282_v33, %v1282_v33  ;;  %v1002_v27 = vmul.f32 %v7011_v14, %v1001_v48  ;;  %v7039_v4 = vpop.f32.mrf.mxu1  ;;  %v535_v62 = vadd.f32 %v534_v30, %v6528_v43  ;;  %6078 = vrcp.f32 %v7037_v59  ;;  %10248 = vst [vmem:[#allocation19_spill] sm:$0xff] %v7069_v28  ;;  %v656_v33 = vpop.f32.mrf.mxu3 }
 0x134   : > { %v1241_v58 = vsub.f32 1.0, %v1240_v35  ;;  %v1011_v61 = vor.u32 1.1754944e-38, %v1010_v13  ;;  %vm1019_vm6 = vweird.f32 %v7027_v52  ;;  %v1023_v54 = vand.u32 2147483647, %v7027_v52 }
 0x135   : > { %v6075_v31 = vpop.eup %6074  ;;  %v1378_v63 = vunpack.c.l.b16 %v1314_v51  ;;  %v1003_v7 = vadd.f32 %v7011_v14, %v1002_v27  ;;  %v5111_v16 = vmul.f32 -1.442695, %v535_v62  ;;  %v657_v30 = vadd.f32 %v656_v33, %v6545_v8 }
 0x136   : > { %v7051_v50 = vadd.f32 1.0, %v6075_v31  ;;  %v1242_v48 = vmul.f32 %v7029_v25, %v1241_v58  ;;  %v1025_v53 = vand.u32 2147483648, %v7027_v52  ;;  %vm1245_vm10 = vweird.f32 %v7029_v25 }
 0x137   : > { %v7055_v20 = vpack.c.b16 %v1378_v63, %v1377_v12  ;;  %v1007_v60 = vsel %vm7057_vm4, %v7011_v14, %v1003_v7  ;;  %vm7089_vm11 = vmor %vm1244_vm7, %vm1245_vm10  ;;  %v1248_v12 = vand.u32 2147483647, %v6987_v17  ;;  %v1250_v13 = vand.u32 2147483648, %v6987_v17 }
 0x138   : > { %6080 = vrcp.f32 %v7051_v50  ;;  %v6077_v22 = vpop.eup %6076  ;;  %v1012_v51 = vsel %vm1009_vm5, %v1011_v61, %v1007_v60  ;;  %v1243_v10 = vadd.f32 %v7029_v25, %v1242_v48  ;;  %v619_v17 = vadd.f32 %v6952_v9, %v6545_v8 }
 0x139   : > { %10245 = vst [vmem:[#allocation18_spill] sm:$0xff] %v7055_v20  ;;  %6082 = vpow2.f32 %v5111_v16  ;;  %v1015_v2 = vmul.f32 %v6077_v22, %v7027_v52  ;;  %v7082_v62 = vpop.eup %6078  ;;  %vm1020_vm8 = vweird.f32 %v6077_v22  ;;  %v10081_v16 = vshrl.u32 %v7055_v20, 16 }
 0x13a   : > { %v537_v29 = vpop.f32.mrf.mxu0  ;;  %v1283_v0 = vmul.f32 %v1012_v51, %v617_v36  ;;  %v1247_v61 = vsel %vm7089_vm11, %v7029_v25, %v1243_v10  ;;  %vm1249_vm12 = vcmp.eq.f32.partialorder %v1248_v12, 8.507059e+37  ;;  %v1251_v33 = vor.u32 1.1754944e-38, %v1250_v13  ;;  %vm1021_vm14 = vmor %vm1019_vm6, %vm1020_vm8 }
 0x13b   : > { %v538_v40 = vadd.f32 %v537_v29, %v6528_v43  ;;  %v7076_v14 = vpop.f32.mrf.mxu1  ;;  %v1016_v27 = vsub.f32 1.0, %v1015_v2  ;;  %2654 = vmatmul.bf16.gmra.mxu3 %v7055_v20  ;;  %v1026_v36 = vor.u32 1.1754944e-38, %v1025_v53  ;;  %vm1024_vm15 = vcmp.eq.f32.partialorder %v1023_v54, 8.507059e+37 }
 0x13c   : > { %v10082_v25 = vshll.u32 %v7055_v20, 16  ;;  %v1252_v9 = vsel %vm1249_vm12, %v1251_v33, %v1247_v61  ;;  %v1315_v52 = vpack.c.bf16 %v1283_v0, %v1283_v0  ;;  %v1040_v13 = vand.u32 2147483648, %v7051_v50 }
 0x13d   : > { %v5112_v31 = vmul.f32 -1.442695, %v538_v40  ;;  %2723 = vmatmul.bf16.gmra.mxu0 %v7069_v28  ;;  %v1017_v7 = vmul.f32 %v6077_v22, %v1016_v27  ;;  %v1489_v40 = vrot.slane %v10081_v16, 7  ;;  %v7116_v53 = vmul.f32 %v1252_v9, %v657_v30  ;;  %v7130_v30 = vpop.f32.mrf.mxu3 }
 0x13e   : > { %v7087_v63 = vpop.eup %6080  ;;  %2812 = vmatmul.bf16.gmra.mxu1 %v6867_v56  ;;  %vm1034_vm1 = vweird.f32 %v7051_v50  ;;  %vm1259_vm8 = vweird.f32 %v7037_v59  ;;  %vm1260_vm10 = vweird.f32 %v7082_v62 }
 0x13f   : > { %v6083_v58 = vpop.eup %6082  ;;  %v1030_v60 = vmul.f32 %v7087_v63, %v7051_v50  ;;  %6084 = vpow2.f32 %v5112_v31  ;;  %v1018_v2 = vadd.f32 %v6077_v22, %v1017_v7  ;;  %v1492_v12 = vor.u32 %v10082_v25, %v1489_v40  ;;  %vm7206_vm11 = vmor %vm1259_vm8, %vm1260_vm10 }
 0x140   : > { %v7102_v29 = vadd.f32 1.0, %v6083_v58  ;;  %vm1035_vm0 = vweird.f32 %v7087_v63 }
 0x141   : > { %v1031_v48 = vsub.f32 1.0, %v1030_v60  ;;  %v1022_v51 = vsel %vm1021_vm14, %v6077_v22, %v1018_v2  ;;  %v7128_v0 = vsel %vm1429_vm13, %v6531_v45, %v1492_v12  ;;  %v1038_v2 = vand.u32 2147483647, %v7051_v50  ;;  %vm7139_vm2 = vmor %vm1034_vm1, %vm1035_vm0 }
 0x142   : > { %6086 = vrcp.f32 %v7102_v29  ;;  %v539_v27 = vpop.f32.mrf.mxu0  ;;  %v1027_v10 = vsel %vm1024_vm15, %v1026_v36, %v1022_v51  ;;  %10251 = vst [vmem:[#allocation20_spill] sm:$0xff] %v7128_v0  ;;  %2565 = vmatmul.bf16.gmra.mxu2 %v7128_v0  ;;  %v1587_v50 = vrot.slane %v1466_v1, 1  ;;  %vm1049_vm5 = vweird.f32 %v7102_v29 }
 0x143   : > { %v1032_v31 = vmul.f32 %v7087_v63, %v1031_v48  ;;  %v7114_v7 = vpop.f32.mrf.mxu1  ;;  %v1284_v35 = vmul.f32 %v1027_v10, %v619_v17  ;;  %v540_v58 = vadd.f32 %v539_v27, %v6528_v43  ;;  %v1255_v17 = vmul.f32 %v7082_v62, %v7037_v59 }
 0x144   : > { %v1379_v48 = vunpack.c.l.b16 %v1315_v52  ;;  %v1041_v10 = vor.u32 1.1754944e-38, %v1040_v13  ;;  %v1053_v52 = vand.u32 2147483647, %v7102_v29  ;;  %vm1039_vm3 = vcmp.eq.f32.partialorder %v1038_v2, 8.507059e+37 }
 0x145   : > { %v6085_v22 = vpop.eup %6084  ;;  %v1033_v54 = vadd.f32 %v7087_v63, %v1032_v31  ;;  %v1316_v60 = vpack.c.bf16 %v1284_v35, %v1284_v35  ;;  %v5113_v33 = vmul.f32 -1.442695, %v540_v58  ;;  %v1055_v35 = vand.u32 2147483648, %v7102_v29 }
 0x146   : > { %v7124_v61 = vadd.f32 1.0, %v6085_v22  ;;  %v622_v22 = vadd.f32 %v6995_v3, %v6545_v8  ;;  %v1256_v58 = vsub.f32 1.0, %v1255_v17  ;;  %v1588_v13 = vor.u32 %v1587_v50, %v1463_v49 }
 0x147   : > { %v1380_v40 = vunpack.c.l.b16 %v1316_v60  ;;  %v1037_v27 = vsel %vm7139_vm2, %v7087_v63, %v1033_v54  ;;  %v1796_v63 = vld [vmem:[%s10075_s4] sm:$0x3]  ;;  %vm7170_vm6 = vcmp.eq.f32.partialorder %v1053_v52, 8.507059e+37  ;;  %v1265_v17 = vand.u32 2147483648, %v7037_v59 }
 0x148   : > { %v6087_v36 = vpop.eup %6086  ;;  %6088 = vrcp.f32 %v7124_v61  ;;  %v1042_v54 = vsel %vm1039_vm3, %v1041_v10, %v1037_v27  ;;  %v7174_v51 = vperm.slane %v1796_v63, 0  ;;  %v1257_v27 = vmul.f32 %v7082_v62, %v1256_v58  ;;  %v2531_v10 = vpop.f32.mrf.mxu2 }
 0x149   : > { %v1045_v31 = vmul.f32 %v6087_v36, %v7102_v29  ;;  %v7150_v9 = vpack.c.b16 %v1380_v40, %v1379_v48  ;;  %6090 = vpow2.f32 %v5113_v33  ;;  %v624_v33 = vadd.f32 %v7039_v4, %v6545_v8 }
 0x14a   : > { %v542_v12 = vpop.f32.mrf.mxu0  ;;  %vm1050_vm4 = vweird.f32 %v6087_v36  ;;  %v1056_v40 = vor.u32 1.1754944e-38, %v1055_v35  ;;  %v1285_v49 = vmul.f32 %v1042_v54, %v622_v22  ;;  %v2532_v52 = vadd.f32 %v2531_v10, %v7174_v51 }
 0x14b   : > { %10254 = vst [vmem:[#allocation21_spill] sm:$0xff] %v7150_v9  ;;  %v1046_v1 = vsub.f32 1.0, %v1045_v31  ;;  %v7156_v60 = vpop.f32.mrf.mxu1  ;;  %2659 = vmatmul.bf16.gmra.mxu3 %v7150_v9  ;;  %v543_v3 = vadd.f32 %v542_v12, %v6528_v43  ;;  %vm1051_vm7 = vmor %vm1049_vm5, %vm1050_vm4  ;;  %v2620_v12 = vpop.f32.mrf.mxu3  ;;  %v7183_v35 = vsel %vm1574_vm9, %v1588_v13, %v6836_v32  ;;  %vm1064_vm14 = vweird.f32 %v7124_v61 }
 0x14c   : > { %10257 = vst [vmem:[#allocation22_spill] sm:$0xff] %v7183_v35 }
 0x14d   : > { %v1047_v48 = vmul.f32 %v6087_v36, %v1046_v1  ;;  %v5114_v29 = vmul.f32 -1.442695, %v543_v3  ;;  %v10080_v1 = vshrl.u32 %v7150_v9, 16  ;;  %2728 = vmatmul.bf16.gmra.mxu0 %v7183_v35  ;;  %v1317_v3 = vpack.c.bf16 %v1285_v49, %v1285_v49 }
 0x14e   : > { %v7167_v2 = vpop.eup %6088  ;;  %2817 = vmatmul.bf16.gmra.mxu1 %v6949_v34  ;;  %v10085_v49 = vshll.u32 %v7150_v9, 16 }
 0x14f   : > { %v1048_v50 = vadd.f32 %v6087_v36, %v1047_v48  ;;  %v1060_v4 = vmul.f32 %v7167_v2, %v7124_v61  ;;  %v6091_v31 = vpop.eup %6090  ;;  %6092 = vpow2.f32 %v5114_v29  ;;  %v7193_v48 = vadd.f32 %v2620_v12, %v2532_v52 }
 0x150   : > { %v7186_v54 = vadd.f32 1.0, %v6091_v31  ;;  %v1263_v31 = vand.u32 2147483647, %v7037_v59  ;;  %vm1065_vm12 = vweird.f32 %v7167_v2  ;;  %v1068_v12 = vand.u32 2147483647, %v7124_v61 }
 0x151   : > { %v1052_v22 = vsel %vm1051_vm7, %v6087_v36, %v1048_v50  ;;  %v1061_v63 = vsub.f32 1.0, %v1060_v4  ;;  %v1258_v4 = vadd.f32 %v7082_v62, %v1257_v27  ;;  %vm7228_vm0 = vmor %vm1064_vm14, %vm1065_vm12 }
 0x152   : > { %v1057_v58 = vsel %vm7170_vm6, %v1056_v40, %v1052_v22  ;;  %v544_v13 = vpop.f32.mrf.mxu0  ;;  %6094 = vrcp.f32 %v7186_v54  ;;  %v1497_v40 = vrot.slane %v10080_v1, 7  ;;  %v1070_v22 = vand.u32 2147483648, %v7124_v61 }
 0x153   : > { %v1286_v10 = vmul.f32 %v1057_v58, %v624_v33  ;;  %v1062_v36 = vmul.f32 %v7167_v2, %v1061_v63  ;;  %v7197_v50 = vpop.f32.mrf.mxu1  ;;  %v545_v52 = vadd.f32 %v544_v13, %v6528_v43  ;;  %v1381_v63 = vunpack.c.l.b16 %v1317_v3 }
 0x154   : > { %v1500_v59 = vor.u32 %v10085_v49, %v1497_v40  ;;  %v1262_v13 = vsel %vm7206_vm11, %v7082_v62, %v1258_v4  ;;  %vm7222_vm15 = vcmp.eq.f32.partialorder %v1263_v31, 8.507059e+37  ;;  %v1266_v1 = vor.u32 1.1754944e-38, %v1265_v17 }
 0x155   : > { %v1318_v29 = vpack.c.bf16 %v1286_v10, %v1286_v10  ;;  %v1063_v27 = vadd.f32 %v7167_v2, %v1062_v36  ;;  %v5115_v10 = vmul.f32 -1.442695, %v545_v52  ;;  %v6093_v44 = vpop.eup %6092  ;;  %v1590_v62 = vrot.slane %v1474_v46, 1 }
 0x156   : > { %v7232_v40 = vadd.f32 1.0, %v6093_v44  ;;  %v7236_v61 = vsel %vm1429_vm13, %v6531_v45, %v1500_v59  ;;  %v627_v4 = vadd.f32 %v7076_v14, %v6545_v8  ;;  %v2533_v44 = vpop.f32.mrf.mxu2  ;;  %vm1069_vm1 = vcmp.eq.f32.partialorder %v1068_v12, 8.507059e+37 }
 0x157   : > { %v1382_v58 = vunpack.c.l.b16 %v1318_v29  ;;  %10264 = vst [vmem:[#allocation23_spill] sm:$0xff] %v7236_v61  ;;  %v1067_v31 = vsel %vm7228_vm0, %v7167_v2, %v1063_v27  ;;  %2570 = vmatmul.bf16.gmra.mxu2 %v7236_v61  ;;  %6096 = vpow2.f32 %v5115_v10  ;;  %v2622_v29 = vpop.f32.mrf.mxu3  ;;  %v1071_v33 = vor.u32 1.1754944e-38, %v1070_v22 }
 0x158   : > { %v6095_v16 = vpop.eup %6094  ;;  %v659_v52 = vadd.f32 %v7130_v30, %v6545_v8  ;;  %6098 = vrcp.f32 %v7232_v40  ;;  %v1267_v2 = vsel %vm7222_vm15, %v1266_v1, %v1262_v13  ;;  %v2534_v27 = vadd.f32 %v2533_v44, %v7174_v51 }
 0x159   : > { %v7226_v25 = vpack.c.b16 %v1382_v58, %v1381_v63  ;;  %v1075_v17 = vmul.f32 %v6095_v16, %v7186_v54  ;;  %v1072_v12 = vsel %vm1069_vm1, %v1071_v33, %v1067_v31  ;;  %v1083_v22 = vand.u32 2147483647, %v7186_v54 }
 0x15a   : > { %v547_v46 = vpop.f32.mrf.mxu0  ;;  %v1085_v30 = vand.u32 2147483648, %v7186_v54  ;;  %v1591_v59 = vor.u32 %v1590_v62, %v1471_v26  ;;  %vm1080_vm2 = vweird.f32 %v6095_v16  ;;  %v7261_v3 = vadd.f32 %v2622_v29, %v2534_v27 }
 0x15b   : > { %v7250_v14 = vpop.f32.mrf.mxu1  ;;  %v1076_v63 = vsub.f32 1.0, %v1075_v17  ;;  %2664 = vmatmul.bf16.gmra.mxu3 %v7226_v25  ;;  %v548_v58 = vadd.f32 %v547_v46, %v6528_v43  ;;  %v629_v1 = vadd.f32 %v7114_v7, %v6545_v8  ;;  %vm1079_vm3 = vweird.f32 %v7186_v54 }
 0x15c   : > { %v10083_v13 = vshrl.u32 %v7226_v25, 16  ;;  %v1287_v17 = vmul.f32 %v1072_v12, %v627_v4  ;;  %v7270_v26 = vsel %vm1574_vm9, %v1591_v59, %v6836_v32  ;;  %vm1081_vm4 = vmor %vm1079_vm3, %vm1080_vm2  ;;  %v1086_v29 = vor.u32 1.1754944e-38, %v1085_v30 }
 0x15d   : > { %v1077_v10 = vmul.f32 %v6095_v16, %v1076_v63  ;;  %v5116_v36 = vmul.f32 -1.442695, %v548_v58  ;;  %v6097_v31 = vpop.eup %6096  ;;  %10265 = vst [vmem:[#allocation24_spill] sm:$0xff] %v7270_v26  ;;  %v1300_v33 = vmul.f32 %v1267_v2, %v659_v52  ;;  %2733 = vmatmul.bf16.gmra.mxu0 %v7270_v26  ;;  %vm1084_vm5 = vcmp.eq.f32.partialorder %v1083_v22, 8.507059e+37 }
 0x15e   : > { %2822 = vmatmul.bf16.gmra.mxu1 %v7033_v42  ;;  %v6099_v62 = vpop.eup %6098  ;;  %v7272_v46 = vadd.f32 1.0, %v6097_v31  ;;  %v1505_v7 = vrot.slane %v10083_v13, 7  ;;  %v10084_v27 = vshll.u32 %v7226_v25, 16  ;;  %v1319_v2 = vpack.c.bf16 %v1287_v17, %v1287_v17 }
 0x15f   : > { %v1078_v44 = vadd.f32 %v6095_v16, %v1077_v10  ;;  %6100 = vpow2.f32 %v5116_v36  ;;  %v1090_v4 = vmul.f32 %v6099_v62, %v7232_v40  ;;  %v7278_v63 = vpop.f32.mrf.mxu3  ;;  %v1332_v22 = vpack.c.bf16 %v1300_v33, %v1300_v33 }
 0x160   : > { %6102 = vrcp.f32 %v7272_v46  ;;  %v1508_v10 = vor.u32 %v10084_v27, %v1505_v7  ;;  %v1593_v31 = vrot.slane %v1482_v38, 1  ;;  %vm1094_vm6 = vweird.f32 %v7232_v40 }
 0x161   : > { %v1082_v54 = vsel %vm1081_vm4, %v6095_v16, %v1078_v44  ;;  %v1091_v59 = vsub.f32 1.0, %v1090_v4  ;;  %v1331_v16 = vpack.c.bf16 %v7116_v53, %v7116_v53  ;;  %vm1095_vm7 = vweird.f32 %v6099_v62 }
 0x162   : > { %v1087_v58 = vsel %vm1084_vm5, %v1086_v29, %v1082_v54  ;;  %v549_v12 = vpop.f32.mrf.mxu0  ;;  %v7297_v7 = vsel %vm1429_vm13, %v6531_v45, %v1508_v10  ;;  %v1383_v33 = vunpack.c.l.b16 %v1319_v2  ;;  %v1098_v38 = vand.u32 2147483647, %v7232_v40  ;;  %vm7300_vm8 = vmor %vm1094_vm6, %vm1095_vm7 }
 0x163   : > { %v7282_v52 = vpop.f32.mrf.mxu1  ;;  %v1288_v30 = vmul.f32 %v1087_v58, %v629_v1  ;;  %v550_v36 = vadd.f32 %v549_v12, %v6528_v43  ;;  %v1092_v54 = vmul.f32 %v6099_v62, %v1091_v59  ;;  %v1100_v1 = vand.u32 2147483648, %v7232_v40  ;;  %10266 = vst [vmem:[#allocation25_spill] sm:$0xff] %v7297_v7  ;;  %v7311_v40 = vpop.f32.mrf.mxu2 }
 0x164   : > { %v1395_v59 = vunpack.c.l.b16 %v1331_v16  ;;  %v1396_v2 = vunpack.c.l.b16 %v1332_v22  ;;  %v1594_v13 = vor.u32 %v1593_v31, %v1479_v6  ;;  %v632_v16 = vadd.f32 %v7156_v60, %v6545_v8 }
 0x165   : > { %v6101_v44 = vpop.eup %6100  ;;  %v1320_v29 = vpack.c.bf16 %v1288_v30, %v1288_v30  ;;  %v5117_v53 = vmul.f32 -1.442695, %v550_v36  ;;  %v1093_v58 = vadd.f32 %v6099_v62, %v1092_v54  ;;  %vm1099_vm10 = vcmp.eq.f32.partialorder %v1098_v38, 8.507059e+37 }
 0x166   : > { %v7293_v17 = vadd.f32 1.0, %v6101_v44  ;;  %v6103_v12 = vpop.eup %6102  ;;  %v1113_v6 = vand.u32 2147483647, %v7272_v46  ;;  %v7330_v31 = vpack.c.b16 %v1396_v2, %v1395_v59  ;;  %vm1109_vm12 = vweird.f32 %v7272_v46 }
 0x167   : > { %v1384_v4 = vunpack.c.l.b16 %v1320_v29  ;;  %v1097_v10 = vsel %vm7300_vm8, %v6099_v62, %v1093_v58  ;;  %v1105_v36 = vmul.f32 %v6103_v12, %v7272_v46  ;;  %2575 = vmatmul.bf16.gmra.mxu2 %v7297_v7  ;;  %v1101_v29 = vor.u32 1.1754944e-38, %v1100_v1  ;;  %v7313_v54 = vpop.f32.mrf.mxu3 }
 0x168   : > { %6104 = vrcp.f32 %v7293_v17  ;;  %v1115_v1 = vand.u32 2147483648, %v7272_v46  ;;  %v634_v58 = vadd.f32 %v7197_v50, %v6545_v8  ;;  %vm1110_vm11 = vweird.f32 %v6103_v12  ;;  %10270 = vst [vmem:[#allocation27_spill] sm:$0xff] %v7330_v31 }
 0x169   : > { %v7305_v44 = vpack.c.b16 %v1384_v4, %v1383_v33  ;;  %6106 = vpow2.f32 %v5117_v53  ;;  %v1106_v33 = vsub.f32 1.0, %v1105_v36  ;;  %v1102_v22 = vsel %vm1099_vm10, %v1101_v29, %v1097_v10  ;;  %vm1111_vm14 = vmor %vm1109_vm12, %vm1110_vm11 }
 0x16a   : > { %v552_v62 = vpop.f32.mrf.mxu0  ;;  %v7334_v10 = vsel %vm1574_vm9, %v1594_v13, %v6836_v32  ;;  %v1289_v29 = vmul.f32 %v1102_v22, %v632_v16  ;;  %v1116_v27 = vor.u32 1.1754944e-38, %v1115_v1  ;;  %vm1114_vm15 = vcmp.eq.f32.partialorder %v1113_v6, 8.507059e+37 }
 0x16b   : > { %10269 = vst [vmem:[#allocation26_spill] sm:$0xff] %v7305_v44  ;;  %2669 = vmatmul.bf16.gmra.mxu3 %v7305_v44  ;;  %v7320_v4 = vpop.f32.mrf.mxu1  ;;  %v553_v53 = vadd.f32 %v552_v62, %v6528_v43  ;;  %v1107_v30 = vmul.f32 %v6103_v12, %v1106_v33  ;;  %v10088_v36 = vshrl.u32 %v7305_v44, 16  ;;  %v10089_v13 = vshll.u32 %v7305_v44, 16 }
 0x16c   : > { %10271 = vst [vmem:[#allocation28_spill] sm:$0xff] %v7334_v10  ;;  %v1321_v49 = vpack.c.bf16 %v1289_v29, %v1289_v29  ;;  %vm1124_vm1 = vweird.f32 %v7293_v17 }
 0x16d   : > { %v5118_v38 = vmul.f32 -1.442695, %v553_v53  ;;  %v1108_v62 = vadd.f32 %v6103_v12, %v1107_v30  ;;  %2738 = vmatmul.bf16.gmra.mxu0 %v7334_v10  ;;  %v1513_v59 = vrot.slane %v10088_v36, 7  ;;  %v7346_v53 = vpop.f32.mrf.mxu2 }
 0x16e   : > { %2827 = vmatmul.bf16.gmra.mxu1 %v7128_v0  ;;  %v7328_v60 = vpop.eup %6104 }
 0x16f   : > { %v1120_v50 = vmul.f32 %v7328_v60, %v7293_v17  ;;  %v6107_v33 = vpop.eup %6106  ;;  %6108 = vpow2.f32 %v5118_v38  ;;  %v1112_v2 = vsel %vm1111_vm14, %v6103_v12, %v1108_v62  ;;  %v7348_v30 = vpop.f32.mrf.mxu3  ;;  %v1516_v1 = vor.u32 %v10089_v13, %v1513_v59 }
 0x170   : > { %v7344_v22 = vadd.f32 1.0, %v6107_v33  ;;  %v1117_v46 = vsel %vm1114_vm15, %v1116_v27, %v1112_v2  ;;  %v10096_v38 = vshll.u32 %v7330_v31, 16  ;;  %v565_v27 = vadd.f32 %v6804_v55, %v6528_v43 }
 0x171   : > { %v1121_v16 = vsub.f32 1.0, %v1120_v50  ;;  %v1290_v57 = vmul.f32 %v1117_v46, %v634_v58  ;;  %v10272_v62 = vshll.u32 %v7055_v20, 16  ;;  %vm1125_vm0 = vweird.f32 %v7328_v60 }
 0x172   : > { %6110 = vrcp.f32 %v7344_v22  ;;  %v554_v12 = vpop.f32.mrf.mxu0  ;;  %v1130_v59 = vand.u32 2147483648, %v7293_v17  ;;  %v10097_v46 = vshrl.u32 %v7330_v31, 16  ;;  %v1648_v55 = vrot.slane %v10096_v38, 1  ;;  %vm7384_vm2 = vmor %vm1124_vm1, %vm1125_vm0 }
 0x173   : > { %v1122_v36 = vmul.f32 %v7328_v60, %v1121_v16  ;;  %v7355_v6 = vpop.f32.mrf.mxu1  ;;  %v1596_v50 = vrot.slane %v10272_v62, 1  ;;  %v1322_v33 = vpack.c.bf16 %v1290_v57, %v1290_v57  ;;  %v555_v58 = vadd.f32 %v554_v12, %v6528_v43 }
 0x174   : > { %v7367_v16 = vsel %vm1429_vm13, %v6531_v45, %v1516_v1  ;;  %v1385_v62 = vunpack.c.l.b16 %v1321_v49  ;;  %v5123_v42 = vmul.f32 -1.442695, %v565_v27  ;;  %v1128_v12 = vand.u32 2147483647, %v7293_v17 }
 0x175   : > { %v6109_v29 = vpop.eup %6108  ;;  %v1123_v2 = vadd.f32 %v7328_v60, %v1122_v36  ;;  %10273 = vst [vmem:[#allocation29_spill] sm:$0xff] %v7367_v16  ;;  %v1386_v57 = vunpack.c.l.b16 %v1322_v33  ;;  %v5119_v0 = vmul.f32 -1.442695, %v555_v58  ;;  %v7378_v36 = vor.u32 %v1648_v55, %v10097_v46  ;;  %v7394_v58 = vpop.f32.mrf.mxu2 }
 0x176   : > { %v7372_v13 = vadd.f32 1.0, %v6109_v29  ;;  %v1131_v33 = vor.u32 1.1754944e-38, %v1130_v59  ;;  %v10278_v55 = vshrl.u32 %v7055_v20, 16  ;;  %vm1129_vm3 = vcmp.eq.f32.partialorder %v1128_v12, 8.507059e+37 }
 0x177   : > { %10274 = vst [vmem:[#allocation30_spill] sm:$0xff] %v7378_v36  ;;  %v7380_v34 = vpack.c.b16 %v1386_v57, %v1385_v62  ;;  %2580 = vmatmul.bf16.gmra.mxu2 %v7367_v16  ;;  %v1127_v17 = vsel %vm7384_vm2, %v7328_v60, %v1123_v2  ;;  %v7396_v29 = vpop.f32.mrf.mxu3  ;;  %v637_v57 = vadd.f32 %v7250_v14, %v6545_v8  ;;  %vm1139_vm5 = vweird.f32 %v7344_v22 }
 0x178   : > { %v6111_v1 = vpop.eup %6110  ;;  %6112 = vrcp.f32 %v7372_v13  ;;  %v1597_v62 = vor.u32 %v1596_v50, %v10278_v55  ;;  %v1132_v59 = vsel %vm1129_vm3, %v1131_v33, %v1127_v17  ;;  %v1143_v50 = vand.u32 2147483647, %v7344_v22 }
 0x179   : > { %10275 = vst [vmem:[#allocation31_spill] sm:$0xff] %v7380_v34  ;;  %v1135_v27 = vmul.f32 %v6111_v1, %v7344_v22  ;;  %6114 = vpow2.f32 %v5119_v0  ;;  %v1145_v0 = vand.u32 2147483648, %v7344_v22  ;;  %vm1140_vm4 = vweird.f32 %v6111_v1 }
 0x17a   : > { %6116 = vpow2.f32 %v5123_v42  ;;  %v557_v60 = vpop.f32.mrf.mxu0  ;;  %v639_v14 = vadd.f32 %v7282_v52, %v6545_v8  ;;  %v10104_v17 = vshrl.u32 %v7380_v34, 16  ;;  %v1291_v33 = vmul.f32 %v1132_v59, %v637_v57  ;;  %vm1141_vm6 = vmor %vm1139_vm5, %vm1140_vm4 }
 0x17b   : > { %2674 = vmatmul.bf16.gmra.mxu3 %v7380_v34  ;;  %v1136_v49 = vsub.f32 1.0, %v1135_v27  ;;  %v7403_v2 = vpop.f32.mrf.mxu1  ;;  %v558_v38 = vadd.f32 %v557_v60, %v6528_v43  ;;  %v7415_v27 = vsel %vm1574_vm9, %v1597_v62, %v6836_v32  ;;  %v1146_v36 = vor.u32 1.1754944e-38, %v1145_v0 }
 0x17c   : > { %10279 = vst [vmem:[#allocation32_spill] sm:$0xff] %v7415_v27  ;;  %v1521_v52 = vrot.slane %v10104_v17, 7  ;;  %vm1144_vm7 = vcmp.eq.f32.partialorder %v1143_v50, 8.507059e+37  ;;  %v2537_v59 = vadd.f32 %v7311_v40, %v7174_v51  ;;  %v10280_v40 = vshll.u32 %v7150_v9, 16 }
 0x17d   : > { %v1137_v46 = vmul.f32 %v6111_v1, %v1136_v49  ;;  %v5120_v12 = vmul.f32 -1.442695, %v558_v38  ;;  %2743 = vmatmul.bf16.gmra.mxu0 %v7415_v27  ;;  %v10107_v38 = vshll.u32 %v7380_v34, 16  ;;  %v7429_v20 = vpop.f32.mrf.mxu2  ;;  %vm1154_vm10 = vweird.f32 %v7372_v13 }
 0x17e   : > { %2832 = vmatmul.bf16.gmra.mxu1 %v7236_v61  ;;  %v7409_v42 = vpop.eup %6112 }
 0x17f   : > { %v1138_v55 = vadd.f32 %v6111_v1, %v1137_v46  ;;  %v1150_v49 = vmul.f32 %v7409_v42, %v7372_v13  ;;  %v6115_v60 = vpop.eup %6114  ;;  %6118 = vpow2.f32 %v5120_v12  ;;  %v7431_v56 = vpop.f32.mrf.mxu3  ;;  %v1524_v0 = vor.u32 %v10107_v38, %v1521_v52 }
 0x180   : > { %v6117_v62 = vpop.eup %6116  ;;  %v7425_v57 = vadd.f32 1.0, %v6115_v60  ;;  %v1323_v12 = vpack.c.bf16 %v1291_v33, %v1291_v33  ;;  %vm1155_vm8 = vweird.f32 %v7409_v42  ;;  %v1158_v52 = vand.u32 2147483647, %v7372_v13 }
 0x181   : > { %v1142_v61 = vsel %vm1141_vm6, %v6111_v1, %v1138_v55  ;;  %v1151_v46 = vsub.f32 1.0, %v1150_v49  ;;  %vm7461_vm11 = vmor %vm1154_vm10, %vm1155_vm8 }
 0x182   : > { %v1147_v22 = vsel %vm1144_vm7, %v1146_v36, %v1142_v61  ;;  %6120 = vrcp.f32 %v7425_v57  ;;  %v559_v1 = vpop.f32.mrf.mxu0  ;;  %v7439_v61 = vadd.f32 1.0, %v6117_v62  ;;  %v1599_v36 = vrot.slane %v10280_v40, 1 }
 0x183   : > { %v1292_v17 = vmul.f32 %v1147_v22, %v639_v14  ;;  %v1152_v27 = vmul.f32 %v7409_v42, %v1151_v46  ;;  %v7437_v50 = vpop.f32.mrf.mxu1  ;;  %v7447_v14 = vsel %vm1429_vm13, %v6531_v45, %v1524_v0  ;;  %v560_v33 = vadd.f32 %v559_v1, %v6528_v43 }
 0x184   : > { %10281 = vst [vmem:[#allocation33_spill] sm:$0xff] %v7447_v14  ;;  %v1160_v62 = vand.u32 2147483648, %v7372_v13  ;;  %v7454_v46 = vadd.f32 %v7278_v63, %v2537_v59  ;;  %v1387_v22 = vunpack.c.l.b16 %v1323_v12  ;;  %6122 = vrcp.f32 %v7439_v61 }
 0x185   : > { %v1324_v55 = vpack.c.bf16 %v1292_v17, %v1292_v17  ;;  %v1153_v49 = vadd.f32 %v7409_v42, %v1152_v27  ;;  %v6119_v60 = vpop.eup %6118  ;;  %v5121_v27 = vmul.f32 -1.442695, %v560_v33  ;;  %v10284_v13 = vshrl.u32 %v7150_v9, 16 }
 0x186   : > { %v7456_v40 = vadd.f32 1.0, %v6119_v60  ;;  %v2539_v1 = vadd.f32 %v7346_v53, %v7174_v51  ;;  %v2542_v60 = vadd.f32 %v7394_v58, %v7174_v51  ;;  %vm1159_vm12 = vcmp.eq.f32.partialorder %v1158_v52, 8.507059e+37 }
 0x187   : > { %v1388_v17 = vunpack.c.l.b16 %v1324_v55  ;;  %2585 = vmatmul.bf16.gmra.mxu2 %v7447_v14  ;;  %v1600_v0 = vor.u32 %v1599_v36, %v10284_v13  ;;  %v1157_v12 = vsel %vm7461_vm11, %v7409_v42, %v1153_v49  ;;  %v1161_v55 = vor.u32 1.1754944e-38, %v1160_v62 }
 0x188   : > { %v6121_v63 = vpop.eup %6120  ;;  %6124 = vrcp.f32 %v7456_v40  ;;  %v642_v36 = vadd.f32 %v7320_v4, %v6545_v8  ;;  %v1175_v4 = vand.u32 2147483648, %v7425_v57  ;;  %v7497_v13 = vadd.f32 %v7313_v54, %v2539_v1  ;;  %v5504_v54 = vld [vmem:[%s10074_s3 + $0x2f0] sm:$0xf]  ;;  %v5897_v1 = vld [vmem:[%s10074_s3 + $0x2f4] sm:$0xf0] }
 0x189   : > { %v7468_v59 = vpack.c.b16 %v1388_v17, %v1387_v22  ;;  %v1165_v33 = vmul.f32 %v6121_v63, %v7425_v57  ;;  %6126 = vpow2.f32 %v5121_v27  ;;  %v7481_v22 = vpop.f32.mrf.mxu2  ;;  %v7483_v17 = vpop.f32.mrf.mxu3  ;;  %v1162_v42 = vsel %vm1159_vm12, %v1161_v55, %v1157_v12 }
 0x18a   : > { %v2709_v62 = vpop.f32.mrf.mxu0  ;;  %v7489_v58 = vsel %vm1574_vm9, %v1600_v0, %v6836_v32  ;;  %v7499_v12 = vpop.eup %6122  ;;  %vm1170_vm14 = vweird.f32 %v6121_v63  ;;  %v7503_v0 = vadd.f32 %v7348_v30, %v2542_v60  ;;  %vm1169_vm15 = vweird.f32 %v7425_v57 }
 0x18b   : > { %10285 = vst [vmem:[#allocation34_spill] sm:$0xff] %v7468_v59  ;;  %2679 = vmatmul.bf16.gmra.mxu3 %v7468_v59  ;;  %v10112_v53 = vshrl.u32 %v7468_v59, 16  ;;  %v1166_v49 = vsub.f32 1.0, %v1165_v33  ;;  %v2798_v43 = vpop.f32.mrf.mxu1  ;;  %v2710_v52 = vadd.f32 %v2709_v62, %v7193_v48  ;;  %v1173_v33 = vand.u32 2147483647, %v7425_v57  ;;  %vm1171_vm0 = vmor %vm1169_vm15, %vm1170_vm14 }
 0x18c   : > { %10286 = vst [vmem:[#allocation35_spill] sm:$0xff] %v7489_v58  ;;  %v10119_v48 = vshll.u32 %v7468_v59, 16  ;;  %v5505_v60 = vor.u32 %v5897_v1, %v5504_v54  ;;  %v644_v62 = vadd.f32 %v7355_v6, %v6545_v8  ;;  %vm1184_vm3 = vweird.f32 %v7456_v40 }
 0x18d   : > { %v1529_v27 = vrot.slane %v10112_v53, 7  ;;  %v1167_v55 = vmul.f32 %v6121_v63, %v1166_v49  ;;  %v7507_v9 = vadd.f32 %v2798_v43, %v2710_v52  ;;  %2748 = vmatmul.bf16.gmra.mxu0 %v7489_v58  ;;  %v1176_v43 = vor.u32 1.1754944e-38, %v1175_v4 }
 0x18e   : > { %2837 = vmatmul.bf16.gmra.mxu1 %v7297_v7  ;;  %v7505_v38 = vpop.eup %6124  ;;  %v1293_v7 = vmul.f32 %v1162_v42, %v642_v36  ;;  %v1225_v42 = vmul.f32 %v7499_v12, %v7439_v61  ;;  %vm1174_vm1 = vcmp.eq.f32.partialorder %v1173_v33, 8.507059e+37  ;;  %2967 = vmatpush.bf16.msra.mxu3 %v5505_v60  ;;  %v10288_v4 = vshll.u32 %v7226_v25, 16  ;;  %v5895_v33 = vld [vmem:[%s10074_s3 + $0x2e4] sm:$0xf0] }
 0x18f   : > { %10287 = vst [vmem:[#allocation36_spill] sm:$0xff] %v7507_v9  ;;  %v1168_v49 = vadd.f32 %v6121_v63, %v1167_v55  ;;  %v1180_v30 = vmul.f32 %v7505_v38, %v7456_v40  ;;  %v6127_v36 = vpop.eup %6126  ;;  %v1532_v52 = vor.u32 %v10119_v48, %v1529_v27  ;;  %v2544_v9 = vadd.f32 %v7429_v20, %v7174_v51  ;;  %v5496_v20 = vld [vmem:[%s10074_s3 + $0x2e0] sm:$0xf] }
 0x190   : > { %v7527_v53 = vadd.f32 1.0, %v6127_v36  ;;  %v1325_v54 = vpack.c.bf16 %v1293_v7, %v1293_v7  ;;  %v1602_v47 = vrot.slane %v10288_v4, 1  ;;  %vm1185_vm2 = vweird.f32 %v7505_v38 }
 0x191   : > { %v1172_v55 = vsel %vm1171_vm0, %v6121_v63, %v1168_v49  ;;  %v1181_v57 = vsub.f32 1.0, %v1180_v30  ;;  %v7531_v58 = vpop.f32.mrf.mxu2  ;;  %v7533_v6 = vpop.f32.mrf.mxu3  ;;  %v1226_v49 = vsub.f32 1.0, %v1225_v42  ;;  %v7549_v30 = vsel %vm1429_vm13, %v6531_v45, %v1532_v52  ;;  %vm7558_vm6 = vmor %vm1184_vm3, %vm1185_vm2 }
 0x192   : > { %v1177_v1 = vsel %vm1174_vm1, %v1176_v43, %v1172_v55  ;;  %6128 = vrcp.f32 %v7527_v53  ;;  %v2711_v27 = vpop.f32.mrf.mxu0  ;;  %10289 = vst [vmem:[#allocation37_spill] sm:$0xff] %v7549_v30  ;;  %v1190_v43 = vand.u32 2147483648, %v7456_v40  ;;  %v5497_v55 = vor.u32 %v5895_v33, %v5496_v20 }
 0x193   : > { %v1294_v19 = vmul.f32 %v1177_v1, %v644_v62  ;;  %v1182_v63 = vmul.f32 %v7505_v38, %v1181_v57  ;;  %v2800_v7 = vpop.f32.mrf.mxu1  ;;  %v2712_v60 = vadd.f32 %v2711_v27, %v7261_v3  ;;  %vm1229_vm4 = vweird.f32 %v7439_v61  ;;  %v5881_v27 = vld [vmem:[%s10074_s3 + $0x274] sm:$0xf0] }
 0x194   : > { %vm1230_vm5 = vweird.f32 %v7499_v12  ;;  %v1188_v52 = vand.u32 2147483647, %v7456_v40  ;;  %v10293_v1 = vshrl.u32 %v7226_v25, 16  ;;  %2968 = vmatpush.bf16.msra.mxu3 %v5497_v55  ;;  %v7575_v40 = vadd.f32 %v7396_v29, %v2544_v9 }
 0x195   : > { %v1326_v36 = vpack.c.bf16 %v1294_v19, %v1294_v19  ;;  %v1183_v62 = vadd.f32 %v7505_v38, %v1182_v63  ;;  %v7563_v57 = vadd.f32 %v2800_v7, %v2712_v60  ;;  %v1389_v19 = vunpack.c.l.b16 %v1325_v54  ;;  %v5440_v63 = vld [vmem:[%s10074_s3 + $0x270] sm:$0xf]  ;;  %v5893_v60 = vld [vmem:[%s10074_s3 + $0x2d4] sm:$0xf0]  ;;  %vm7653_vm10 = vmor %vm1229_vm4, %vm1230_vm5 }
 0x196   : > { %v1603_v4 = vor.u32 %v1602_v47, %v10293_v1  ;;  %v5488_v54 = vld [vmem:[%s10074_s3 + $0x2d0] sm:$0xf]  ;;  %v1227_v7 = vmul.f32 %v7499_v12, %v1226_v49  ;;  %v2547_v20 = vadd.f32 %v7481_v22, %v7174_v51  ;;  %v5441_v33 = vor.u32 %v5881_v27, %v5440_v63 }
 0x197   : > { %10292 = vst [vmem:[#allocation38_spill] sm:$0xff] %v7563_v57  ;;  %v1390_v3 = vunpack.c.l.b16 %v1326_v36  ;;  %2590 = vmatmul.bf16.gmra.mxu2 %v7549_v30  ;;  %v1187_v47 = vsel %vm7558_vm6, %v7505_v38, %v1183_v62  ;;  %v1233_v29 = vand.u32 2147483647, %v7439_v61  ;;  %v1191_v55 = vor.u32 1.1754944e-38, %v1190_v43 }
 0x198   : > { %v7589_v9 = vpop.eup %6128  ;;  %v5489_v49 = vor.u32 %v5893_v60, %v5488_v54  ;;  %v1235_v1 = vand.u32 2147483648, %v7439_v61  ;;  %vm1189_vm7 = vcmp.eq.f32.partialorder %v1188_v52, 8.507059e+37  ;;  %v1203_v22 = vand.u32 2147483647, %v7527_v53  ;;  %2878 = vmatpush.bf16.msra.mxu2 %v5441_v33  ;;  %v5432_v54 = vld [vmem:[%s10074_s3 + $0x260] sm:$0xf] }
 0x199   : > { %v7592_v36 = vpack.c.b16 %v1390_v3, %v1389_v19  ;;  %v1195_v38 = vmul.f32 %v7589_v9, %v7527_v53  ;;  %v7598_v62 = vpop.f32.mrf.mxu2  ;;  %v7600_v42 = vpop.f32.mrf.mxu3  ;;  %v647_v63 = vadd.f32 %v7403_v2, %v6545_v8  ;;  %v1192_v19 = vsel %vm1189_vm7, %v1191_v55, %v1187_v47  ;;  %v5879_v2 = vld [vmem:[%s10074_s3 + $0x264] sm:$0xf0] }
 0x19a   : > { %v2714_v43 = vpop.f32.mrf.mxu0  ;;  %v7607_v52 = vsel %vm1574_vm9, %v1603_v4, %v6836_v32  ;;  %2969 = vmatpush.bf16.msra.mxu3 %v5489_v49  ;;  %v5433_v60 = vor.u32 %v5879_v2, %v5432_v54  ;;  %v5480_v4 = vld [vmem:[%s10074_s3 + $0x2c0] sm:$0xf]  ;;  %v5891_v55 = vld [vmem:[%s10074_s3 + $0x2c4] sm:$0xf0]  ;;  %v7625_v48 = vadd.f32 %v7431_v56, %v2547_v20  ;;  %vm1200_vm8 = vweird.f32 %v7589_v9  ;;  %v5877_v54 = vld [vmem:[%s10074_s3 + $0x254] sm:$0xf0] }
 0x19b   : > { %10294 = vst [vmem:[#allocation39_spill] sm:$0xff] %v7592_v36  ;;  %2684 = vmatmul.bf16.gmra.mxu3 %v7592_v36  ;;  %v2803_v3 = vpop.f32.mrf.mxu1  ;;  %v1196_v47 = vsub.f32 1.0, %v1195_v38  ;;  %v2715_v33 = vadd.f32 %v2714_v43, %v7454_v46  ;;  %v1205_v27 = vand.u32 2147483648, %v7527_v53  ;;  %v10296_v38 = vshrl.u32 %v7592_v36, 16  ;;  %v5424_v43 = vld [vmem:[%s10074_s3 + $0x250] sm:$0xf] }
 0x19c   : > { %10295 = vst [vmem:[#allocation40_spill] sm:$0xff] %v7607_v52  ;;  %v5481_v49 = vor.u32 %v5891_v55, %v5480_v4  ;;  %v1538_v20 = vshll.u32 %v7592_v36, 16  ;;  %2879 = vmatpush.bf16.msra.mxu2 %v5433_v60  ;;  %v5472_v4 = vld [vmem:[%s10074_s3 + $0x2b0] sm:$0xf]  ;;  %v5889_v55 = vld [vmem:[%s10074_s3 + $0x2b4] sm:$0xf0]  ;;  %v1295_v57 = vmul.f32 %v1192_v19, %v647_v63  ;;  %vm1199_vm11 = vweird.f32 %v7527_v53 }
 0x19d   : > { %v1537_v46 = vrot.slane %v10296_v38, 7  ;;  %v1197_v2 = vmul.f32 %v7589_v9, %v1196_v47  ;;  %v7638_v56 = vadd.f32 %v2803_v3, %v2715_v33  ;;  %2753 = vmatmul.bf16.gmra.mxu0 %v7607_v52  ;;  %v1228_v38 = vadd.f32 %v7499_v12, %v1227_v7  ;;  %vm1201_vm14 = vmor %vm1199_vm11, %vm1200_vm8 }
 0x19e   : > { %2842 = vmatmul.bf16.gmra.mxu1 %v7367_v16  ;;  %v5425_v16 = vor.u32 %v5877_v54, %v5424_v43  ;;  %2970 = vmatpush.bf16.msra.mxu3 %v5481_v49  ;;  %v5473_v60 = vor.u32 %v5889_v55, %v5472_v4  ;;  %vm7661_vm12 = vcmp.eq.f32.partialorder %v1233_v29, 8.507059e+37  ;;  %v1206_v61 = vor.u32 1.1754944e-38, %v1205_v27  ;;  %v5887_v4 = vld [vmem:[%s10074_s3 + $0x2a4] sm:$0xf0] }
 0x19f   : > { %v1198_v47 = vadd.f32 %v7589_v9, %v1197_v2  ;;  %v1540_v33 = vor.u32 %v1538_v20, %v1537_v46  ;;  %v1236_v63 = vor.u32 1.1754944e-38, %v1235_v1  ;;  %v649_v19 = vadd.f32 %v7437_v50, %v6545_v8  ;;  %v5416_v50 = vld [vmem:[%s10074_s3 + $0x240] sm:$0xf] }
 0x1a0   : > { %vm1204_vm15 = vcmp.eq.f32.partialorder %v1203_v22, 8.507059e+37  ;;  %2880 = vmatpush.bf16.msra.mxu2 %v5425_v16  ;;  %v1232_v29 = vsel %vm7653_vm10, %v7499_v12, %v1228_v38  ;;  %v1327_v49 = vpack.c.bf16 %v1295_v57, %v1295_v57  ;;  %v2549_v1 = vadd.f32 %v7531_v58, %v7174_v51  ;;  %v5464_v16 = vld [vmem:[%s10074_s3 + $0x2a0] sm:$0xf] }
 0x1a1   : > { %v1202_v43 = vsel %vm1201_vm14, %v7589_v9, %v1198_v47  ;;  %v7670_v53 = vpop.f32.mrf.mxu2  ;;  %v7672_v46 = vpop.f32.mrf.mxu3  ;;  %v5875_v9 = vld [vmem:[%s10074_s3 + $0x244] sm:$0xf0]  ;;  %v7690_v57 = vsel %vm1429_vm13, %v6531_v45, %v1540_v33  ;;  %v654_v55 = vadd.f32 %v7023_v18, %v6545_v8  ;;  %v10302_v38 = vshll.u32 %v7305_v44, 16  ;;  %v5873_v8 = vld [vmem:[%s10074_s3 + $0x234] sm:$0xf0] }
 0x1a2   : > { %v1207_v54 = vsel %vm1204_vm15, %v1206_v61, %v1202_v43  ;;  %v2716_v27 = vpop.f32.mrf.mxu0  ;;  %10301 = vst [vmem:[#allocation41_spill] sm:$0xff] %v7690_v57  ;;  %2971 = vmatpush.bf16.msra.mxu3 %v5473_v60  ;;  %v5417_v22 = vor.u32 %v5875_v9, %v5416_v50  ;;  %v5465_v47 = vor.u32 %v5887_v4, %v5464_v16  ;;  %v5456_v60 = vld [vmem:[%s10074_s3 + $0x290] sm:$0xf]  ;;  %v1391_v7 = vunpack.c.l.b16 %v1327_v49 }
 0x1a3   : > { %v2805_v2 = vpop.f32.mrf.mxu1  ;;  %v1296_v12 = vmul.f32 %v1207_v54, %v649_v19  ;;  %v2717_v58 = vadd.f32 %v2716_v27, %v7497_v13  ;;  %v1605_v3 = vrot.slane %v10302_v38, 1  ;;  %v1237_v61 = vsel %vm7661_vm12, %v1236_v63, %v1232_v29  ;;  %v5408_v13 = vld [vmem:[%s10074_s3 + $0x230] sm:$0xf]  ;;  %v5885_v29 = vld [vmem:[%s10074_s3 + $0x294] sm:$0xf0] }
 0x1a4   : > { %2881 = vmatpush.bf16.msra.mxu2 %v5417_v22  ;;  %v7712_v18 = vadd.f32 %v7483_v17, %v2549_v1  ;;  %v5409_v43 = vor.u32 %v5873_v8, %v5408_v13  ;;  %v1298_v54 = vmul.f32 %v1237_v61, %v654_v55  ;;  %v2552_v27 = vadd.f32 %v7598_v62, %v7174_v51  ;;  %v5871_v62 = vld [vmem:[%s10074_s3 + $0x224] sm:$0xf0]  ;;  %v5448_v22 = vld [vmem:[%s10074_s3 + $0x280] sm:$0xf]  ;;  %v5392_v61 = vld [vmem:[%s10074_s3 + $0x210] sm:$0xf] }
 0x1a5   : > { %v1328_v33 = vpack.c.bf16 %v1296_v12, %v1296_v12  ;;  %v7702_v19 = vadd.f32 %v2805_v2, %v2717_v58  ;;  %v10303_v2 = vshrl.u32 %v7305_v44, 16  ;;  %v5457_v1 = vor.u32 %v5885_v29, %v5456_v60  ;;  %v5400_v58 = vld [vmem:[%s10074_s3 + $0x220] sm:$0xf] }
 0x1a6   : > { %2972 = vmatpush.bf16.msra.mxu3 %v5465_v47  ;;  %v1329_v4 = vpack.c.bf16 %v6999_v37, %v6999_v37  ;;  %v5883_v47 = vld [vmem:[%s10074_s3 + $0x284] sm:$0xf0]  ;;  %v7757_v8 = vadd.f32 %v7533_v6, %v2552_v27  ;;  %v2554_v27 = vadd.f32 %v7670_v53, %v7174_v51 }
 0x1a7   : > { %2595 = vmatmul.bf16.gmra.mxu2 %v7690_v57  ;;  %v1392_v63 = vunpack.c.l.b16 %v1328_v33  ;;  %v1606_v17 = vor.u32 %v1605_v3, %v10303_v2  ;;  %v5401_v3 = vor.u32 %v5871_v62, %v5400_v58  ;;  %v1330_v33 = vpack.c.bf16 %v1298_v54, %v1298_v54  ;;  %v5867_v58 = vld [vmem:[%s10074_s3 + $0x204] sm:$0xf0] }
 0x1a8   : > { %2882 = vmatpush.bf16.msra.mxu2 %v5409_v43  ;;  %v5449_v37 = vor.u32 %v5883_v47, %v5448_v22  ;;  %v1393_v54 = vunpack.c.l.b16 %v1329_v4 }
 0x1a9   : > { %v7724_v50 = vpack.c.b16 %v1392_v63, %v1391_v7  ;;  %v2556_v9 = vpop.f32.mrf.mxu2  ;;  %v7726_v16 = vpop.f32.mrf.mxu3  ;;  %v7751_v13 = vsel %vm1574_vm9, %v1606_v17, %v6836_v32  ;;  %v1394_v2 = vunpack.c.l.b16 %v1330_v33 }
 0x1aa   : > { %v2719_v49 = vpop.f32.mrf.mxu0  ;;  %10305 = vst [vmem:[#allocation43_spill] sm:$0xff] %v7751_v13  ;;  %2973 = vmatpush.bf16.msra.mxu3 %v5457_v1  ;;  %v2557_v33 = vadd.f32 %v2556_v9, %v7174_v51 }
 0x1ab   : > { %10304 = vst [vmem:[#allocation42_spill] sm:$0xff] %v7724_v50  ;;  %v2808_v12 = vpop.f32.mrf.mxu1  ;;  %2689 = vmatmul.bf16.gmra.mxu3 %v7724_v50  ;;  %v2720_v55 = vadd.f32 %v2719_v49, %v7503_v0  ;;  %v10124_v38 = vshrl.u32 %v7724_v50, 16  ;;  %v5869_v0 = vld [vmem:[%s10074_s3 + $0x214] sm:$0xf0]  ;;  %v10125_v63 = vshll.u32 %v7724_v50, 16 }
 0x1ac   : > { %2883 = vmatpush.bf16.msra.mxu2 %v5401_v3  ;;  %v5393_v43 = vor.u32 %v5869_v0, %v5392_v61  ;;  %v7782_v3 = vpack.c.b16 %v1394_v2, %v1393_v54  ;;  %v2643_v61 = vadd.f32 %v7600_v42, %v2554_v27  ;;  %v7796_v2 = vadd.f32 %v7672_v46, %v2557_v33 }
 0x1ad   : > { %v7759_v60 = vadd.f32 %v2808_v12, %v2720_v55  ;;  %2758 = vmatmul.bf16.gmra.mxu0 %v7751_v13  ;;  %v1545_v7 = vrot.slane %v10124_v38, 7  ;;  %v5384_v12 = vld [vmem:[%s10074_s3 + $0x200] sm:$0xf]  ;;  %v10307_v55 = vshll.u32 %v7380_v34, 16 }
 0x1ae   : > { %2847 = vmatmul.bf16.gmra.mxu1 %v7447_v14  ;;  %2974 = vmatpush.bf16.msra.mxu3 %v5449_v37  ;;  %v5385_v4 = vor.u32 %v5867_v58, %v5384_v12  ;;  %10308 = vst [vmem:[#allocation45_spill] sm:$0xff] %v7782_v3  ;;  %v10309_v37 = vshrl.u32 %v7380_v34, 16 }
 0x1af   : > { %v1548_v29 = vor.u32 %v10125_v63, %v1545_v7  ;;  %v1608_v53 = vrot.slane %v10307_v55, 1 }
 0x1b0   : > { %2884 = vmatpush.bf16.msra.mxu2 %v5393_v43  ;;  %v10122_v43 = vshrl.u32 %v7782_v3, 16 }
 0x1b1   : > { %v2558_v17 = vpop.f32.mrf.mxu2  ;;  %v2650_v6 = vpop.f32.mrf.mxu3  ;;  %v7777_v62 = vsel %vm1429_vm13, %v6531_v45, %v1548_v29  ;;  %v1609_v0 = vor.u32 %v1608_v53, %v10309_v37  ;;  %v10311_v53 = vshll.u32 %v7468_v59, 16 }
 0x1b2   : > { %v2721_v1 = vpop.f32.mrf.mxu0  ;;  %10306 = vst [vmem:[#allocation44_spill] sm:$0xff] %v7777_v62  ;;  %v1553_v27 = vrot.slane %v10122_v43, 7  ;;  %v2559_v46 = vadd.f32 %v2558_v17, %v7174_v51 }
 0x1b3   : > { %v2810_v49 = vpop.f32.mrf.mxu1  ;;  %v2722_v22 = vadd.f32 %v2721_v1, %v7575_v40  ;;  %v7800_v42 = vsel %vm1574_vm9, %v1609_v0, %v6836_v32  ;;  %v1611_v33 = vrot.slane %v10311_v53, 1 }
 0x1b4   : > { %2885 = vmatpush.bf16.msra.mxu2 %v5385_v4  ;;  %10310 = vst [vmem:[#allocation46_spill] sm:$0xff] %v7800_v42 }
 0x1b5   : > { %v7784_v47 = vadd.f32 %v2810_v49, %v2722_v22  ;;  %v10123_v49 = vshll.u32 %v7782_v3, 16 }
 0x1b7   : > { %2600 = vmatmul.bf16.gmra.mxu2 %v7777_v62 }
 0x1b9   : > { %v2561_v7 = vpop.f32.mrf.mxu2  ;;  %v2652_v40 = vpop.f32.mrf.mxu3 }
 0x1ba   : > { %v2724_v29 = vpop.f32.mrf.mxu0  ;;  %v2562_v17 = vadd.f32 %v2561_v7, %v7174_v51 }
 0x1bb   : > { %v2813_v1 = vpop.f32.mrf.mxu1  ;;  %2694 = vmatmul.bf16.gmra.mxu3 %v7782_v3  ;;  %v2725_v54 = vadd.f32 %v2724_v29, %v7625_v48  ;;  %v1556_v48 = vor.u32 %v10123_v49, %v1553_v27  ;;  %v7824_v29 = vadd.f32 %v7726_v16, %v2559_v46 }
 0x1bd   : > { %v7802_v9 = vadd.f32 %v2813_v1, %v2725_v54  ;;  %2763 = vmatmul.bf16.gmra.mxu0 %v7800_v42  ;;  %v7818_v37 = vsel %vm1429_vm13, %v6531_v45, %v1556_v48  ;;  %v10313_v1 = vshrl.u32 %v7468_v59, 16 }
 0x1be   : > { %2852 = vmatmul.bf16.gmra.mxu1 %v7549_v30  ;;  %10312 = vst [vmem:[#allocation47_spill] sm:$0xff] %v7818_v37 }
 0x1bf   : > { %v1612_v54 = vor.u32 %v1611_v33, %v10313_v1 }
 0x1c1   : > { %v2563_v12 = vpop.f32.mrf.mxu2  ;;  %v7808_v58 = vpop.f32.mrf.mxu3  ;;  %v7838_v16 = vsel %vm1574_vm9, %v1612_v54, %v6836_v32 }
 0x1c2   : > { %v2726_v22 = vpop.f32.mrf.mxu0  ;;  %10314 = vst [vmem:[#allocation48_spill] sm:$0xff] %v7838_v16  ;;  %v2564_v33 = vadd.f32 %v2563_v12, %v7174_v51  ;;  %v5929_v12 = vld [vmem:[%s10074_s3 + $0x3f4] sm:$0xf0] }
 0x1c3   : > { %v2815_v4 = vpop.f32.mrf.mxu1  ;;  %v2727_v55 = vadd.f32 %v2726_v22, %v7712_v18 }
 0x1c4   : > { %v7863_v38 = vadd.f32 %v2652_v40, %v2564_v33  ;;  %v5927_v40 = vld [vmem:[%s10074_s3 + $0x3e4] sm:$0xf0]  ;;  %v10315_v33 = vshrl.u32 %v7592_v36, 16 }
 0x1c5   : > { %v7820_v0 = vadd.f32 %v2815_v4, %v2727_v55  ;;  %v7834_v4 = vadd.f32 %v2650_v6, %v2562_v17  ;;  %v5913_v6 = vld [vmem:[%s10074_s3 + $0x374] sm:$0xf0]  ;;  %v5632_v17 = vld [vmem:[%s10074_s3 + $0x3f0] sm:$0xf] }
 0x1c7   : > { %2605 = vmatmul.bf16.gmra.mxu2 %v7818_v37 }
 0x1c9   : > { %v2566_v18 = vpop.f32.mrf.mxu2  ;;  %v7829_v27 = vpop.f32.mrf.mxu3 }
 0x1ca   : > { %v2729_v22 = vpop.f32.mrf.mxu0 }
 0x1cb   : > { %v2818_v53 = vpop.f32.mrf.mxu1  ;;  %2975 = vmatmul.bf16.vlgmr.msra.gmra.mxu3 %v6884_v21  ;;  %v2730_v48 = vadd.f32 %v2729_v22, %v7757_v8  ;;  %v5568_v8 = vld [vmem:[%s10074_s3 + $0x370] sm:$0xf] }
 0x1cc   : > { %v5569_v22 = vor.u32 %v5913_v6, %v5568_v8 }
 0x1cd   : > { %v7840_v7 = vadd.f32 %v2818_v53, %v2730_v48  ;;  %2768 = vmatmul.bf16.gmra.mxu0 %v7838_v16  ;;  %v1614_v53 = vrot.slane %v1538_v20, 1  ;;  %v5633_v48 = vor.u32 %v5929_v12, %v5632_v17  ;;  %v5624_v20 = vld [vmem:[%s10074_s3 + $0x3e0] sm:$0xf] }
 0x1ce   : > { %2857 = vmatmul.bf16.gmra.mxu1 %v7690_v57  ;;  %3056 = vmatpush.bf16.msra.mxu0 %v5569_v22  ;;  %v5625_v17 = vor.u32 %v5927_v40, %v5624_v20 }
 0x1cf   : > { %3145 = vmatpush.bf16.msra.mxu1 %v5633_v48  ;;  %v1615_v6 = vor.u32 %v1614_v53, %v10315_v33  ;;  %v5616_v53 = vld [vmem:[%s10074_s3 + $0x3d0] sm:$0xf] }
 0x1d1   : > { %v2568_v46 = vpop.f32.mrf.mxu2  ;;  %v7843_v55 = vpop.f32.mrf.mxu3  ;;  %v7902_v33 = vsel %vm1574_vm9, %v1615_v6, %v6836_v32  ;;  %v5923_v6 = vld [vmem:[%s10074_s3 + $0x3c4] sm:$0xf0] }
 0x1d2   : > { %v2731_v1 = vpop.f32.mrf.mxu0  ;;  %10316 = vst [vmem:[#allocation49_spill] sm:$0xff] %v7902_v33 }
 0x1d3   : > { %v2820_v43 = vpop.f32.mrf.mxu1  ;;  %v2732_v54 = vadd.f32 %v2731_v1, %v2643_v61  ;;  %v5560_v61 = vld [vmem:[%s10074_s3 + $0x360] sm:$0xf]  ;;  %v5911_v1 = vld [vmem:[%s10074_s3 + $0x364] sm:$0xf0]  ;;  %3146 = vmatpush.bf16.msra.mxu1 %v5625_v17 }
 0x1d4   : > { %v5561_v8 = vor.u32 %v5911_v1, %v5560_v61  ;;  %v5909_v61 = vld [vmem:[%s10074_s3 + $0x354] sm:$0xf0]  ;;  %v5907_v17 = vld [vmem:[%s10074_s3 + $0x344] sm:$0xf0] }
 0x1d5   : > { %v7860_v49 = vadd.f32 %v2820_v43, %v2732_v54  ;;  %v2567_v43 = vadd.f32 %v2566_v18, %v7174_v51  ;;  %v5552_v18 = vld [vmem:[%s10074_s3 + $0x350] sm:$0xf] }
 0x1d6   : > { %3057 = vmatpush.bf16.msra.mxu0 %v5561_v8  ;;  %v5553_v20 = vor.u32 %v5909_v61, %v5552_v18  ;;  %v5925_v8 = vld [vmem:[%s10074_s3 + $0x3d4] sm:$0xf0]  ;;  %v2569_v61 = vadd.f32 %v2568_v46, %v7174_v51 }
 0x1d7   : > { %2886 = vmatmul.bf16.vlgmr.msra.gmra.mxu2 %v6604_v11  ;;  %v7898_v40 = vadd.f32 %v7808_v58, %v2567_v43  ;;  %v5617_v63 = vor.u32 %v5925_v8, %v5616_v53  ;;  %v5608_v58 = vld [vmem:[%s10074_s3 + $0x3c0] sm:$0xf]  ;;  %v5536_v8 = vld [vmem:[%s10074_s3 + $0x330] sm:$0xf]  ;;  %v5921_v46 = vld [vmem:[%s10074_s3 + $0x3b4] sm:$0xf0] }
 0x1d9   : > { %v7880_v22 = vpop.f32.mrf.mxu3  ;;  %3147 = vmatpush.bf16.msra.mxu1 %v5617_v63  ;;  %v5600_v63 = vld [vmem:[%s10074_s3 + $0x3b0] sm:$0xf] }
 0x1da   : > { %v2571_v54 = vpop.f32.mrf.mxu2  ;;  %v2734_v12 = vpop.f32.mrf.mxu0  ;;  %3058 = vmatpush.bf16.msra.mxu0 %v5553_v20  ;;  %v5905_v20 = vld [vmem:[%s10074_s3 + $0x334] sm:$0xf0] }
 0x1db   : > { %v2823_v48 = vpop.f32.mrf.mxu1  ;;  %2980 = vmatmul.bf16.gmra.mxu3 %v7004_v5  ;;  %v2735_v1 = vadd.f32 %v2734_v12, %v7796_v2  ;;  %v5544_v2 = vld [vmem:[%s10074_s3 + $0x340] sm:$0xf]  ;;  %v5609_v12 = vor.u32 %v5923_v6, %v5608_v58  ;;  %v10317_v58 = vshll.u32 %v7724_v50, 16  ;;  %v5601_v6 = vor.u32 %v5921_v46, %v5600_v63 }
 0x1dc   : > { %v5545_v43 = vor.u32 %v5907_v17, %v5544_v2  ;;  %v5537_v17 = vor.u32 %v5905_v20, %v5536_v8  ;;  %v7941_v5 = vadd.f32 %v7829_v27, %v2569_v61  ;;  %v5919_v27 = vld [vmem:[%s10074_s3 + $0x3a4] sm:$0xf0]  ;;  %v10318_v61 = vshrl.u32 %v7724_v50, 16 }
 0x1dd   : > { %v7904_v11 = vadd.f32 %v2823_v48, %v2735_v1  ;;  %2773 = vmatmul.bf16.gmra.mxu0 %v7902_v33  ;;  %3148 = vmatpush.bf16.msra.mxu1 %v5609_v12  ;;  %v5903_v12 = vld [vmem:[%s10074_s3 + $0x324] sm:$0xf0] }
 0x1de   : > { %2862 = vmatmul.bf16.gmra.mxu1 %v7777_v62  ;;  %3059 = vmatpush.bf16.msra.mxu0 %v5545_v43  ;;  %v1617_v43 = vrot.slane %v10317_v58, 1 }
 0x1e0   : > { %v1618_v20 = vor.u32 %v1617_v43, %v10318_v61  ;;  %v5584_v43 = vld [vmem:[%s10074_s3 + $0x390] sm:$0xf] }
 0x1e1   : > { %v7919_v18 = vpop.f32.mrf.mxu3  ;;  %3149 = vmatpush.bf16.msra.mxu1 %v5601_v6  ;;  %v5901_v6 = vld [vmem:[%s10074_s3 + $0x314] sm:$0xf0] }
 0x1e2   : > { %v2573_v48 = vpop.f32.mrf.mxu2  ;;  %v2736_v53 = vpop.f32.mrf.mxu0  ;;  %3060 = vmatpush.bf16.msra.mxu0 %v5537_v17 }
 0x1e3   : > { %v2825_v1 = vpop.f32.mrf.mxu1  ;;  %v2737_v2 = vadd.f32 %v2736_v53, %v7824_v29  ;;  %v5528_v29 = vld [vmem:[%s10074_s3 + $0x320] sm:$0xf] }
 0x1e4   : > { %v5592_v53 = vld [vmem:[%s10074_s3 + $0x3a0] sm:$0xf]  ;;  %v5529_v8 = vor.u32 %v5903_v12, %v5528_v29 }
 0x1e5   : > { %v7937_v21 = vadd.f32 %v2825_v1, %v2737_v2  ;;  %v2572_v1 = vadd.f32 %v2571_v54, %v7174_v51  ;;  %v5593_v63 = vor.u32 %v5919_v27, %v5592_v53  ;;  %v5520_v54 = vld [vmem:[%s10074_s3 + $0x310] sm:$0xf]  ;;  %v5917_v53 = vld [vmem:[%s10074_s3 + $0x394] sm:$0xf0]  ;;  %v7976_v27 = vsel %vm1574_vm9, %v1618_v20, %v6836_v32  ;;  %v5915_v20 = vld [vmem:[%s10074_s3 + $0x384] sm:$0xf0] }
 0x1e6   : > { %3061 = vmatpush.bf16.msra.mxu0 %v5529_v8  ;;  %v5521_v12 = vor.u32 %v5901_v6, %v5520_v54  ;;  %10319 = vst [vmem:[#allocation50_spill] sm:$0xff] %v7976_v27  ;;  %v5585_v61 = vor.u32 %v5917_v53, %v5584_v43  ;;  %v10320_v6 = vshrl.u32 %v7330_v31, 16 }
 0x1e7   : > { %2891 = vmatmul.bf16.gmra.mxu2 %v6701_v24  ;;  %3150 = vmatpush.bf16.msra.mxu1 %v5593_v63  ;;  %v2661_v8 = vadd.f32 %v7843_v55, %v2572_v1  ;;  %v5899_v63 = vld [vmem:[%s10074_s3 + $0x304] sm:$0xf0]  ;;  %v5576_v55 = vld [vmem:[%s10074_s3 + $0x380] sm:$0xf] }
 0x1e8   : > { %v1642_v43 = vrot.slane %v10320_v6, 7  ;;  %v10323_v6 = vshrl.u32 %v7782_v3, 16 }
 0x1e9   : > { %v2667_v17 = vpop.f32.mrf.mxu3 }
 0x1ea   : > { %v2576_v2 = vpop.f32.mrf.mxu2  ;;  %v2739_v46 = vpop.f32.mrf.mxu0  ;;  %3062 = vmatpush.bf16.msra.mxu0 %v5521_v12  ;;  %v10321_v12 = vshll.u32 %v7782_v3, 16 }
 0x1eb   : > { %v2828_v58 = vpop.f32.mrf.mxu1  ;;  %2985 = vmatmul.bf16.gmra.mxu3 %v7069_v28  ;;  %v2740_v29 = vadd.f32 %v2739_v46, %v7834_v4  ;;  %v5512_v4 = vld [vmem:[%s10074_s3 + $0x300] sm:$0xf]  ;;  %3151 = vmatpush.bf16.msra.mxu1 %v5585_v61  ;;  %v5577_v46 = vor.u32 %v5915_v20, %v5576_v55  ;;  %v10322_v61 = vshll.u32 %v7330_v31, 16 }
 0x1ec   : > { %v5513_v1 = vor.u32 %v5899_v63, %v5512_v4  ;;  %v1620_v4 = vrot.slane %v10321_v12, 1 }
 0x1ed   : > { %2778 = vmatmul.bf16.gmra.mxu0 %v7976_v27  ;;  %v1645_v55 = vor.u32 %v10322_v61, %v1642_v43 }
 0x1ee   : > { %2867 = vmatmul.bf16.gmra.mxu1 %v7818_v37  ;;  %v7978_v37 = vadd.f32 %v2828_v58, %v2740_v29  ;;  %v2574_v29 = vadd.f32 %v2573_v48, %v7174_v51  ;;  %3063 = vmatpush.bf16.msra.mxu0 %v5513_v1  ;;  %v2577_v48 = vadd.f32 %v2576_v2, %v7174_v51 }
 0x1ef   : > { %3152 = vmatpush.bf16.msra.mxu1 %v5577_v46  ;;  %v1621_v1 = vor.u32 %v1620_v4, %v10323_v6  ;;  %v8010_v46 = vsel %vm1429_vm13, %v6531_v45, %v1645_v55 }
 0x1f0   : > { %v2663_v20 = vadd.f32 %v7880_v22, %v2574_v29  ;;  %10324 = vst [vmem:[#allocation51_spill] sm:$0xff] %v8010_v46  ;;  %v2666_v22 = vadd.f32 %v7919_v18, %v2577_v48 }
 0x1f1   : > { %v2670_v54 = vpop.f32.mrf.mxu3  ;;  %v8018_v2 = vsel %vm1574_vm9, %v1621_v1, %v6836_v32 }
 0x1f2   : > { %v2578_v58 = vpop.f32.mrf.mxu2  ;;  %v2741_v53 = vpop.f32.mrf.mxu0  ;;  %10325 = vst [vmem:[#allocation52_spill] sm:$0xff] %v8018_v2 }
 0x1f3   : > { %v2830_v28 = vpop.f32.mrf.mxu1  ;;  %v2742_v62 = vadd.f32 %v2741_v53, %v7863_v38  ;;  %v2579_v4 = vadd.f32 %v2578_v58, %v7174_v51 }
 0x1f5   : > { %v7999_v63 = vadd.f32 %v2830_v28, %v2742_v62 }
 0x1f7   : > { %2896 = vmatmul.bf16.gmra.mxu2 %v6782_v23 }
 0x1f9   : > { %v2672_v38 = vpop.f32.mrf.mxu3 }
 0x1fa   : > { %v2581_v57 = vpop.f32.mrf.mxu2  ;;  %v2744_v28 = vpop.f32.mrf.mxu0 }
 0x1fb   : > { %v2833_v62 = vpop.f32.mrf.mxu1  ;;  %2990 = vmatmul.bf16.gmra.mxu3 %v7183_v35  ;;  %v2745_v43 = vadd.f32 %v2744_v28, %v7898_v40  ;;  %v2668_v40 = vadd.f32 %v2667_v17, %v2579_v4  ;;  %v2582_v18 = vadd.f32 %v2581_v57, %v7174_v51 }
 0x1fd   : > { %v8020_v29 = vadd.f32 %v2833_v62, %v2745_v43  ;;  %2783 = vmatmul.bf16.gmra.mxu0 %v8018_v2  ;;  %v2671_v43 = vadd.f32 %v2670_v54, %v2582_v18 }
 0x1fe   : > { %2872 = vmatmul.bf16.gmra.mxu1 %v8010_v46 }
 0x201   : > { %v2675_v12 = vpop.f32.mrf.mxu3 }
 0x202   : > { %v2583_v53 = vpop.f32.mrf.mxu2  ;;  %v2746_v61 = vpop.f32.mrf.mxu0 }
 0x203   : > { %v2835_v55 = vpop.f32.mrf.mxu1  ;;  %v2747_v6 = vadd.f32 %v2746_v61, %v7941_v5  ;;  %v2584_v17 = vadd.f32 %v2583_v53, %v7174_v51 }
 0x205   : > { %v8025_v35 = vadd.f32 %v2835_v55, %v2747_v6 }
 0x207   : > { %2901 = vmatmul.bf16.gmra.mxu2 %v6820_v39 }
 0x209   : > { %v2677_v1 = vpop.f32.mrf.mxu3 }
 0x20a   : > { %v2586_v48 = vpop.f32.mrf.mxu2  ;;  %v2749_v28 = vpop.f32.mrf.mxu0 }
 0x20b   : > { %v2838_v62 = vpop.f32.mrf.mxu1  ;;  %2995 = vmatmul.bf16.gmra.mxu3 %v7270_v26  ;;  %v2750_v58 = vadd.f32 %v2749_v28, %v2661_v8  ;;  %v2587_v26 = vadd.f32 %v2586_v48, %v7174_v51 }
 0x20d   : > { %v8031_v46 = vadd.f32 %v2838_v62, %v2750_v58  ;;  %3064 = vmatmul.bf16.vlgmr.msra.gmra.mxu0 %v6763_v15  ;;  %v2676_v53 = vadd.f32 %v2675_v12, %v2587_v26 }
 0x20e   : > { %3153 = vmatmul.bf16.vlgmr.msra.gmra.mxu1 %v6701_v24  ;;  %v2673_v24 = vadd.f32 %v2672_v38, %v2584_v17 }
 0x211   : > { %v2680_v61 = vpop.f32.mrf.mxu3 }
 0x212   : > { %v2588_v5 = vpop.f32.mrf.mxu2  ;;  %v2751_v4 = vpop.f32.mrf.mxu0 }
 0x213   : > { %v2840_v57 = vpop.f32.mrf.mxu1  ;;  %v2752_v55 = vadd.f32 %v2751_v4, %v2663_v20  ;;  %v10328_v20 = vld [vmem:[#allocation8_spill] sm:$0xff]  ;;  %v2589_v38 = vadd.f32 %v2588_v5, %v7174_v51 }
 0x215   : > { %v8035_v6 = vadd.f32 %v2840_v57, %v2752_v55 }
 0x217   : > { %10326 = vst [vmem:[#allocation53_spill] sm:$0xff] %v8035_v6  ;;  %2906 = vmatmul.bf16.gmra.mxu2 %v6913_v41  ;;  %v10330_v6 = vld [vmem:[#allocation15_spill] sm:$0xff] }
 0x219   : > { %v2682_v54 = vpop.f32.mrf.mxu3 }
 0x21a   : > { %v2591_v8 = vpop.f32.mrf.mxu2  ;;  %v2754_v18 = vpop.f32.mrf.mxu0 }
 0x21b   : > { %v2843_v28 = vpop.f32.mrf.mxu1  ;;  %3000 = vmatmul.bf16.gmra.mxu3 %v7334_v10  ;;  %v2755_v62 = vadd.f32 %v2754_v18, %v2666_v22  ;;  %v2592_v10 = vadd.f32 %v2591_v8, %v7174_v51 }
 0x21d   : > { %v8041_v58 = vadd.f32 %v2843_v28, %v2755_v62  ;;  %3069 = vmatmul.bf16.gmra.mxu0 %v10328_v20  ;;  %v10331_v28 = vld [vmem:[#allocation32_spill] sm:$0xff]  ;;  %v2681_v5 = vadd.f32 %v2680_v61, %v2592_v10 }
 0x21e   : > { %3158 = vmatmul.bf16.gmra.mxu1 %v6782_v23  ;;  %v2678_v23 = vadd.f32 %v2677_v1, %v2589_v38 }
 0x21f   : > { %10327 = vst [vmem:[#allocation54_spill] sm:$0xff] %v8041_v58  ;;  %v10335_v58 = vld [vmem:[#allocation18_spill] sm:$0xff] }
 0x221   : > { %v2685_v57 = vpop.f32.mrf.mxu3 }
 0x222   : > { %v2593_v4 = vpop.f32.mrf.mxu2  ;;  %v2756_v17 = vpop.f32.mrf.mxu0 }
 0x223   : > { %v2845_v48 = vpop.f32.mrf.mxu1  ;;  %v2757_v55 = vadd.f32 %v2756_v17, %v2668_v40  ;;  %v10333_v40 = vld [vmem:[#allocation11_spill] sm:$0xff]  ;;  %v2594_v1 = vadd.f32 %v2593_v4, %v7174_v51 }
 0x225   : > { %v8045_v15 = vadd.f32 %v2845_v48, %v2757_v55 }
 0x227   : > { %10329 = vst [vmem:[#allocation55_spill] sm:$0xff] %v8045_v15  ;;  %2911 = vmatmul.bf16.gmra.mxu2 %v10330_v6 }
 0x229   : > { %v2687_v26 = vpop.f32.mrf.mxu3 }
 0x22a   : > { %v2596_v22 = vpop.f32.mrf.mxu2  ;;  %v2759_v12 = vpop.f32.mrf.mxu0 }
 0x22b   : > { %v2848_v18 = vpop.f32.mrf.mxu1  ;;  %3005 = vmatmul.bf16.gmra.mxu3 %v10331_v28  ;;  %v2760_v62 = vadd.f32 %v2759_v12, %v2671_v43  ;;  %v2597_v28 = vadd.f32 %v2596_v22, %v7174_v51 }
 0x22d   : > { %v8051_v20 = vadd.f32 %v2848_v18, %v2760_v62  ;;  %3074 = vmatmul.bf16.gmra.mxu0 %v10333_v40  ;;  %v10336_v18 = vld [vmem:[#allocation35_spill] sm:$0xff]  ;;  %v2686_v4 = vadd.f32 %v2685_v57, %v2597_v28 }
 0x22e   : > { %3163 = vmatmul.bf16.gmra.mxu1 %v6820_v39  ;;  %v2683_v39 = vadd.f32 %v2682_v54, %v2594_v1 }
 0x22f   : > { %10332 = vst [vmem:[#allocation56_spill] sm:$0xff] %v8051_v20  ;;  %v10338_v20 = vld [vmem:[#allocation21_spill] sm:$0xff] }
 0x231   : > { %v2690_v48 = vpop.f32.mrf.mxu3 }
 0x232   : > { %v2598_v17 = vpop.f32.mrf.mxu2  ;;  %v2761_v38 = vpop.f32.mrf.mxu0 }
 0x233   : > { %v2850_v8 = vpop.f32.mrf.mxu1  ;;  %v2762_v55 = vadd.f32 %v2761_v38, %v2673_v24  ;;  %v10337_v24 = vld [vmem:[#allocation14_spill] sm:$0xff]  ;;  %v2599_v54 = vadd.f32 %v2598_v17, %v7174_v51 }
 0x235   : > { %v8055_v15 = vadd.f32 %v2850_v8, %v2762_v55 }
 0x237   : > { %10334 = vst [vmem:[#allocation57_spill] sm:$0xff] %v8055_v15  ;;  %2916 = vmatmul.bf16.gmra.mxu2 %v10335_v58 }
 0x239   : > { %v2692_v10 = vpop.f32.mrf.mxu3 }
 0x23a   : > { %v2601_v43 = vpop.f32.mrf.mxu2  ;;  %v2764_v61 = vpop.f32.mrf.mxu0 }
 0x23b   : > { %v2853_v12 = vpop.f32.mrf.mxu1  ;;  %3010 = vmatmul.bf16.gmra.mxu3 %v10336_v18  ;;  %v2765_v62 = vadd.f32 %v2764_v61, %v2676_v53  ;;  %v2602_v18 = vadd.f32 %v2601_v43, %v7174_v51 }
 0x23d   : > { %v8061_v40 = vadd.f32 %v2853_v12, %v2765_v62  ;;  %3079 = vmatmul.bf16.gmra.mxu0 %v10337_v24  ;;  %v2691_v17 = vadd.f32 %v2690_v48, %v2602_v18  ;;  %v10342_v18 = vld [vmem:[#allocation36_spill] sm:$0xff] }
 0x23e   : > { %3168 = vmatmul.bf16.gmra.mxu1 %v6913_v41  ;;  %v2688_v41 = vadd.f32 %v2687_v26, %v2599_v54 }
 0x241   : > { %v2695_v8 = vpop.f32.mrf.mxu3 }
 0x242   : > { %v2603_v38 = vpop.f32.mrf.mxu2  ;;  %v2766_v1 = vpop.f32.mrf.mxu0 }
 0x243   : > { %v2855_v22 = vpop.f32.mrf.mxu1  ;;  %v2767_v55 = vadd.f32 %v2766_v1, %v2678_v23  ;;  %v10340_v23 = vld [vmem:[#allocation17_spill] sm:$0xff]  ;;  %v2604_v26 = vadd.f32 %v2603_v38, %v7174_v51 }
 0x245   : > { %v8065_v15 = vadd.f32 %v2855_v22, %v2767_v55 }
 0x247   : > { %2921 = vmatmul.bf16.gmra.mxu2 %v10338_v20 }
 0x249   : > { %v2697_v57 = vpop.f32.mrf.mxu3 }
 0x24a   : > { %v2606_v53 = vpop.f32.mrf.mxu2  ;;  %v2769_v28 = vpop.f32.mrf.mxu0 }
 0x24b   : > { %v2858_v61 = vpop.f32.mrf.mxu1  ;;  %3015 = vmatmul.bf16.gmra.mxu3 %v7607_v52  ;;  %v2770_v12 = vadd.f32 %v2769_v28, %v2681_v5  ;;  %v2607_v52 = vadd.f32 %v2606_v53, %v7174_v51 }
 0x24d   : > { %v8071_v62 = vadd.f32 %v2858_v61, %v2770_v12  ;;  %3084 = vmatmul.bf16.gmra.mxu0 %v10340_v23  ;;  %v2696_v23 = vadd.f32 %v2695_v8, %v2607_v52 }
 0x24e   : > { %3173 = vmatmul.bf16.gmra.mxu1 %v10330_v6  ;;  %v2693_v6 = vadd.f32 %v2692_v10, %v2604_v26  ;;  %v10344_v26 = vld [vmem:[#allocation38_spill] sm:$0xff] }
 0x24f   : > { %10339 = vst [vmem:[#allocation58_spill] sm:$0xff] %v8071_v62 }
 0x251   : > { %v2976_v22 = vpop.f32.mrf.mxu3 }
 0x252   : > { %v2608_v1 = vpop.f32.mrf.mxu2  ;;  %v2771_v54 = vpop.f32.mrf.mxu0 }
 0x253   : > { %v2860_v43 = vpop.f32.mrf.mxu1  ;;  %v2772_v55 = vadd.f32 %v2771_v54, %v2683_v39  ;;  %v10343_v54 = vld [vmem:[#allocation20_spill] sm:$0xff]  ;;  %v2609_v53 = vadd.f32 %v2608_v1, %v7174_v51 }
 0x255   : > { %v8075_v24 = vadd.f32 %v2860_v43, %v2772_v55 }
 0x257   : > { %10341 = vst [vmem:[#allocation59_spill] sm:$0xff] %v8075_v24  ;;  %2926 = vmatmul.bf16.gmra.mxu2 %v7226_v25 }
 0x259   : > { %v2978_v48 = vpop.f32.mrf.mxu3 }
 0x25a   : > { %v2887_v5 = vpop.f32.mrf.mxu2  ;;  %v2774_v61 = vpop.f32.mrf.mxu0 }
 0x25b   : > { %v2888_v28 = vadd.f32 %v2887_v5, %v10342_v18  ;;  %v2863_v12 = vpop.f32.mrf.mxu1  ;;  %3020 = vmatmul.bf16.gmra.mxu3 %v7751_v13  ;;  %v2775_v38 = vadd.f32 %v2774_v61, %v2686_v4 }
 0x25d   : > { %v8082_v39 = vadd.f32 %v2863_v12, %v2775_v38  ;;  %3089 = vmatmul.bf16.gmra.mxu0 %v10343_v54  ;;  %v2977_v1 = vadd.f32 %v2976_v22, %v2888_v28 }
 0x25e   : > { %3178 = vmatmul.bf16.gmra.mxu1 %v10335_v58  ;;  %v2698_v58 = vadd.f32 %v2697_v57, %v2609_v53 }
 0x261   : > { %v2981_v10 = vpop.f32.mrf.mxu3 }
 0x262   : > { %v2889_v43 = vpop.f32.mrf.mxu2  ;;  %v2776_v24 = vpop.f32.mrf.mxu0 }
 0x263   : > { %v2890_v55 = vadd.f32 %v2889_v43, %v10344_v26  ;;  %v2865_v5 = vpop.f32.mrf.mxu1  ;;  %v2777_v18 = vadd.f32 %v2776_v24, %v2688_v41  ;;  %v10345_v41 = vld [vmem:[#allocation23_spill] sm:$0xff] }
 0x265   : > { %v8087_v62 = vadd.f32 %v2865_v5, %v2777_v18  ;;  %v2979_v18 = vadd.f32 %v2978_v48, %v2890_v55 }
 0x267   : > { %2931 = vmatmul.bf16.gmra.mxu2 %v7305_v44 }
 0x269   : > { %v2983_v52 = vpop.f32.mrf.mxu3 }
 0x26a   : > { %v2892_v4 = vpop.f32.mrf.mxu2  ;;  %v2779_v61 = vpop.f32.mrf.mxu0 }
 0x26b   : > { %v2893_v8 = vadd.f32 %v2892_v4, %v7638_v56  ;;  %v2868_v12 = vpop.f32.mrf.mxu1  ;;  %3025 = vmatmul.bf16.gmra.mxu3 %v7800_v42  ;;  %v2780_v51 = vadd.f32 %v2779_v61, %v2691_v17 }
 0x26d   : > { %v8093_v38 = vadd.f32 %v2868_v12, %v2780_v51  ;;  %3094 = vmatmul.bf16.gmra.mxu0 %v10345_v41 }
 0x26e   : > { %3183 = vmatmul.bf16.gmra.mxu1 %v10338_v20 }
 0x271   : > { %v2986_v43 = vpop.f32.mrf.mxu3 }
 0x272   : > { %v2894_v24 = vpop.f32.mrf.mxu2  ;;  %v2781_v53 = vpop.f32.mrf.mxu0 }
 0x273   : > { %v2895_v57 = vadd.f32 %v2894_v24, %v7702_v19  ;;  %v2870_v26 = vpop.f32.mrf.mxu1  ;;  %v2782_v5 = vadd.f32 %v2781_v53, %v2693_v6  ;;  %v2982_v19 = vadd.f32 %v2981_v10, %v2893_v8  ;;  %v10346_v6 = vld [vmem:[#allocation25_spill] sm:$0xff] }
 0x275   : > { %v8097_v56 = vadd.f32 %v2870_v26, %v2782_v5  ;;  %v8110_v5 = vadd.f32 %v2983_v52, %v2895_v57  ;;  %v5816_v52 = vld [vmem:[%s10074_s3 + $0x74] sm:$0xf] }
 0x277   : > { %2936 = vmatmul.bf16.gmra.mxu2 %v7380_v34 }
 0x279   : > { %v2988_v20 = vpop.f32.mrf.mxu3 }
 0x27a   : > { %v2897_v4 = vpop.f32.mrf.mxu2  ;;  %v2784_v22 = vpop.f32.mrf.mxu0 }
 0x27b   : > { %v2898_v17 = vadd.f32 %v2897_v4, %v7759_v60  ;;  %v2873_v28 = vpop.f32.mrf.mxu1  ;;  %3030 = vmatmul.bf16.gmra.mxu3 %v7838_v16  ;;  %v2785_v61 = vadd.f32 %v2784_v22, %v2696_v23 }
 0x27d   : > { %v8103_v12 = vadd.f32 %v2873_v28, %v2785_v61  ;;  %3099 = vmatmul.bf16.gmra.mxu0 %v10346_v6  ;;  %v8117_v28 = vadd.f32 %v2986_v43, %v2898_v17  ;;  %v10347_v61 = vld [vmem:[#allocation29_spill] sm:$0xff] }
 0x27e   : > { %3188 = vmatmul.bf16.gmra.mxu1 %v7226_v25 }
 0x281   : > { %v2991_v24 = vpop.f32.mrf.mxu3 }
 0x282   : > { %v2899_v51 = vpop.f32.mrf.mxu2  ;;  %v2786_v55 = vpop.f32.mrf.mxu0 }
 0x283   : > { %v2900_v48 = vadd.f32 %v2899_v51, %v7784_v47  ;;  %v2875_v53 = vpop.f32.mrf.mxu1  ;;  %v2787_v26 = vadd.f32 %v2786_v55, %v2698_v58 }
 0x285   : > { %v8107_v60 = vadd.f32 %v2875_v53, %v2787_v26  ;;  %v5814_v53 = vld [vmem:[%s10074_s3 + $0x64] sm:$0xf]  ;;  %v5178_v26 = vld [vmem:[%s10074_s3 + $0x68] sm:$0xf0] }
 0x287   : > { %2941 = vmatmul.bf16.gmra.mxu2 %v7468_v59 }
 0x289   : > { %v8112_v23 = vpop.f32.mrf.mxu3 }
 0x28a   : > { %v2902_v4 = vpop.f32.mrf.mxu2  ;;  %v3065_v8 = vpop.f32.mrf.mxu0 }
 0x28b   : > { %v2903_v10 = vadd.f32 %v2902_v4, %v7802_v9  ;;  %v3154_v22 = vpop.f32.mrf.mxu1  ;;  %3035 = vmatmul.bf16.gmra.mxu3 %v7902_v33  ;;  %v3066_v47 = vadd.f32 %v3065_v8, %v2977_v1  ;;  %v5186_v9 = vld [vmem:[%s10074_s3 + $0x78] sm:$0xf0]  ;;  %v5181_v8 = vor.u32 %v5814_v53, %v5178_v26 }
 0x28c   : > { %v5189_v57 = vor.u32 %v5816_v52, %v5186_v9  ;;  %v8148_v52 = vadd.f32 %v2988_v20, %v2900_v48  ;;  %v5688_v48 = vld [vmem:[%s10074_s3 + $0x460] sm:$0xf] }
 0x28d   : > { %v8119_v58 = vadd.f32 %v3154_v22, %v3066_v47  ;;  %3104 = vmatmul.bf16.gmra.mxu0 %v10347_v61  ;;  %v5945_v47 = vld [vmem:[%s10074_s3 + $0x474] sm:$0xf0] }
 0x28e   : > { %3193 = vmatmul.bf16.gmra.mxu1 %v7305_v44  ;;  %3323 = vmatpush.bf16.msrb.mxu3 %v5189_v57  ;;  %v5170_v57 = vld [vmem:[%s10074_s3 + $0x58] sm:$0xf0]  ;;  %v5640_v44 = vld [vmem:[%s10074_s3 + $0x400] sm:$0xf] }
 0x291   : > { %v8128_v55 = vpop.f32.mrf.mxu3 }
 0x292   : > { %v2904_v51 = vpop.f32.mrf.mxu2  ;;  %v3067_v43 = vpop.f32.mrf.mxu0  ;;  %3324 = vmatpush.bf16.msrb.mxu3 %v5181_v8  ;;  %v5810_v8 = vld [vmem:[%s10074_s3 + $0x44] sm:$0xf] }
 0x293   : > { %v8131_v1 = vadd.f32 %v2904_v51, %v7820_v0  ;;  %v3156_v17 = vpop.f32.mrf.mxu1  ;;  %v3068_v4 = vadd.f32 %v3067_v43, %v2979_v18  ;;  %v5696_v0 = vld [vmem:[%s10074_s3 + $0x470] sm:$0xf]  ;;  %v5812_v18 = vld [vmem:[%s10074_s3 + $0x54] sm:$0xf] }
 0x294   : > { %v5697_v9 = vor.u32 %v5945_v47, %v5696_v0  ;;  %v5173_v51 = vor.u32 %v5812_v18, %v5170_v57  ;;  %v5162_v47 = vld [vmem:[%s10074_s3 + $0x48] sm:$0xf0]  ;;  %v5680_v18 = vld [vmem:[%s10074_s3 + $0x450] sm:$0xf]  ;;  %v8181_v57 = vadd.f32 %v2991_v24, %v2903_v10 }
 0x295   : > { %v8139_v22 = vadd.f32 %v3156_v17, %v3068_v4  ;;  %v5943_v4 = vld [vmem:[%s10074_s3 + $0x464] sm:$0xf0] }
 0x296   : > { %3234 = vmatpush.bf16.msrb.mxu2 %v5697_v9  ;;  %3325 = vmatpush.bf16.msrb.mxu3 %v5173_v51  ;;  %v5689_v0 = vor.u32 %v5943_v4, %v5688_v48  ;;  %v5941_v9 = vld [vmem:[%s10074_s3 + $0x454] sm:$0xf0]  ;;  %v5165_v51 = vor.u32 %v5810_v8, %v5162_v47  ;;  %v5154_v48 = vld [vmem:[%s10074_s3 + $0x38] sm:$0xf0]  ;;  %v5806_v47 = vld [vmem:[%s10074_s3 + $0x24] sm:$0xf] }
 0x297   : > { %2946 = vmatmul.bf16.gmra.mxu2 %v7592_v36 }
 0x299   : > { %v8156_v17 = vpop.f32.mrf.mxu3 }
 0x29a   : > { %v2907_v43 = vpop.f32.mrf.mxu2  ;;  %v3070_v26 = vpop.f32.mrf.mxu0  ;;  %3235 = vmatpush.bf16.msrb.mxu2 %v5689_v0  ;;  %3326 = vmatpush.bf16.msrb.mxu3 %v5165_v51  ;;  %v5939_v0 = vld [vmem:[%s10074_s3 + $0x444] sm:$0xf0] }
 0x29b   : > { %v8159_v53 = vadd.f32 %v2907_v43, %v7840_v7  ;;  %v3159_v20 = vpop.f32.mrf.mxu1  ;;  %3040 = vmatmul.bf16.gmra.mxu3 %v7976_v27  ;;  %v3071_v7 = vadd.f32 %v3070_v26, %v2982_v19  ;;  %v5681_v19 = vor.u32 %v5941_v9, %v5680_v18  ;;  %v5808_v26 = vld [vmem:[%s10074_s3 + $0x34] sm:$0xf] }
 0x29c   : > { %v5157_v4 = vor.u32 %v5808_v26, %v5154_v48  ;;  %v2994_v26 = vadd.f32 %v8112_v23, %v8131_v1  ;;  %v5804_v48 = vld [vmem:[%s10074_s3 + $0x14] sm:$0xf]  ;;  %v5656_v23 = vld [vmem:[%s10074_s3 + $0x420] sm:$0xf]  ;;  %v5935_v1 = vld [vmem:[%s10074_s3 + $0x424] sm:$0xf0] }
 0x29d   : > { %v8183_v43 = vadd.f32 %v3159_v20, %v3071_v7  ;;  %3109 = vmatmul.bf16.gmra.mxu0 %v7447_v14  ;;  %v5672_v7 = vld [vmem:[%s10074_s3 + $0x440] sm:$0xf] }
 0x29e   : > { %3198 = vmatmul.bf16.gmra.mxu1 %v7380_v34  ;;  %3236 = vmatpush.bf16.msrb.mxu2 %v5681_v19  ;;  %v5673_v9 = vor.u32 %v5939_v0, %v5672_v7  ;;  %v5664_v19 = vld [vmem:[%s10074_s3 + $0x430] sm:$0xf] }
 0x29f   : > { %3327 = vmatpush.bf16.msrb.mxu3 %v5157_v4 }
 0x2a1   : > { %v8192_v24 = vpop.f32.mrf.mxu3 }
 0x2a2   : > { %v2909_v34 = vpop.f32.mrf.mxu2  ;;  %v3072_v20 = vpop.f32.mrf.mxu0  ;;  %3237 = vmatpush.bf16.msrb.mxu2 %v5673_v9 }
 0x2a3   : > { %v2910_v10 = vadd.f32 %v2909_v34, %v7860_v49  ;;  %v3161_v8 = vpop.f32.mrf.mxu1  ;;  %v3073_v18 = vadd.f32 %v3072_v20, %v8110_v5  ;;  %v5146_v34 = vld [vmem:[%s10074_s3 + $0x28] sm:$0xf0]  ;;  %v5937_v5 = vld [vmem:[%s10074_s3 + $0x434] sm:$0xf0]  ;;  %v5138_v20 = vld [vmem:[%s10074_s3 + $0x18] sm:$0xf0] }
 0x2a4   : > { %v5149_v49 = vor.u32 %v5806_v47, %v5146_v34  ;;  %v5665_v4 = vor.u32 %v5937_v5, %v5664_v19  ;;  %v5802_v34 = vld [vmem:[%s10074_s3 + $0x4] sm:$0xf]  ;;  %v5130_v19 = vld [vmem:[%s10074_s3 + $0x8] sm:$0xf0]  ;;  %v5648_v5 = vld [vmem:[%s10074_s3 + $0x410] sm:$0xf] }
 0x2a5   : > { %v8208_v51 = vadd.f32 %v3161_v8, %v3073_v18  ;;  %v5141_v8 = vor.u32 %v5804_v48, %v5138_v20  ;;  %v5933_v48 = vld [vmem:[%s10074_s3 + $0x414] sm:$0xf0]  ;;  %v5133_v20 = vor.u32 %v5802_v34, %v5130_v19 }
 0x2a6   : > { %3328 = vmatpush.bf16.msrb.mxu3 %v5149_v49  ;;  %3238 = vmatpush.bf16.msrb.mxu2 %v5665_v4  ;;  %v5657_v49 = vor.u32 %v5935_v1, %v5656_v23  ;;  %v2997_v4 = vadd.f32 %v8128_v55, %v8159_v53  ;;  %v5931_v55 = vld [vmem:[%s10074_s3 + $0x404] sm:$0xf0] }
 0x2a7   : > { %2951 = vmatmul.bf16.gmra.mxu2 %v7724_v50 }
 0x2a9   : > { %v3003_v0 = vpop.f32.mrf.mxu3 }
 0x2aa   : > { %v2912_v7 = vpop.f32.mrf.mxu2  ;;  %v3075_v18 = vpop.f32.mrf.mxu0  ;;  %3329 = vmatpush.bf16.msrb.mxu3 %v5141_v8  ;;  %3239 = vmatpush.bf16.msrb.mxu2 %v5657_v49 }
 0x2ab   : > { %v2913_v47 = vadd.f32 %v2912_v7, %v7904_v11  ;;  %v3164_v9 = vpop.f32.mrf.mxu1  ;;  %3045 = vmatmul.bf16.gmra.mxu3 %v8018_v2  ;;  %v3076_v11 = vadd.f32 %v3075_v18, %v8117_v28  ;;  %v5649_v28 = vor.u32 %v5933_v48, %v5648_v5  ;;  %v10348_v5 = vld [vmem:[#allocation30_spill] sm:$0xff] }
 0x2ac   : > { %v8268_v48 = vsel %vm1574_vm9, %v10348_v5, %v6836_v32 }
 0x2ad   : > { %v8249_v8 = vadd.f32 %v3164_v9, %v3076_v11  ;;  %3114 = vmatmul.bf16.gmra.mxu0 %v7549_v30  ;;  %v5641_v9 = vor.u32 %v5931_v55, %v5640_v44  ;;  %10349 = vst [vmem:[#allocation36_spill] sm:$0xff] %v8268_v48 }
 0x2ae   : > { %3203 = vmatmul.bf16.gmra.mxu1 %v7468_v59  ;;  %3330 = vmatpush.bf16.msrb.mxu3 %v5133_v20 }
 0x2af   : > { %3240 = vmatpush.bf16.msrb.mxu2 %v5649_v28 }
 0x2b1   : > { %v3006_v18 = vpop.f32.mrf.mxu3 }
 0x2b2   : > { %v2914_v7 = vpop.f32.mrf.mxu2  ;;  %v3077_v1 = vpop.f32.mrf.mxu0 }
 0x2b3   : > { %v2915_v23 = vadd.f32 %v2914_v7, %v7937_v21  ;;  %v3166_v59 = vpop.f32.mrf.mxu1  ;;  %v3078_v53 = vadd.f32 %v3077_v1, %v8148_v52  ;;  %3241 = vmatpush.bf16.msrb.mxu2 %v5641_v9  ;;  %v2999_v21 = vadd.f32 %v8156_v17, %v2910_v10  ;;  %v10350_v17 = vld [vmem:[#allocation41_spill] sm:$0xff] }
 0x2b5   : > { %v8260_v34 = vadd.f32 %v3166_v59, %v3078_v53  ;;  %v3002_v59 = vadd.f32 %v8192_v24, %v2913_v47 }
 0x2b7   : > { %2956 = vmatmul.bf16.gmra.mxu2 %v7782_v3 }
 0x2b9   : > { %v3008_v49 = vpop.f32.mrf.mxu3 }
 0x2ba   : > { %v2917_v11 = vpop.f32.mrf.mxu2  ;;  %v3080_v20 = vpop.f32.mrf.mxu0 }
 0x2bb   : > { %v2918_v19 = vadd.f32 %v2917_v11, %v7978_v37  ;;  %v3169_v28 = vpop.f32.mrf.mxu1  ;;  %3050 = vmatmul.bf16.gmra.mxu3 %v8268_v48  ;;  %v3081_v44 = vadd.f32 %v3080_v20, %v8181_v57  ;;  %v8281_v11 = vadd.f32 %v3003_v0, %v2915_v23  ;;  %v10362_v48 = vld [vmem:[#allocation51_spill] sm:$0xff] }
 0x2bd   : > { %v8274_v52 = vadd.f32 %v3169_v28, %v3081_v44  ;;  %3119 = vmatmul.bf16.gmra.mxu0 %v10350_v17  ;;  %v8288_v28 = vadd.f32 %v3006_v18, %v2918_v19  ;;  %v10351_v44 = vld [vmem:[#allocation44_spill] sm:$0xff] }
 0x2be   : > { %3208 = vmatmul.bf16.gmra.mxu1 %v7592_v36  ;;  %v5848_v18 = vld [vmem:[%s10074_s3 + $0x174] sm:$0xf]  ;;  %v5826_v36 = vld [vmem:[%s10074_s3 + $0xc4] sm:$0xf] }
 0x2c1   : > { %v3011_v10 = vpop.f32.mrf.mxu3 }
 0x2c2   : > { %v2919_v37 = vpop.f32.mrf.mxu2  ;;  %v3082_v1 = vpop.f32.mrf.mxu0 }
 0x2c3   : > { %v2920_v7 = vadd.f32 %v2919_v37, %v7999_v63  ;;  %v3171_v55 = vpop.f32.mrf.mxu1  ;;  %v3083_v53 = vadd.f32 %v3082_v1, %v2994_v26 }
 0x2c5   : > { %v8278_v9 = vadd.f32 %v3171_v55, %v3083_v53  ;;  %v5832_v55 = vld [vmem:[%s10074_s3 + $0xf4] sm:$0xf] }
 0x2c7   : > { %2961 = vmatmul.bf16.gmra.mxu2 %v7330_v31 }
 0x2c9   : > { %v8283_v5 = vpop.f32.mrf.mxu3 }
 0x2ca   : > { %v2922_v57 = vpop.f32.mrf.mxu2  ;;  %v3085_v47 = vpop.f32.mrf.mxu0 }
 0x2cb   : > { %v2923_v24 = vadd.f32 %v2922_v57, %v8020_v29  ;;  %v3174_v20 = vpop.f32.mrf.mxu1  ;;  %3331 = vmatmul.bf16.vlgmr.msrb.gmra.mxu3 %v6531_v45  ;;  %v3086_v63 = vadd.f32 %v3085_v47, %v2997_v4  ;;  %v5250_v4 = vld [vmem:[%s10074_s3 + $0xf8] sm:$0xf0] }
 0x2cc   : > { %v5253_v53 = vor.u32 %v5832_v55, %v5250_v4  ;;  %v5306_v55 = vld [vmem:[%s10074_s3 + $0x168] sm:$0xf0] }
 0x2cd   : > { %v8290_v26 = vadd.f32 %v3174_v20, %v3086_v63  ;;  %3124 = vmatmul.bf16.gmra.mxu0 %v10351_v44  ;;  %v10352_v20 = vld [vmem:[#allocation16_spill] sm:$0xff]  ;;  %v8313_v63 = vadd.f32 %v3008_v49, %v2920_v7 }
 0x2ce   : > { %3213 = vmatmul.bf16.gmra.mxu1 %v7724_v50  ;;  %3412 = vmatpush.bf16.msrb.mxu0 %v5253_v53  ;;  %v10355_v50 = vld [vmem:[#allocation47_spill] sm:$0xff] }
 0x2d1   : > { %v8293_v23 = vpop.f32.mrf.mxu3 }
 0x2d2   : > { %v2924_v0 = vpop.f32.mrf.mxu2  ;;  %v3087_v29 = vpop.f32.mrf.mxu0 }
 0x2d3   : > { %v8296_v37 = vadd.f32 %v2924_v0, %v8025_v35  ;;  %v3176_v1 = vpop.f32.mrf.mxu1  ;;  %v3088_v19 = vadd.f32 %v3087_v29, %v2999_v21  ;;  %v5314_v35 = vld [vmem:[%s10074_s3 + $0x178] sm:$0xf0]  ;;  %v5830_v0 = vld [vmem:[%s10074_s3 + $0xe4] sm:$0xf]  ;;  %v5242_v21 = vld [vmem:[%s10074_s3 + $0xe8] sm:$0xf0] }
 0x2d4   : > { %v5317_v57 = vor.u32 %v5848_v18, %v5314_v35  ;;  %v5846_v29 = vld [vmem:[%s10074_s3 + $0x164] sm:$0xf]  ;;  %v5828_v35 = vld [vmem:[%s10074_s3 + $0xd4] sm:$0xf] }
 0x2d5   : > { %v8310_v47 = vadd.f32 %v3176_v1, %v3088_v19  ;;  %v5245_v1 = vor.u32 %v5830_v0, %v5242_v21  ;;  %v5309_v4 = vor.u32 %v5846_v29, %v5306_v55  ;;  %v5844_v0 = vld [vmem:[%s10074_s3 + $0x154] sm:$0xf]  ;;  %v8346_v55 = vadd.f32 %v3011_v10, %v2923_v24  ;;  %v5290_v24 = vld [vmem:[%s10074_s3 + $0x148] sm:$0xf0] }
 0x2d6   : > { %3501 = vmatpush.bf16.msrb.mxu1 %v5317_v57  ;;  %v5234_v57 = vld [vmem:[%s10074_s3 + $0xd8] sm:$0xf0]  ;;  %v10353_v21 = vld [vmem:[#allocation4_spill] sm:$0xff] }
 0x2d7   : > { %3242 = vmatmul.bf16.vlgmr.msrb.gmra.mxu2 %v10352_v20  ;;  %3413 = vmatpush.bf16.msrb.mxu0 %v5245_v1  ;;  %v5237_v29 = vor.u32 %v5828_v35, %v5234_v57  ;;  %v5298_v1 = vld [vmem:[%s10074_s3 + $0x158] sm:$0xf0] }
 0x2d8   : > { %v10356_v57 = vld [vmem:[#allocation53_spill] sm:$0xff] }
 0x2d9   : > { %v8327_v7 = vpop.f32.mrf.mxu3 }
 0x2da   : > { %v2927_v49 = vpop.f32.mrf.mxu2  ;;  %v3090_v19 = vpop.f32.mrf.mxu0  ;;  %3502 = vmatpush.bf16.msrb.mxu1 %v5309_v4  ;;  %v5842_v4 = vld [vmem:[%s10074_s3 + $0x144] sm:$0xf] }
 0x2db   : > { %v8330_v18 = vadd.f32 %v2927_v49, %v8031_v46  ;;  %v3179_v53 = vpop.f32.mrf.mxu1  ;;  %3336 = vmatmul.bf16.gmra.mxu3 %v10353_v21  ;;  %v3091_v46 = vadd.f32 %v3090_v19, %v3002_v59  ;;  %v5301_v49 = vor.u32 %v5844_v0, %v5298_v1  ;;  %v5226_v59 = vld [vmem:[%s10074_s3 + $0xc8] sm:$0xf0]  ;;  %3414 = vmatpush.bf16.msrb.mxu0 %v5237_v29  ;;  %v5824_v21 = vld [vmem:[%s10074_s3 + $0xb4] sm:$0xf] }
 0x2dc   : > { %v5229_v10 = vor.u32 %v5826_v36, %v5226_v59  ;;  %v5293_v19 = vor.u32 %v5842_v4, %v5290_v24  ;;  %v5218_v36 = vld [vmem:[%s10074_s3 + $0xb8] sm:$0xf0]  ;;  %v5840_v29 = vld [vmem:[%s10074_s3 + $0x134] sm:$0xf] }
 0x2dd   : > { %3129 = vmatmul.bf16.gmra.mxu0 %v10355_v50  ;;  %v5221_v59 = vor.u32 %v5824_v21, %v5218_v36  ;;  %v5282_v4 = vld [vmem:[%s10074_s3 + $0x138] sm:$0xf0]  ;;  %v5822_v50 = vld [vmem:[%s10074_s3 + $0xa4] sm:$0xf] }
 0x2de   : > { %3218 = vmatmul.bf16.gmra.mxu1 %v7782_v3  ;;  %v8348_v3 = vadd.f32 %v3179_v53, %v3091_v46  ;;  %v5838_v21 = vld [vmem:[%s10074_s3 + $0x124] sm:$0xf] }
 0x2df   : > { %3503 = vmatpush.bf16.msrb.mxu1 %v5301_v49  ;;  %3415 = vmatpush.bf16.msrb.mxu0 %v5229_v10  ;;  %v5285_v10 = vor.u32 %v5840_v29, %v5282_v4  ;;  %v10359_v36 = vld [vmem:[#allocation54_spill] sm:$0xff]  ;;  %v5820_v4 = vld [vmem:[%s10074_s3 + $0x94] sm:$0xf] }
 0x2e0   : > { %10354 = vst [vmem:[#allocation38_spill] sm:$0xff] %v8348_v3  ;;  %v10367_v3 = vmov 0  }
 0x2e1   : > { %v8363_v35 = vpop.f32.mrf.mxu3 }
 0x2e2   : > { %v2929_v53 = vpop.f32.mrf.mxu2  ;;  %v3092_v46 = vpop.f32.mrf.mxu0 }
 0x2e3   : > { %v2930_v0 = vadd.f32 %v2929_v53, %v10356_v57  ;;  %v3181_v1 = vpop.f32.mrf.mxu1  ;;  %v3093_v49 = vadd.f32 %v3092_v46, %v8281_v11  ;;  %3504 = vmatpush.bf16.msrb.mxu1 %v5293_v19  ;;  %v10358_v53 = vld [vmem:[#allocation19_spill] sm:$0xff]  ;;  %3416 = vmatpush.bf16.msrb.mxu0 %v5221_v59  ;;  %v3014_v57 = vadd.f32 %v8283_v5, %v8296_v37 }
 0x2e4   : > { %v5210_v11 = vld [vmem:[%s10074_s3 + $0xa8] sm:$0xf0] }
 0x2e5   : > { %v8379_v24 = vadd.f32 %v3181_v1, %v3093_v49  ;;  %v5213_v19 = vor.u32 %v5822_v50, %v5210_v11  ;;  %v5274_v46 = vld [vmem:[%s10074_s3 + $0x128] sm:$0xf0]  ;;  %v5202_v50 = vld [vmem:[%s10074_s3 + $0x98] sm:$0xf0]  ;;  %v10360_v11 = vld [vmem:[#allocation6_spill] sm:$0xff] }
 0x2e6   : > { %v5277_v1 = vor.u32 %v5838_v21, %v5274_v46  ;;  %v5205_v46 = vor.u32 %v5820_v4, %v5202_v50  ;;  %v10363_v50 = vld [vmem:[#allocation55_spill] sm:$0xff] }
 0x2e7   : > { %10357 = vst [vmem:[#allocation25_spill] sm:$0xff] %v8379_v24  ;;  %3247 = vmatmul.bf16.gmra.mxu2 %v10358_v53  ;;  %3505 = vmatpush.bf16.msrb.mxu1 %v5285_v10  ;;  %v5836_v10 = vld [vmem:[%s10074_s3 + $0x114] sm:$0xf] }
 0x2e8   : > { %3417 = vmatpush.bf16.msrb.mxu0 %v5213_v19  ;;  %v5266_v19 = vld [vmem:[%s10074_s3 + $0x118] sm:$0xf0] }
 0x2e9   : > { %v3023_v37 = vpop.f32.mrf.mxu3 }
 0x2ea   : > { %v2932_v5 = vpop.f32.mrf.mxu2  ;;  %v3095_v49 = vpop.f32.mrf.mxu0 }
 0x2eb   : > { %v2933_v29 = vadd.f32 %v2932_v5, %v10359_v36  ;;  %v3184_v59 = vpop.f32.mrf.mxu1  ;;  %3341 = vmatmul.bf16.gmra.mxu3 %v10360_v11  ;;  %v3096_v21 = vadd.f32 %v3095_v49, %v8288_v28  ;;  %3506 = vmatpush.bf16.msrb.mxu1 %v5277_v1  ;;  %v3017_v5 = vadd.f32 %v8293_v23, %v8330_v18  ;;  %v5818_v11 = vld [vmem:[%s10074_s3 + $0x84] sm:$0xf]  ;;  %v5194_v28 = vld [vmem:[%s10074_s3 + $0x88] sm:$0xf0] }
 0x2ec   : > { %v5269_v36 = vor.u32 %v5836_v10, %v5266_v19  ;;  %v5834_v1 = vld [vmem:[%s10074_s3 + $0x104] sm:$0xf]  ;;  %3418 = vmatpush.bf16.msrb.mxu0 %v5205_v46  ;;  %v5197_v49 = vor.u32 %v5818_v11, %v5194_v28  ;;  %v5258_v23 = vld [vmem:[%s10074_s3 + $0x108] sm:$0xf0]  ;;  %v3019_v11 = vadd.f32 %v8327_v7, %v2930_v0  ;;  %v10370_v0 = vld [vmem:[#allocation57_spill] sm:$0xff] }
 0x2ed   : > { %3134 = vmatmul.bf16.gmra.mxu0 %v10362_v48  ;;  %v5261_v18 = vor.u32 %v5834_v1, %v5258_v23  ;;  %v10365_v46 = vld [vmem:[#allocation22_spill] sm:$0xff] }
 0x2ee   : > { %3223 = vmatmul.bf16.gmra.mxu1 %v7330_v31  ;;  %v8414_v31 = vadd.f32 %v3184_v59, %v3096_v21 }
 0x2ef   : > { %3507 = vmatpush.bf16.msrb.mxu1 %v5269_v36  ;;  %v10366_v36 = vld [vmem:[#allocation56_spill] sm:$0xff] }
 0x2f0   : > { %10361 = vst [vmem:[#allocation29_spill] sm:$0xff] %v8414_v31  ;;  %3419 = vmatpush.bf16.msrb.mxu0 %v5197_v49 }
 0x2f1   : > { %v3026_v4 = vpop.f32.mrf.mxu3 }
 0x2f2   : > { %v2934_v59 = vpop.f32.mrf.mxu2  ;;  %v3097_v21 = vpop.f32.mrf.mxu0 }
 0x2f3   : > { %v2935_v10 = vadd.f32 %v2934_v59, %v10363_v50  ;;  %v3186_v19 = vpop.f32.mrf.mxu1  ;;  %v3098_v48 = vadd.f32 %v3097_v21, %v8313_v63  ;;  %3508 = vmatpush.bf16.msrb.mxu1 %v5261_v18  ;;  %v10368_v59 = vld [vmem:[#allocation8_spill] sm:$0xff]  ;;  %v3022_v63 = vadd.f32 %v8363_v35, %v2933_v29 }
 0x2f5   : > { %v8431_v31 = vadd.f32 %v3186_v19, %v3098_v48 }
 0x2f7   : > { %10364 = vst [vmem:[#allocation30_spill] sm:$0xff] %v8431_v31  ;;  %3252 = vmatmul.bf16.gmra.mxu2 %v10365_v46  ;;  %v10372_v31 = vld [vmem:[#allocation24_spill] sm:$0xff] }
 0x2f9   : > { %v3028_v24 = vpop.f32.mrf.mxu3 }
 0x2fa   : > { %v2937_v28 = vpop.f32.mrf.mxu2  ;;  %v3100_v23 = vpop.f32.mrf.mxu0 }
 0x2fb   : > { %v2938_v1 = vadd.f32 %v2937_v28, %v10366_v36  ;;  %v3189_v44 = vpop.f32.mrf.mxu1  ;;  %3346 = vmatmul.bf16.gmra.mxu3 %v10368_v59  ;;  %v3101_v49 = vadd.f32 %v3100_v23, %v8346_v55  ;;  %v3024_v59 = vadd.f32 %v3023_v37, %v2935_v10  ;;  %v10373_v23 = vld [vmem:[#allocation11_spill] sm:$0xff] }
 0x2fd   : > { %v8440_v48 = vadd.f32 %v3189_v44, %v3101_v49  ;;  %3139 = vmatmul.bf16.gmra.mxu0 %v6531_v45 }
 0x2fe   : > { %3228 = vmatmul.bf16.gmra.mxu1 %v10367_v3 }
 0x2ff   : > { %10369 = vst [vmem:[#allocation53_spill] sm:$0xff] %v8440_v48 }
 0x301   : > { %v3031_v7 = vpop.f32.mrf.mxu3 }
 0x302   : > { %v2939_v18 = vpop.f32.mrf.mxu2  ;;  %v3102_v21 = vpop.f32.mrf.mxu0 }
 0x303   : > { %v2940_v50 = vadd.f32 %v2939_v18, %v10370_v0  ;;  %v3191_v19 = vpop.f32.mrf.mxu1  ;;  %v3103_v28 = vadd.f32 %v3102_v21, %v3014_v57  ;;  %v3027_v18 = vadd.f32 %v3026_v4, %v2938_v1 }
 0x305   : > { %v8444_v36 = vadd.f32 %v3191_v19, %v3103_v28  ;;  %v3029_v45 = vadd.f32 %v3028_v24, %v2940_v50 }
 0x307   : > { %10371 = vst [vmem:[#allocation54_spill] sm:$0xff] %v8444_v36  ;;  %3257 = vmatmul.bf16.gmra.mxu2 %v10372_v31 }
 0x309   : > { %v3033_v55 = vpop.f32.mrf.mxu3 }
 0x30a   : > { %v2942_v2 = vpop.f32.mrf.mxu2  ;;  %v3105_v44 = vpop.f32.mrf.mxu0 }
 0x30b   : > { %v2943_v35 = vadd.f32 %v2942_v2, %v8061_v40  ;;  %v3194_v29 = vpop.f32.mrf.mxu1  ;;  %3351 = vmatmul.bf16.gmra.mxu3 %v10373_v23  ;;  %v3106_v49 = vadd.f32 %v3105_v44, %v3017_v5  ;;  %v10376_v40 = vld [vmem:[#allocation28_spill] sm:$0xff]  ;;  %v10377_v5 = vld [vmem:[#allocation58_spill] sm:$0xff] }
 0x30d   : > { %v8450_v0 = vadd.f32 %v3194_v29, %v3106_v49  ;;  %3420 = vmatmul.bf16.vlgmr.msrb.gmra.mxu0 %v10367_v3  ;;  %v10378_v29 = vld [vmem:[#allocation12_spill] sm:$0xff]  ;;  %v10379_v49 = vld [vmem:[#allocation14_spill] sm:$0xff] }
 0x30e   : > { %3509 = vmatmul.bf16.vlgmr.msrb.gmra.mxu1 %v6836_v32 }
 0x30f   : > { %10374 = vst [vmem:[#allocation55_spill] sm:$0xff] %v8450_v0 }
 0x311   : > { %v3036_v21 = vpop.f32.mrf.mxu3 }
 0x312   : > { %v2944_v57 = vpop.f32.mrf.mxu2  ;;  %v3107_v10 = vpop.f32.mrf.mxu0 }
 0x313   : > { %v2945_v37 = vadd.f32 %v2944_v57, %v8065_v15  ;;  %v3196_v19 = vpop.f32.mrf.mxu1  ;;  %v3108_v28 = vadd.f32 %v3107_v10, %v3019_v11  ;;  %v3032_v15 = vadd.f32 %v3031_v7, %v2943_v35  ;;  %v10380_v11 = vld [vmem:[#allocation3_spill] sm:$0xff]  ;;  %v10384_v35 = vld [vmem:[#allocation17_spill] sm:$0xff] }
 0x315   : > { %v8454_v2 = vadd.f32 %v3196_v19, %v3108_v28  ;;  %v10381_v28 = vld [vmem:[#allocation59_spill] sm:$0xff] }
 0x317   : > { %10375 = vst [vmem:[#allocation22_spill] sm:$0xff] %v8454_v2  ;;  %3262 = vmatmul.bf16.gmra.mxu2 %v10376_v40 }
 0x319   : > { %v3038_v23 = vpop.f32.mrf.mxu3 }
 0x31a   : > { %v2947_v36 = vpop.f32.mrf.mxu2  ;;  %v3110_v1 = vpop.f32.mrf.mxu0 }
 0x31b   : > { %v2948_v4 = vadd.f32 %v2947_v36, %v10377_v5  ;;  %v3199_v44 = vpop.f32.mrf.mxu1  ;;  %3356 = vmatmul.bf16.gmra.mxu3 %v10379_v49  ;;  %v3111_v3 = vadd.f32 %v3110_v1, %v3022_v63  ;;  %v10383_v5 = vld [vmem:[#allocation32_spill] sm:$0xff] }
 0x31d   : > { %v8460_v57 = vadd.f32 %v3199_v44, %v3111_v3  ;;  %3425 = vmatmul.bf16.gmra.mxu0 %v10380_v11  ;;  %v3037_v44 = vadd.f32 %v3036_v21, %v2948_v4 }
 0x31e   : > { %3514 = vmatmul.bf16.gmra.mxu1 %v10378_v29  ;;  %v3034_v29 = vadd.f32 %v3033_v55, %v2945_v37 }
 0x321   : > { %v3041_v19 = vpop.f32.mrf.mxu3 }
 0x322   : > { %v2949_v10 = vpop.f32.mrf.mxu2  ;;  %v3112_v50 = vpop.f32.mrf.mxu0 }
 0x323   : > { %v2950_v24 = vadd.f32 %v2949_v10, %v10381_v28  ;;  %v3201_v2 = vpop.f32.mrf.mxu1  ;;  %v3113_v0 = vadd.f32 %v3112_v50, %v3024_v59  ;;  %v10385_v59 = vld [vmem:[#allocation5_spill] sm:$0xff] }
 0x325   : > { %v8464_v36 = vadd.f32 %v3201_v2, %v3113_v0 }
 0x327   : > { %10382 = vst [vmem:[#allocation56_spill] sm:$0xff] %v8464_v36  ;;  %3267 = vmatmul.bf16.gmra.mxu2 %v10383_v5 }
 0x329   : > { %v3043_v49 = vpop.f32.mrf.mxu3 }
 0x32a   : > { %v2952_v48 = vpop.f32.mrf.mxu2  ;;  %v3115_v3 = vpop.f32.mrf.mxu0 }
 0x32b   : > { %v2953_v63 = vadd.f32 %v2952_v48, %v8082_v39  ;;  %v3204_v7 = vpop.f32.mrf.mxu1  ;;  %3361 = vmatmul.bf16.gmra.mxu3 %v10384_v35  ;;  %v3116_v1 = vadd.f32 %v3115_v3, %v3027_v18  ;;  %v10386_v48 = vld [vmem:[#allocation35_spill] sm:$0xff] }
 0x32d   : > { %v8470_v10 = vadd.f32 %v3204_v7, %v3116_v1  ;;  %3430 = vmatmul.bf16.gmra.mxu0 %v10385_v59  ;;  %v10387_v7 = vld [vmem:[#allocation7_spill] sm:$0xff] }
 0x32e   : > { %3519 = vmatmul.bf16.gmra.mxu1 %v10352_v20  ;;  %v3039_v20 = vadd.f32 %v3038_v23, %v2950_v24 }
 0x331   : > { %v3046_v2 = vpop.f32.mrf.mxu3 }
 0x332   : > { %v2954_v0 = vpop.f32.mrf.mxu2  ;;  %v3117_v37 = vpop.f32.mrf.mxu0 }
 0x333   : > { %v2955_v55 = vadd.f32 %v2954_v0, %v8087_v62  ;;  %v3206_v28 = vpop.f32.mrf.mxu1  ;;  %v3118_v50 = vadd.f32 %v3117_v37, %v3029_v45 }
 0x335   : > { %v8474_v39 = vadd.f32 %v3206_v28, %v3118_v50  ;;  %v3042_v28 = vadd.f32 %v3041_v19, %v2953_v63 }
 0x337   : > { %3272 = vmatmul.bf16.gmra.mxu2 %v10386_v48 }
 0x339   : > { %v3048_v35 = vpop.f32.mrf.mxu3 }
 0x33a   : > { %v2957_v36 = vpop.f32.mrf.mxu2  ;;  %v3120_v21 = vpop.f32.mrf.mxu0 }
 0x33b   : > { %v2958_v18 = vadd.f32 %v2957_v36, %v8093_v38  ;;  %v3209_v4 = vpop.f32.mrf.mxu1  ;;  %3366 = vmatmul.bf16.gmra.mxu3 %v10343_v54  ;;  %v3121_v3 = vadd.f32 %v3120_v21, %v3032_v15  ;;  %v10388_v36 = vld [vmem:[#allocation40_spill] sm:$0xff] }
 0x33d   : > { %v8480_v62 = vadd.f32 %v3209_v4, %v3121_v3  ;;  %3435 = vmatmul.bf16.gmra.mxu0 %v10387_v7 }
 0x33e   : > { %3524 = vmatmul.bf16.gmra.mxu1 %v10358_v53 }
 0x341   : > { %v3051_v1 = vpop.f32.mrf.mxu3 }
 0x342   : > { %v2959_v45 = vpop.f32.mrf.mxu2  ;;  %v3122_v23 = vpop.f32.mrf.mxu0 }
 0x343   : > { %v2960_v0 = vadd.f32 %v2959_v45, %v8097_v56  ;;  %v3211_v24 = vpop.f32.mrf.mxu1  ;;  %v3123_v37 = vadd.f32 %v3122_v23, %v3034_v29  ;;  %v3044_v56 = vadd.f32 %v3043_v49, %v2955_v55  ;;  %v10389_v29 = vld [vmem:[#allocation9_spill] sm:$0xff] }
 0x345   : > { %v8484_v38 = vadd.f32 %v3211_v24, %v3123_v37 }
 0x347   : > { %3277 = vmatmul.bf16.gmra.mxu2 %v10388_v36 }
 0x349   : > { %v3053_v53 = vpop.f32.mrf.mxu3 }
 0x34a   : > { %v2962_v50 = vpop.f32.mrf.mxu2  ;;  %v3125_v21 = vpop.f32.mrf.mxu0 }
 0x34b   : > { %v2963_v15 = vadd.f32 %v2962_v50, %v8103_v12  ;;  %v3214_v4 = vpop.f32.mrf.mxu1  ;;  %3371 = vmatmul.bf16.gmra.mxu3 %v10345_v41  ;;  %v3126_v3 = vadd.f32 %v3125_v21, %v3037_v44  ;;  %v3047_v50 = vadd.f32 %v3046_v2, %v2958_v18  ;;  %v10391_v2 = vld [vmem:[#allocation13_spill] sm:$0xff] }
 0x34d   : > { %v8490_v45 = vadd.f32 %v3214_v4, %v3126_v3  ;;  %3440 = vmatmul.bf16.gmra.mxu0 %v10389_v29  ;;  %v3049_v4 = vadd.f32 %v3048_v35, %v2960_v0 }
 0x34e   : > { %3529 = vmatmul.bf16.gmra.mxu1 %v10365_v46 }
 0x351   : > { %v8493_v63 = vpop.f32.mrf.mxu3 }
 0x352   : > { %v2964_v19 = vpop.f32.mrf.mxu2  ;;  %v3127_v24 = vpop.f32.mrf.mxu0 }
 0x353   : > { %v2965_v23 = vadd.f32 %v2964_v19, %v8107_v60  ;;  %v3216_v37 = vpop.f32.mrf.mxu1  ;;  %v3128_v12 = vadd.f32 %v3127_v24, %v3039_v20 }
 0x355   : > { %v8496_v54 = vadd.f32 %v3216_v37, %v3128_v12  ;;  %v3052_v37 = vadd.f32 %v3051_v1, %v2963_v15  ;;  %v10394_v1 = vld [vmem:[#allocation15_spill] sm:$0xff] }
 0x357   : > { %3282 = vmatmul.bf16.gmra.mxu2 %v7751_v13 }
 0x359   : > { %v8499_v44 = vpop.f32.mrf.mxu3 }
 0x35a   : > { %v3243_v41 = vpop.f32.mrf.mxu2  ;;  %v3130_v55 = vpop.f32.mrf.mxu0 }
 0x35b   : > { %v8502_v49 = vadd.f32 %v3243_v41, %v8119_v58  ;;  %v3219_v21 = vpop.f32.mrf.mxu1  ;;  %3376 = vmatmul.bf16.gmra.mxu3 %v10346_v6  ;;  %v3131_v60 = vadd.f32 %v3130_v55, %v3042_v28 }
 0x35d   : > { %10390 = vst [vmem:[#allocation57_spill] sm:$0xff] %v8502_v49  ;;  %v8506_v20 = vadd.f32 %v3219_v21, %v3131_v60  ;;  %3445 = vmatmul.bf16.gmra.mxu0 %v10391_v2  ;;  %v3054_v60 = vadd.f32 %v3053_v53, %v2965_v23 }
 0x35e   : > { %3534 = vmatmul.bf16.gmra.mxu1 %v10372_v31 }
 0x361   : > { %v8509_v3 = vpop.f32.mrf.mxu3 }
 0x362   : > { %v3245_v18 = vpop.f32.mrf.mxu2  ;;  %v3132_v41 = vpop.f32.mrf.mxu0 }
 0x363   : > { %v8512_v19 = vadd.f32 %v3245_v18, %v8139_v22  ;;  %v3221_v58 = vpop.f32.mrf.mxu1  ;;  %v3133_v24 = vadd.f32 %v3132_v41, %v3044_v56 }
 0x365   : > { %10392 = vst [vmem:[#allocation24_spill] sm:$0xff] %v8512_v19  ;;  %v8514_v12 = vadd.f32 %v3221_v58, %v3133_v24 }
 0x367   : > { %3287 = vmatmul.bf16.gmra.mxu2 %v7800_v42 }
 0x369   : > { %v8517_v35 = vpop.f32.mrf.mxu3 }
 0x36a   : > { %v3248_v28 = vpop.f32.mrf.mxu2  ;;  %v3135_v55 = vpop.f32.mrf.mxu0 }
 0x36b   : > { %v8520_v0 = vadd.f32 %v3248_v28, %v8183_v43  ;;  %v3224_v21 = vpop.f32.mrf.mxu1  ;;  %3381 = vmatmul.bf16.gmra.mxu3 %v10347_v61  ;;  %v3136_v22 = vadd.f32 %v3135_v55, %v3047_v50 }
 0x36d   : > { %10393 = vst [vmem:[#allocation28_spill] sm:$0xff] %v8520_v0  ;;  %v8524_v56 = vadd.f32 %v3224_v21, %v3136_v22  ;;  %3450 = vmatmul.bf16.gmra.mxu0 %v10394_v1 }
 0x36e   : > { %3539 = vmatmul.bf16.gmra.mxu1 %v10376_v40 }
 0x371   : > { %v8527_v18 = vpop.f32.mrf.mxu3 }
 0x372   : > { %v3250_v15 = vpop.f32.mrf.mxu2  ;;  %v3137_v43 = vpop.f32.mrf.mxu0 }
 0x373   : > { %v8530_v41 = vadd.f32 %v3250_v15, %v8208_v51  ;;  %v3226_v58 = vpop.f32.mrf.mxu1  ;;  %v3138_v24 = vadd.f32 %v3137_v43, %v3049_v4  ;;  %v10397_v4 = vld [vmem:[#allocation18_spill] sm:$0xff] }
 0x375   : > { %10395 = vst [vmem:[#allocation58_spill] sm:$0xff] %v8530_v41  ;;  %v8532_v28 = vadd.f32 %v3226_v58, %v3138_v24  ;;  %v6258_v24 = vld [vmem:[%s10075_s4] sm:$0x3] }
 0x377   : > { %3292 = vmatmul.bf16.gmra.mxu2 %v7838_v16 }
 0x379   : > { %v8535_v50 = vpop.f32.mrf.mxu3 }
 0x37a   : > { %v3253_v0 = vpop.f32.mrf.mxu2  ;;  %v3140_v23 = vpop.f32.mrf.mxu0 }
 0x37b   : > { %v8538_v53 = vadd.f32 %v3253_v0, %v8249_v8  ;;  %v3229_v55 = vpop.f32.mrf.mxu1  ;;  %3386 = vmatmul.bf16.gmra.mxu3 %v7447_v14  ;;  %v3141_v51 = vadd.f32 %v3140_v23, %v3052_v37 }
 0x37d   : > { %10396 = vst [vmem:[#allocation3_spill] sm:$0xff] %v8538_v53  ;;  %v8542_v21 = vadd.f32 %v3229_v55, %v3141_v51  ;;  %3455 = vmatmul.bf16.gmra.mxu0 %v10397_v4  ;;  %v8553_v53 = vperm.slane %v6258_v24, 1 }
 0x37e   : > { %3544 = vmatmul.bf16.gmra.mxu1 %v10383_v5 }
 0x37f   : > { %v3333_v23 = vadd.f32 %v8493_v63, %v8553_v53  ;;  %v3335_v63 = vadd.f32 %v8499_v44, %v8553_v53 }
 0x381   : > { %v8545_v15 = vpop.f32.mrf.mxu3 }
 0x382   : > { %v3255_v22 = vpop.f32.mrf.mxu2  ;;  %v3142_v58 = vpop.f32.mrf.mxu0 }
 0x383   : > { %v8548_v43 = vadd.f32 %v3255_v22, %v8260_v34  ;;  %v3231_v8 = vpop.f32.mrf.mxu1  ;;  %v3143_v0 = vadd.f32 %v3142_v58, %v3054_v60 }
 0x385   : > { %10398 = vst [vmem:[#allocation59_spill] sm:$0xff] %v8548_v43  ;;  %v8555_v37 = vadd.f32 %v3231_v8, %v3143_v0  ;;  %v10400_v0 = vld [vmem:[#allocation21_spill] sm:$0xff] }
 0x387   : > { %3297 = vmatmul.bf16.gmra.mxu2 %v7902_v33 }
 0x389   : > { %v8560_v51 = vpop.f32.mrf.mxu3 }
 0x38a   : > { %v3258_v55 = vpop.f32.mrf.mxu2  ;;  %v3421_v60 = vpop.f32.mrf.mxu0 }
 0x38b   : > { %v8563_v34 = vadd.f32 %v3258_v55, %v8274_v52  ;;  %v3510_v22 = vpop.f32.mrf.mxu1  ;;  %3391 = vmatmul.bf16.gmra.mxu3 %v7549_v30  ;;  %v3422_v58 = vadd.f32 %v3421_v60, %v3333_v23  ;;  %v3338_v23 = vadd.f32 %v8509_v3, %v8553_v53  ;;  %v5880_v3 = vld [vmem:[%s10074_s3 + $0x274] sm:$0xf] }
 0x38d   : > { %10399 = vst [vmem:[#allocation32_spill] sm:$0xff] %v8563_v34  ;;  %v8567_v8 = vadd.f32 %v3510_v22, %v3422_v58  ;;  %3460 = vmatmul.bf16.gmra.mxu0 %v10400_v0 }
 0x38e   : > { %3549 = vmatmul.bf16.gmra.mxu1 %v10386_v48 }
 0x391   : > { %v8572_v43 = vpop.f32.mrf.mxu3 }
 0x392   : > { %v3260_v24 = vpop.f32.mrf.mxu2  ;;  %v3423_v55 = vpop.f32.mrf.mxu0 }
 0x393   : > { %v8575_v52 = vadd.f32 %v3260_v24, %v8278_v9  ;;  %v3512_v34 = vpop.f32.mrf.mxu1  ;;  %v3424_v41 = vadd.f32 %v3423_v55, %v3335_v63  ;;  %v5878_v63 = vld [vmem:[%s10074_s3 + $0x264] sm:$0xf]  ;;  %v5864_v24 = vld [vmem:[%s10074_s3 + $0x1f4] sm:$0xf]  ;;  %v5378_v55 = vld [vmem:[%s10074_s3 + $0x1f8] sm:$0xf0] }
 0x395   : > { %10401 = vst [vmem:[#allocation13_spill] sm:$0xff] %v8575_v52  ;;  %v8577_v19 = vadd.f32 %v3512_v34, %v3424_v41 }
 0x397   : > { %3302 = vmatmul.bf16.gmra.mxu2 %v7976_v27 }
 0x399   : > { %v8582_v22 = vpop.f32.mrf.mxu3 }
 0x39a   : > { %v3263_v60 = vpop.f32.mrf.mxu2  ;;  %v3426_v58 = vpop.f32.mrf.mxu0 }
 0x39b   : > { %v8585_v44 = vadd.f32 %v3263_v60, %v8290_v26  ;;  %v3515_v49 = vpop.f32.mrf.mxu1  ;;  %3396 = vmatmul.bf16.gmra.mxu3 %v10350_v17  ;;  %v3427_v9 = vadd.f32 %v3426_v58, %v3338_v23  ;;  %v5442_v26 = vld [vmem:[%s10074_s3 + $0x278] sm:$0xf0]  ;;  %v3340_v23 = vadd.f32 %v8517_v35, %v8553_v53  ;;  %v5876_v17 = vld [vmem:[%s10074_s3 + $0x254] sm:$0xf] }
 0x39c   : > { %v5445_v34 = vor.u32 %v5880_v3, %v5442_v26  ;;  %v5381_v3 = vor.u32 %v5864_v24, %v5378_v55  ;;  %v10406_v55 = vld [vmem:[#allocation38_spill] sm:$0xff] }
 0x39d   : > { %10402 = vst [vmem:[#allocation15_spill] sm:$0xff] %v8585_v44  ;;  %v8589_v41 = vadd.f32 %v3515_v49, %v3427_v9  ;;  %3465 = vmatmul.bf16.gmra.mxu0 %v7226_v25  ;;  %v5434_v49 = vld [vmem:[%s10074_s3 + $0x268] sm:$0xf0] }
 0x39e   : > { %3554 = vmatmul.bf16.gmra.mxu1 %v10388_v36  ;;  %3679 = vmatpush.bf16.msra.mxu3 %v5445_v34  ;;  %v5437_v9 = vor.u32 %v5878_v63, %v5434_v49  ;;  %v5426_v36 = vld [vmem:[%s10074_s3 + $0x258] sm:$0xf0]  ;;  %v10405_v63 = vld [vmem:[#allocation52_spill] sm:$0xff] }
 0x39f   : > { %3590 = vmatpush.bf16.msra.mxu2 %v5381_v3  ;;  %v5429_v34 = vor.u32 %v5876_v17, %v5426_v36  ;;  %v10410_v36 = vld [vmem:[#allocation26_spill] sm:$0xff] }
 0x3a1   : > { %v8612_v58 = vpop.f32.mrf.mxu3 }
 0x3a2   : > { %v3265_v60 = vpop.f32.mrf.mxu2  ;;  %v3428_v44 = vpop.f32.mrf.mxu0  ;;  %3680 = vmatpush.bf16.msra.mxu3 %v5437_v9  ;;  %v5874_v9 = vld [vmem:[%s10074_s3 + $0x244] sm:$0xf] }
 0x3a3   : > { %v8615_v26 = vadd.f32 %v3265_v60, %v8310_v47  ;;  %v3517_v52 = vpop.f32.mrf.mxu1  ;;  %v3429_v35 = vadd.f32 %v3428_v44, %v3340_v23  ;;  %v3343_v47 = vadd.f32 %v8527_v18, %v8553_v53  ;;  %v5862_v18 = vld [vmem:[%s10074_s3 + $0x1e4] sm:$0xf]  ;;  %v5370_v23 = vld [vmem:[%s10074_s3 + $0x1e8] sm:$0xf0] }
 0x3a4   : > { %v5373_v3 = vor.u32 %v5862_v18, %v5370_v23 }
 0x3a5   : > { %10403 = vst [vmem:[#allocation18_spill] sm:$0xff] %v8615_v26  ;;  %v8623_v30 = vadd.f32 %v3517_v52, %v3429_v35  ;;  %v10408_v52 = vld [vmem:[#allocation44_spill] sm:$0xff]  ;;  %v5362_v35 = vld [vmem:[%s10074_s3 + $0x1d8] sm:$0xf0] }
 0x3a6   : > { %3681 = vmatpush.bf16.msra.mxu3 %v5429_v34  ;;  %3591 = vmatpush.bf16.msra.mxu2 %v5373_v3  ;;  %v5870_v3 = vld [vmem:[%s10074_s3 + $0x224] sm:$0xf] }
 0x3a7   : > { %10404 = vst [vmem:[#allocation21_spill] sm:$0xff] %v8623_v30  ;;  %3307 = vmatmul.bf16.gmra.mxu2 %v10405_v63 }
 0x3a9   : > { %v8628_v24 = vpop.f32.mrf.mxu3 }
 0x3aa   : > { %v3268_v49 = vpop.f32.mrf.mxu2  ;;  %v3431_v26 = vpop.f32.mrf.mxu0 }
 0x3ab   : > { %v8631_v60 = vadd.f32 %v3268_v49, %v10406_v55  ;;  %v3520_v48 = vpop.f32.mrf.mxu1  ;;  %3401 = vmatmul.bf16.gmra.mxu3 %v10408_v52  ;;  %v3432_v44 = vadd.f32 %v3431_v26, %v3343_v47  ;;  %v5860_v26 = vld [vmem:[%s10074_s3 + $0x1d4] sm:$0xf]  ;;  %v5410_v49 = vld [vmem:[%s10074_s3 + $0x238] sm:$0xf0]  ;;  %v3345_v55 = vadd.f32 %v8535_v50, %v8553_v53  ;;  %v5354_v50 = vld [vmem:[%s10074_s3 + $0x1c8] sm:$0xf0] }
 0x3ac   : > { %v5872_v47 = vld [vmem:[%s10074_s3 + $0x234] sm:$0xf]  ;;  %v5365_v23 = vor.u32 %v5860_v26, %v5362_v35 }
 0x3ad   : > { %10407 = vst [vmem:[#allocation38_spill] sm:$0xff] %v8631_v60  ;;  %v8635_v17 = vadd.f32 %v3520_v48, %v3432_v44  ;;  %3470 = vmatmul.bf16.gmra.mxu0 %v10410_v36  ;;  %v5418_v48 = vld [vmem:[%s10074_s3 + $0x248] sm:$0xf0]  ;;  %v10411_v60 = vld [vmem:[#allocation25_spill] sm:$0xff] }
 0x3ae   : > { %3559 = vmatmul.bf16.gmra.mxu1 %v7751_v13  ;;  %v5421_v34 = vor.u32 %v5874_v9, %v5418_v48  ;;  %v5413_v13 = vor.u32 %v5872_v47, %v5410_v49  ;;  %3592 = vmatpush.bf16.msra.mxu2 %v5365_v23  ;;  %v5856_v49 = vld [vmem:[%s10074_s3 + $0x1b4] sm:$0xf] }
 0x3af   : > { %10409 = vst [vmem:[#allocation60_spill] sm:$0xff] %v8635_v17  ;;  %v5858_v17 = vld [vmem:[%s10074_s3 + $0x1c4] sm:$0xf] }
 0x3b0   : > { %3682 = vmatpush.bf16.msra.mxu3 %v5421_v34  ;;  %v5357_v35 = vor.u32 %v5858_v17, %v5354_v50  ;;  %v10414_v34 = vld [vmem:[#allocation36_spill] sm:$0xff] }
 0x3b1   : > { %v8664_v18 = vpop.f32.mrf.mxu3 }
 0x3b2   : > { %v3270_v44 = vpop.f32.mrf.mxu2  ;;  %v3433_v9 = vpop.f32.mrf.mxu0  ;;  %3593 = vmatpush.bf16.msra.mxu2 %v5357_v35  ;;  %v5854_v35 = vld [vmem:[%s10074_s3 + $0x1a4] sm:$0xf] }
 0x3b3   : > { %v8667_v52 = vadd.f32 %v3270_v44, %v10411_v60  ;;  %v3522_v48 = vpop.f32.mrf.mxu1  ;;  %v3434_v14 = vadd.f32 %v3433_v9, %v3345_v55  ;;  %v5402_v60 = vld [vmem:[%s10074_s3 + $0x228] sm:$0xf0]  ;;  %v5346_v55 = vld [vmem:[%s10074_s3 + $0x1b8] sm:$0xf0]  ;;  %v5868_v44 = vld [vmem:[%s10074_s3 + $0x214] sm:$0xf] }
 0x3b4   : > { %3683 = vmatpush.bf16.msra.mxu3 %v5413_v13  ;;  %v5405_v47 = vor.u32 %v5870_v3, %v5402_v60  ;;  %v3348_v13 = vadd.f32 %v8545_v15, %v8553_v53  ;;  %v5349_v9 = vor.u32 %v5856_v49, %v5346_v55  ;;  %v10418_v15 = vld [vmem:[#allocation31_spill] sm:$0xff] }
 0x3b5   : > { %10412 = vst [vmem:[#allocation25_spill] sm:$0xff] %v8667_v52  ;;  %v8681_v26 = vadd.f32 %v3522_v48, %v3434_v14  ;;  %v5394_v14 = vld [vmem:[%s10074_s3 + $0x218] sm:$0xf0]  ;;  %v5338_v49 = vld [vmem:[%s10074_s3 + $0x1a8] sm:$0xf0] }
 0x3b6   : > { %v10415_v48 = vld [vmem:[#allocation29_spill] sm:$0xff]  ;;  %v5397_v52 = vor.u32 %v5868_v44, %v5394_v14  ;;  %3594 = vmatpush.bf16.msra.mxu2 %v5349_v9  ;;  %v5341_v55 = vor.u32 %v5854_v35, %v5338_v49 }
 0x3b7   : > { %10413 = vst [vmem:[#allocation61_spill] sm:$0xff] %v8681_v26  ;;  %3312 = vmatmul.bf16.gmra.mxu2 %v10414_v34  ;;  %v10417_v34 = vld [vmem:[#allocation47_spill] sm:$0xff]  ;;  %v5330_v44 = vld [vmem:[%s10074_s3 + $0x198] sm:$0xf0] }
 0x3b8   : > { %3684 = vmatpush.bf16.msra.mxu3 %v5405_v47  ;;  %v5866_v47 = vld [vmem:[%s10074_s3 + $0x204] sm:$0xf] }
 0x3b9   : > { %v8698_v23 = vpop.f32.mrf.mxu3 }
 0x3ba   : > { %v3273_v17 = vpop.f32.mrf.mxu2  ;;  %v3436_v3 = vpop.f32.mrf.mxu0  ;;  %3595 = vmatpush.bf16.msra.mxu2 %v5341_v55 }
 0x3bb   : > { %v8701_v50 = vadd.f32 %v3273_v17, %v10415_v48  ;;  %v3525_v60 = vpop.f32.mrf.mxu1  ;;  %3406 = vmatmul.bf16.gmra.mxu3 %v10417_v34  ;;  %v3437_v26 = vadd.f32 %v3436_v3, %v3348_v13  ;;  %v3350_v13 = vadd.f32 %v8560_v51, %v8553_v53  ;;  %v10419_v3 = vld [vmem:[#allocation30_spill] sm:$0xff] }
 0x3bc   : > { %3685 = vmatpush.bf16.msra.mxu3 %v5397_v52  ;;  %v5852_v52 = vld [vmem:[%s10074_s3 + $0x194] sm:$0xf] }
 0x3bd   : > { %10416 = vst [vmem:[#allocation29_spill] sm:$0xff] %v8701_v50  ;;  %v8705_v30 = vadd.f32 %v3525_v60, %v3437_v26  ;;  %3475 = vmatmul.bf16.gmra.mxu0 %v10418_v15  ;;  %v5386_v26 = vld [vmem:[%s10074_s3 + $0x208] sm:$0xf0]  ;;  %v5333_v48 = vor.u32 %v5852_v52, %v5330_v44  ;;  %v5850_v50 = vld [vmem:[%s10074_s3 + $0x184] sm:$0xf]  ;;  %v3353_v52 = vadd.f32 %v8572_v43, %v8553_v53 }
 0x3be   : > { %3564 = vmatmul.bf16.gmra.mxu1 %v7800_v42  ;;  %v5389_v14 = vor.u32 %v5866_v47, %v5386_v26  ;;  %v5322_v47 = vld [vmem:[%s10074_s3 + $0x188] sm:$0xf0]  ;;  %v3355_v43 = vadd.f32 %v8582_v22, %v8553_v53 }
 0x3bf   : > { %3596 = vmatpush.bf16.msra.mxu2 %v5333_v48  ;;  %v5325_v55 = vor.u32 %v5850_v50, %v5322_v47  ;;  %v10425_v48 = vld [vmem:[#allocation34_spill] sm:$0xff]  ;;  %v10430_v22 = vld [vmem:[#allocation55_spill] sm:$0xff] }
 0x3c0   : > { %3686 = vmatpush.bf16.msra.mxu3 %v5389_v14  ;;  %v10426_v47 = vld [vmem:[#allocation54_spill] sm:$0xff] }
 0x3c1   : > { %v8728_v9 = vpop.f32.mrf.mxu3 }
 0x3c2   : > { %v3275_v17 = vpop.f32.mrf.mxu2  ;;  %v3438_v35 = vpop.f32.mrf.mxu0 }
 0x3c3   : > { %v8731_v60 = vadd.f32 %v3275_v17, %v10419_v3  ;;  %v3527_v49 = vpop.f32.mrf.mxu1  ;;  %v3439_v51 = vadd.f32 %v3438_v35, %v3350_v13  ;;  %3597 = vmatpush.bf16.msra.mxu2 %v5325_v55  ;;  %v10422_v17 = vld [vmem:[#allocation53_spill] sm:$0xff] }
 0x3c5   : > { %10420 = vst [vmem:[#allocation30_spill] sm:$0xff] %v8731_v60  ;;  %v8739_v26 = vadd.f32 %v3527_v49, %v3439_v51 }
 0x3c7   : > { %10421 = vst [vmem:[#allocation62_spill] sm:$0xff] %v8739_v26  ;;  %3317 = vmatmul.bf16.gmra.mxu2 %v6836_v32 }
 0x3c9   : > { %v8744_v14 = vpop.f32.mrf.mxu3 }
 0x3ca   : > { %v3278_v44 = vpop.f32.mrf.mxu2  ;;  %v3441_v60 = vpop.f32.mrf.mxu0 }
 0x3cb   : > { %v8747_v3 = vadd.f32 %v3278_v44, %v10422_v17  ;;  %v3530_v34 = vpop.f32.mrf.mxu1  ;;  %3687 = vmatmul.bf16.vlgmr.msra.gmra.mxu3 %v10380_v11  ;;  %v3442_v13 = vadd.f32 %v3441_v60, %v3353_v52  ;;  %v10429_v11 = vld [vmem:[#allocation4_spill] sm:$0xff] }
 0x3cd   : > { %10423 = vst [vmem:[#allocation53_spill] sm:$0xff] %v8747_v3  ;;  %v8751_v50 = vadd.f32 %v3530_v34, %v3442_v13  ;;  %3480 = vmatmul.bf16.gmra.mxu0 %v10425_v48  ;;  %v3358_v34 = vadd.f32 %v8612_v58, %v8553_v53  ;;  %v5896_v58 = vld [vmem:[%s10074_s3 + $0x2f4] sm:$0xf] }
 0x3ce   : > { %3569 = vmatmul.bf16.gmra.mxu1 %v7838_v16 }
 0x3cf   : > { %10424 = vst [vmem:[#allocation63_spill] sm:$0xff] %v8751_v50 }
 0x3d1   : > { %v8756_v49 = vpop.f32.mrf.mxu3 }
 0x3d2   : > { %v3280_v35 = vpop.f32.mrf.mxu2  ;;  %v3443_v55 = vpop.f32.mrf.mxu0 }
 0x3d3   : > { %v8759_v51 = vadd.f32 %v3280_v35, %v10426_v47  ;;  %v3532_v44 = vpop.f32.mrf.mxu1  ;;  %v3444_v17 = vadd.f32 %v3443_v55, %v3355_v43  ;;  %v10433_v47 = vld [vmem:[#allocation39_spill] sm:$0xff]  ;;  %v5506_v55 = vld [vmem:[%s10074_s3 + $0x2f8] sm:$0xf0] }
 0x3d5   : > { %10427 = vst [vmem:[#allocation54_spill] sm:$0xff] %v8759_v51  ;;  %v8761_v32 = vadd.f32 %v3532_v44, %v3444_v17  ;;  %v5912_v44 = vld [vmem:[%s10074_s3 + $0x374] sm:$0xf]  ;;  %v5509_v17 = vor.u32 %v5896_v58, %v5506_v55  ;;  %v5910_v58 = vld [vmem:[%s10074_s3 + $0x364] sm:$0xf] }
 0x3d6   : > { %v5562_v55 = vld [vmem:[%s10074_s3 + $0x368] sm:$0xf0] }
 0x3d7   : > { %10428 = vst [vmem:[#allocation64_spill] sm:$0xff] %v8761_v32  ;;  %3598 = vmatmul.bf16.vlgmr.msra.gmra.mxu2 %v10429_v11  ;;  %v5498_v11 = vld [vmem:[%s10074_s3 + $0x2e8] sm:$0xf0]  ;;  %3768 = vmatpush.bf16.msra.mxu0 %v5509_v17 }
 0x3d9   : > { %v8766_v52 = vpop.f32.mrf.mxu3 }
 0x3da   : > { %v3283_v60 = vpop.f32.mrf.mxu2  ;;  %v3446_v3 = vpop.f32.mrf.mxu0 }
 0x3db   : > { %v8769_v13 = vadd.f32 %v3283_v60, %v10430_v22  ;;  %v3535_v16 = vpop.f32.mrf.mxu1  ;;  %3692 = vmatmul.bf16.gmra.mxu3 %v10385_v59  ;;  %v3447_v43 = vadd.f32 %v3446_v3, %v3358_v34  ;;  %v5894_v3 = vld [vmem:[%s10074_s3 + $0x2e4] sm:$0xf]  ;;  %v3360_v34 = vadd.f32 %v8628_v24, %v8553_v53 }
 0x3dc   : > { %v5501_v42 = vor.u32 %v5894_v3, %v5498_v11  ;;  %v5554_v11 = vld [vmem:[%s10074_s3 + $0x358] sm:$0xf0] }
 0x3dd   : > { %10431 = vst [vmem:[#allocation4_spill] sm:$0xff] %v8769_v13  ;;  %v8773_v35 = vadd.f32 %v3535_v16, %v3447_v43  ;;  %3485 = vmatmul.bf16.gmra.mxu0 %v10433_v47  ;;  %v5570_v16 = vld [vmem:[%s10074_s3 + $0x378] sm:$0xf0]  ;;  %v10434_v13 = vld [vmem:[#allocation22_spill] sm:$0xff] }
 0x3de   : > { %3574 = vmatmul.bf16.gmra.mxu1 %v7902_v33  ;;  %v5573_v43 = vor.u32 %v5912_v44, %v5570_v16  ;;  %v10436_v44 = vld [vmem:[#allocation6_spill] sm:$0xff]  ;;  %3769 = vmatpush.bf16.msra.mxu0 %v5501_v42  ;;  %v3363_v16 = vadd.f32 %v8664_v18, %v8553_v53  ;;  %v5892_v18 = vld [vmem:[%s10074_s3 + $0x2d4] sm:$0xf] }
 0x3df   : > { %10432 = vst [vmem:[#allocation55_spill] sm:$0xff] %v8773_v35  ;;  %v5565_v35 = vor.u32 %v5910_v58, %v5562_v55  ;;  %v10438_v42 = vld [vmem:[#allocation42_spill] sm:$0xff]  ;;  %v5546_v55 = vld [vmem:[%s10074_s3 + $0x348] sm:$0xf0] }
 0x3e0   : > { %3857 = vmatpush.bf16.msra.mxu1 %v5573_v43  ;;  %v5906_v58 = vld [vmem:[%s10074_s3 + $0x344] sm:$0xf] }
 0x3e1   : > { %v8796_v22 = vpop.f32.mrf.mxu3 }
 0x3e2   : > { %v3285_v60 = vpop.f32.mrf.mxu2  ;;  %v3448_v59 = vpop.f32.mrf.mxu0 }
 0x3e3   : > { %v8805_v51 = vadd.f32 %v3285_v60, %v10434_v13  ;;  %v3537_v33 = vpop.f32.mrf.mxu1  ;;  %v3449_v24 = vadd.f32 %v3448_v59, %v3360_v34  ;;  %v5890_v34 = vld [vmem:[%s10074_s3 + $0x2c4] sm:$0xf]  ;;  %v5482_v60 = vld [vmem:[%s10074_s3 + $0x2c8] sm:$0xf0] }
 0x3e4   : > { %3858 = vmatpush.bf16.msra.mxu1 %v5565_v35 }
 0x3e5   : > { %10435 = vst [vmem:[#allocation22_spill] sm:$0xff] %v8805_v51  ;;  %v8807_v32 = vadd.f32 %v3537_v33, %v3449_v24  ;;  %v3365_v24 = vadd.f32 %v8698_v23, %v8553_v53  ;;  %v5474_v23 = vld [vmem:[%s10074_s3 + $0x2b8] sm:$0xf0] }
 0x3e7   : > { %3603 = vmatmul.bf16.gmra.mxu2 %v10436_v44 }
 0x3e9   : > { %v8812_v26 = vpop.f32.mrf.mxu3 }
 0x3ea   : > { %v3288_v50 = vpop.f32.mrf.mxu2  ;;  %v3451_v17 = vpop.f32.mrf.mxu0 }
 0x3eb   : > { %v8815_v13 = vadd.f32 %v3288_v50, %v8460_v57  ;;  %v3540_v3 = vpop.f32.mrf.mxu1  ;;  %3697 = vmatmul.bf16.gmra.mxu3 %v10387_v7  ;;  %v3452_v33 = vadd.f32 %v3451_v17, %v3363_v16  ;;  %v5490_v57 = vld [vmem:[%s10074_s3 + $0x2d8] sm:$0xf0]  ;;  %v5908_v50 = vld [vmem:[%s10074_s3 + $0x354] sm:$0xf] }
 0x3ec   : > { %v5493_v35 = vor.u32 %v5892_v18, %v5490_v57  ;;  %v5557_v43 = vor.u32 %v5908_v50, %v5554_v11  ;;  %v5549_v11 = vor.u32 %v5906_v58, %v5546_v55  ;;  %v10441_v58 = vld [vmem:[#allocation8_spill] sm:$0xff] }
 0x3ed   : > { %10437 = vst [vmem:[#allocation6_spill] sm:$0xff] %v8815_v13  ;;  %v8819_v59 = vadd.f32 %v3540_v3, %v3452_v33  ;;  %3490 = vmatmul.bf16.gmra.mxu0 %v10438_v42  ;;  %v5485_v3 = vor.u32 %v5890_v34, %v5482_v60  ;;  %v10439_v33 = vld [vmem:[#allocation56_spill] sm:$0xff]  ;;  %v5538_v34 = vld [vmem:[%s10074_s3 + $0x338] sm:$0xf0] }
 0x3ee   : > { %3579 = vmatmul.bf16.gmra.mxu1 %v7976_v27  ;;  %3770 = vmatpush.bf16.msra.mxu0 %v5493_v35  ;;  %v5888_v13 = vld [vmem:[%s10074_s3 + $0x2b4] sm:$0xf] }
 0x3ef   : > { %3859 = vmatpush.bf16.msra.mxu1 %v5557_v43  ;;  %v5904_v35 = vld [vmem:[%s10074_s3 + $0x334] sm:$0xf]  ;;  %v5477_v43 = vor.u32 %v5888_v13, %v5474_v23  ;;  %v3368_v13 = vadd.f32 %v8728_v9, %v8553_v53  ;;  %v10444_v9 = vld [vmem:[#allocation45_spill] sm:$0xff] }
 0x3f0   : > { %v5541_v55 = vor.u32 %v5904_v35, %v5538_v34 }
 0x3f1   : > { %v8848_v17 = vpop.f32.mrf.mxu3 }
 0x3f2   : > { %v3290_v16 = vpop.f32.mrf.mxu2  ;;  %v3453_v57 = vpop.f32.mrf.mxu0  ;;  %3771 = vmatpush.bf16.msra.mxu0 %v5485_v3 }
 0x3f3   : > { %v8851_v18 = vadd.f32 %v3290_v16, %v10439_v33  ;;  %v3542_v50 = vpop.f32.mrf.mxu1  ;;  %v3454_v51 = vadd.f32 %v3453_v57, %v3365_v24  ;;  %3860 = vmatpush.bf16.msra.mxu1 %v5549_v11  ;;  %v5886_v24 = vld [vmem:[%s10074_s3 + $0x2a4] sm:$0xf]  ;;  %v5466_v16 = vld [vmem:[%s10074_s3 + $0x2a8] sm:$0xf0] }
 0x3f4   : > { %v5902_v33 = vld [vmem:[%s10074_s3 + $0x324] sm:$0xf]  ;;  %v5469_v35 = vor.u32 %v5886_v24, %v5466_v16  ;;  %v5900_v24 = vld [vmem:[%s10074_s3 + $0x314] sm:$0xf]  ;;  %v5522_v16 = vld [vmem:[%s10074_s3 + $0x318] sm:$0xf0] }
 0x3f5   : > { %10440 = vst [vmem:[#allocation56_spill] sm:$0xff] %v8851_v18  ;;  %v8865_v60 = vadd.f32 %v3542_v50, %v3454_v51  ;;  %v5530_v51 = vld [vmem:[%s10074_s3 + $0x328] sm:$0xf0] }
 0x3f6   : > { %3772 = vmatpush.bf16.msra.mxu0 %v5477_v43  ;;  %v5533_v18 = vor.u32 %v5902_v33, %v5530_v51  ;;  %v5458_v43 = vld [vmem:[%s10074_s3 + $0x298] sm:$0xf0]  ;;  %v5882_v33 = vld [vmem:[%s10074_s3 + $0x284] sm:$0xf]  ;;  %v5450_v51 = vld [vmem:[%s10074_s3 + $0x288] sm:$0xf0] }
 0x3f7   : > { %3608 = vmatmul.bf16.gmra.mxu2 %v10441_v58  ;;  %3861 = vmatpush.bf16.msra.mxu1 %v5541_v55 }
 0x3f9   : > { %v8882_v57 = vpop.f32.mrf.mxu3 }
 0x3fa   : > { %v3293_v3 = vpop.f32.mrf.mxu2  ;;  %v3456_v11 = vpop.f32.mrf.mxu0  ;;  %3773 = vmatpush.bf16.msra.mxu0 %v5469_v35 }
 0x3fb   : > { %v8885_v50 = vadd.f32 %v3293_v3, %v8470_v10  ;;  %v3545_v23 = vpop.f32.mrf.mxu1  ;;  %3702 = vmatmul.bf16.gmra.mxu3 %v10389_v29  ;;  %v3457_v34 = vadd.f32 %v3456_v11, %v3368_v13  ;;  %v5884_v10 = vld [vmem:[%s10074_s3 + $0x294] sm:$0xf]  ;;  %3862 = vmatpush.bf16.msra.mxu1 %v5533_v18  ;;  %v5525_v13 = vor.u32 %v5900_v24, %v5522_v16  ;;  %v5898_v3 = vld [vmem:[%s10074_s3 + $0x304] sm:$0xf]  ;;  %v5514_v18 = vld [vmem:[%s10074_s3 + $0x308] sm:$0xf0] }
 0x3fc   : > { %v5461_v55 = vor.u32 %v5884_v10, %v5458_v43  ;;  %v3370_v11 = vadd.f32 %v8744_v14, %v8553_v53  ;;  %v5453_v24 = vor.u32 %v5882_v33, %v5450_v51  ;;  %v3373_v14 = vadd.f32 %v8756_v49, %v8553_v53 }
 0x3fd   : > { %10442 = vst [vmem:[#allocation8_spill] sm:$0xff] %v8885_v50  ;;  %v8889_v7 = vadd.f32 %v3545_v23, %v3457_v34  ;;  %3495 = vmatmul.bf16.gmra.mxu0 %v10444_v9  ;;  %v5517_v50 = vor.u32 %v5898_v3, %v5514_v18  ;;  %v10448_v3 = vld [vmem:[#allocation12_spill] sm:$0xff]  ;;  %v3375_v49 = vadd.f32 %v8766_v52, %v8553_v53 }
 0x3fe   : > { %3584 = vmatmul.bf16.gmra.mxu1 %v10405_v63  ;;  %3774 = vmatpush.bf16.msra.mxu0 %v5461_v55  ;;  %v10446_v63 = vld [vmem:[#allocation11_spill] sm:$0xff] }
 0x3ff   : > { %10443 = vst [vmem:[#allocation65_spill] sm:$0xff] %v8889_v7  ;;  %3863 = vmatpush.bf16.msra.mxu1 %v5525_v13 }
 0x401   : > { %v8918_v35 = vpop.f32.mrf.mxu3 }
 0x402   : > { %v3295_v23 = vpop.f32.mrf.mxu2  ;;  %v3458_v10 = vpop.f32.mrf.mxu0  ;;  %3775 = vmatpush.bf16.msra.mxu0 %v5453_v24 }
 0x403   : > { %v8921_v34 = vadd.f32 %v3295_v23, %v8474_v39  ;;  %v3547_v43 = vpop.f32.mrf.mxu1  ;;  %v3459_v16 = vadd.f32 %v3458_v10, %v3370_v11  ;;  %3864 = vmatpush.bf16.msra.mxu1 %v5517_v50  ;;  %v10450_v10 = vld [vmem:[#allocation14_spill] sm:$0xff] }
 0x405   : > { %10445 = vst [vmem:[#allocation66_spill] sm:$0xff] %v8921_v34  ;;  %v8923_v29 = vadd.f32 %v3547_v43, %v3459_v16  ;;  %v3378_v43 = vadd.f32 %v8796_v22, %v8553_v53  ;;  %v3380_v22 = vadd.f32 %v8812_v26, %v8553_v53 }
 0x407   : > { %3613 = vmatmul.bf16.gmra.mxu2 %v10446_v63 }
 0x409   : > { %v8928_v7 = vpop.f32.mrf.mxu3 }
 0x40a   : > { %v3298_v27 = vpop.f32.mrf.mxu2  ;;  %v3461_v55 = vpop.f32.mrf.mxu0 }
 0x40b   : > { %v8931_v39 = vadd.f32 %v3298_v27, %v8480_v62  ;;  %v3550_v33 = vpop.f32.mrf.mxu1  ;;  %3707 = vmatmul.bf16.gmra.mxu3 %v10391_v2  ;;  %v3462_v51 = vadd.f32 %v3461_v55, %v3373_v14 }
 0x40d   : > { %10447 = vst [vmem:[#allocation11_spill] sm:$0xff] %v8931_v39  ;;  %v8935_v13 = vadd.f32 %v3550_v33, %v3462_v51  ;;  %3776 = vmatmul.bf16.vlgmr.msra.gmra.mxu0 %v10448_v3  ;;  %v10452_v51 = vld [vmem:[#allocation16_spill] sm:$0xff] }
 0x40e   : > { %3865 = vmatmul.bf16.vlgmr.msra.gmra.mxu1 %v10436_v44 }
 0x411   : > { %v8940_v18 = vpop.f32.mrf.mxu3 }
 0x412   : > { %v3300_v50 = vpop.f32.mrf.mxu2  ;;  %v3463_v62 = vpop.f32.mrf.mxu0 }
 0x413   : > { %v8943_v27 = vadd.f32 %v3300_v50, %v8484_v38  ;;  %v3552_v11 = vpop.f32.mrf.mxu1  ;;  %v3464_v23 = vadd.f32 %v3463_v62, %v3375_v49 }
 0x415   : > { %10449 = vst [vmem:[#allocation12_spill] sm:$0xff] %v8943_v27  ;;  %v8945_v44 = vadd.f32 %v3552_v11, %v3464_v23  ;;  %v10454_v23 = vld [vmem:[#allocation17_spill] sm:$0xff] }
 0x417   : > { %3618 = vmatmul.bf16.gmra.mxu2 %v10450_v10 }
 0x419   : > { %v8950_v16 = vpop.f32.mrf.mxu3 }
 0x41a   : > { %v3303_v24 = vpop.f32.mrf.mxu2  ;;  %v3466_v14 = vpop.f32.mrf.mxu0 }
 0x41b   : > { %v8953_v52 = vadd.f32 %v3303_v24, %v8490_v45  ;;  %v3555_v55 = vpop.f32.mrf.mxu1  ;;  %3712 = vmatmul.bf16.gmra.mxu3 %v10394_v1  ;;  %v3467_v38 = vadd.f32 %v3466_v14, %v3378_v43  ;;  %v3383_v43 = vadd.f32 %v8848_v17, %v8553_v53  ;;  %v3385_v17 = vadd.f32 %v8882_v57, %v8553_v53 }
 0x41d   : > { %10451 = vst [vmem:[#allocation14_spill] sm:$0xff] %v8953_v52  ;;  %v8957_v33 = vadd.f32 %v3555_v55, %v3467_v38  ;;  %3781 = vmatmul.bf16.gmra.mxu0 %v10452_v51 }
 0x41e   : > { %3870 = vmatmul.bf16.gmra.mxu1 %v10441_v58 }
 0x421   : > { %v8962_v49 = vpop.f32.mrf.mxu3 }
 0x422   : > { %v3305_v3 = vpop.f32.mrf.mxu2  ;;  %v3468_v50 = vpop.f32.mrf.mxu0 }
 0x423   : > { %v8965_v45 = vadd.f32 %v3305_v3, %v8496_v54  ;;  %v3557_v62 = vpop.f32.mrf.mxu1  ;;  %v3469_v11 = vadd.f32 %v3468_v50, %v3380_v22  ;;  %v10456_v3 = vld [vmem:[#allocation19_spill] sm:$0xff] }
 0x425   : > { %10453 = vst [vmem:[#allocation16_spill] sm:$0xff] %v8965_v45  ;;  %v8967_v58 = vadd.f32 %v3557_v62, %v3469_v11  ;;  %v10458_v45 = vld [vmem:[#allocation20_spill] sm:$0xff] }
 0x427   : > { %3623 = vmatmul.bf16.gmra.mxu2 %v10454_v23 }
 0x429   : > { %v8972_v14 = vpop.f32.mrf.mxu3 }
 0x42a   : > { %v3308_v24 = vpop.f32.mrf.mxu2  ;;  %v3471_v55 = vpop.f32.mrf.mxu0 }
 0x42b   : > { %v8975_v26 = vadd.f32 %v3308_v24, %v8506_v20  ;;  %v3560_v38 = vpop.f32.mrf.mxu1  ;;  %3717 = vmatmul.bf16.gmra.mxu3 %v10397_v4  ;;  %v3472_v54 = vadd.f32 %v3471_v55, %v3383_v43  ;;  %v3388_v43 = vadd.f32 %v8918_v35, %v8553_v53  ;;  %v3390_v35 = vadd.f32 %v8928_v7, %v8553_v53 }
 0x42d   : > { %10455 = vst [vmem:[#allocation17_spill] sm:$0xff] %v8975_v26  ;;  %v8979_v22 = vadd.f32 %v3560_v38, %v3472_v54  ;;  %3786 = vmatmul.bf16.gmra.mxu0 %v10456_v3 }
 0x42e   : > { %3875 = vmatmul.bf16.gmra.mxu1 %v10446_v63 }
 0x431   : > { %v8984_v62 = vpop.f32.mrf.mxu3 }
 0x432   : > { %v3310_v50 = vpop.f32.mrf.mxu2  ;;  %v3473_v11 = vpop.f32.mrf.mxu0 }
 0x433   : > { %v8987_v20 = vadd.f32 %v3310_v50, %v8514_v12  ;;  %v3562_v24 = vpop.f32.mrf.mxu1  ;;  %v3474_v26 = vadd.f32 %v3473_v11, %v3385_v17 }
 0x435   : > { %10457 = vst [vmem:[#allocation19_spill] sm:$0xff] %v8987_v20  ;;  %v8989_v63 = vadd.f32 %v3562_v24, %v3474_v26 }
 0x437   : > { %3628 = vmatmul.bf16.gmra.mxu2 %v10458_v45 }
 0x439   : > { %v8994_v38 = vpop.f32.mrf.mxu3 }
 0x43a   : > { %v3313_v55 = vpop.f32.mrf.mxu2  ;;  %v3476_v54 = vpop.f32.mrf.mxu0 }
 0x43b   : > { %v8997_v57 = vadd.f32 %v3313_v55, %v8524_v56  ;;  %v3565_v52 = vpop.f32.mrf.mxu1  ;;  %3722 = vmatmul.bf16.gmra.mxu3 %v10400_v0  ;;  %v3477_v12 = vadd.f32 %v3476_v54, %v3388_v43 }
 0x43d   : > { %10459 = vst [vmem:[#allocation20_spill] sm:$0xff] %v8997_v57  ;;  %v9001_v26 = vadd.f32 %v3565_v52, %v3477_v12  ;;  %3791 = vmatmul.bf16.gmra.mxu0 %v10365_v46  ;;  %v10461_v57 = vld [vmem:[#allocation23_spill] sm:$0xff]  ;;  %v3393_v52 = vadd.f32 %v8940_v18, %v8553_v53  ;;  %v3395_v18 = vadd.f32 %v8950_v16, %v8553_v53 }
 0x43e   : > { %3880 = vmatmul.bf16.gmra.mxu1 %v10450_v10 }
 0x441   : > { %v9006_v50 = vpop.f32.mrf.mxu3 }
 0x442   : > { %v3315_v17 = vpop.f32.mrf.mxu2  ;;  %v3478_v11 = vpop.f32.mrf.mxu0 }
 0x443   : > { %v9009_v56 = vadd.f32 %v3315_v17, %v8532_v28  ;;  %v3567_v24 = vpop.f32.mrf.mxu1  ;;  %v3479_v55 = vadd.f32 %v3478_v11, %v3390_v35 }
 0x445   : > { %10460 = vst [vmem:[#allocation67_spill] sm:$0xff] %v9009_v56  ;;  %v9011_v10 = vadd.f32 %v3567_v24, %v3479_v55 }
 0x447   : > { %3633 = vmatmul.bf16.gmra.mxu2 %v10461_v57 }
 0x449   : > { %v9016_v54 = vpop.f32.mrf.mxu3 }
 0x44a   : > { %v3318_v43 = vpop.f32.mrf.mxu2  ;;  %v3481_v12 = vpop.f32.mrf.mxu0 }
 0x44b   : > { %v9019_v7 = vadd.f32 %v3318_v43, %v8542_v21  ;;  %v3570_v20 = vpop.f32.mrf.mxu1  ;;  %3727 = vmatmul.bf16.gmra.mxu3 %v7226_v25  ;;  %v3482_v28 = vadd.f32 %v3481_v12, %v3393_v52 }
 0x44d   : > { %10462 = vst [vmem:[#allocation23_spill] sm:$0xff] %v9019_v7  ;;  %v9023_v35 = vadd.f32 %v3570_v20, %v3482_v28  ;;  %3796 = vmatmul.bf16.gmra.mxu0 %v10372_v31 }
 0x44e   : > { %3885 = vmatmul.bf16.gmra.mxu1 %v10454_v23  ;;  %v3398_v23 = vadd.f32 %v8962_v49, %v8553_v53 }
 0x451   : > { %v3688_v11 = vpop.f32.mrf.mxu3 }
 0x452   : > { %v3320_v17 = vpop.f32.mrf.mxu2  ;;  %v3483_v21 = vpop.f32.mrf.mxu0 }
 0x453   : > { %v9029_v24 = vadd.f32 %v3320_v17, %v8555_v37  ;;  %v3572_v55 = vpop.f32.mrf.mxu1  ;;  %v3484_v43 = vadd.f32 %v3483_v21, %v3395_v18  ;;  %v3400_v18 = vadd.f32 %v8972_v14, %v8553_v53 }
 0x455   : > { %10463 = vst [vmem:[#allocation68_spill] sm:$0xff] %v9029_v24  ;;  %v9031_v7 = vadd.f32 %v3572_v55, %v3484_v43 }
 0x457   : > { %3638 = vmatmul.bf16.gmra.mxu2 %v10346_v6 }
 0x459   : > { %v3690_v52 = vpop.f32.mrf.mxu3 }
 0x45a   : > { %v3599_v20 = vpop.f32.mrf.mxu2  ;;  %v3486_v16 = vpop.f32.mrf.mxu0 }
 0x45b   : > { %v3600_v12 = vadd.f32 %v3599_v20, %v8567_v8  ;;  %v3575_v28 = vpop.f32.mrf.mxu1  ;;  %3732 = vmatmul.bf16.gmra.mxu3 %v10410_v36  ;;  %v3487_v37 = vadd.f32 %v3486_v16, %v3398_v23 }
 0x45d   : > { %v9039_v17 = vadd.f32 %v3575_v28, %v3487_v37  ;;  %3801 = vmatmul.bf16.gmra.mxu0 %v10376_v40 }
 0x45e   : > { %3890 = vmatmul.bf16.gmra.mxu1 %v10458_v45  ;;  %v3403_v45 = vadd.f32 %v8984_v62, %v8553_v53 }
 0x461   : > { %v3693_v49 = vpop.f32.mrf.mxu3 }
 0x462   : > { %v3601_v21 = vpop.f32.mrf.mxu2  ;;  %v3488_v43 = vpop.f32.mrf.mxu0 }
 0x463   : > { %v3602_v55 = vadd.f32 %v3601_v21, %v8577_v19  ;;  %v3577_v8 = vpop.f32.mrf.mxu1  ;;  %v3489_v20 = vadd.f32 %v3488_v43, %v3400_v18  ;;  %v3689_v21 = vadd.f32 %v3688_v11, %v3600_v12  ;;  %v3405_v43 = vadd.f32 %v8994_v38, %v8553_v53 }
 0x464   : > { %v3408_v11 = vadd.f32 %v9006_v50, %v8553_v53 }
 0x465   : > { %v9045_v24 = vadd.f32 %v3577_v8, %v3489_v20  ;;  %v10464_v20 = vld [vmem:[#allocation21_spill] sm:$0xff] }
 0x467   : > { %3643 = vmatmul.bf16.gmra.mxu2 %v10347_v61 }
 0x469   : > { %v3695_v16 = vpop.f32.mrf.mxu3 }
 0x46a   : > { %v3604_v23 = vpop.f32.mrf.mxu2  ;;  %v3491_v37 = vpop.f32.mrf.mxu0 }
 0x46b   : > { %v3605_v28 = vadd.f32 %v3604_v23, %v8589_v41  ;;  %v3580_v14 = vpop.f32.mrf.mxu1  ;;  %3737 = vmatmul.bf16.gmra.mxu3 %v10418_v15  ;;  %v3492_v19 = vadd.f32 %v3491_v37, %v3403_v45  ;;  %v3691_v45 = vadd.f32 %v3690_v52, %v3602_v55  ;;  %v3410_v52 = vadd.f32 %v9016_v54, %v8553_v53 }
 0x46d   : > { %v9053_v18 = vadd.f32 %v3580_v14, %v3492_v19  ;;  %3806 = vmatmul.bf16.gmra.mxu0 %v10383_v5  ;;  %v10466_v14 = vld [vmem:[#allocation60_spill] sm:$0xff] }
 0x46e   : > { %3895 = vmatmul.bf16.gmra.mxu1 %v10461_v57  ;;  %v10465_v57 = vld [vmem:[#allocation33_spill] sm:$0xff] }
 0x471   : > { %v3698_v8 = vpop.f32.mrf.mxu3 }
 0x472   : > { %v3606_v62 = vpop.f32.mrf.mxu2  ;;  %v3493_v41 = vpop.f32.mrf.mxu0 }
 0x473   : > { %v3607_v56 = vadd.f32 %v3606_v62, %v10464_v20  ;;  %v3582_v23 = vpop.f32.mrf.mxu1  ;;  %v3494_v27 = vadd.f32 %v3493_v41, %v3405_v43  ;;  %v3694_v43 = vadd.f32 %v3693_v49, %v3605_v28  ;;  %v10467_v20 = vld [vmem:[#allocation35_spill] sm:$0xff]  ;;  %v10468_v41 = vld [vmem:[#allocation61_spill] sm:$0xff] }
 0x475   : > { %v9059_v39 = vadd.f32 %v3582_v23, %v3494_v27 }
 0x477   : > { %3648 = vmatmul.bf16.gmra.mxu2 %v10465_v57 }
 0x479   : > { %v3700_v37 = vpop.f32.mrf.mxu3 }
 0x47a   : > { %v3609_v12 = vpop.f32.mrf.mxu2  ;;  %v3496_v38 = vpop.f32.mrf.mxu0 }
 0x47b   : > { %v3610_v19 = vadd.f32 %v3609_v12, %v10466_v14  ;;  %v3585_v34 = vpop.f32.mrf.mxu1  ;;  %3742 = vmatmul.bf16.gmra.mxu3 %v10425_v48  ;;  %v3497_v62 = vadd.f32 %v3496_v38, %v3408_v11  ;;  %v9076_v11 = vadd.f32 %v3695_v16, %v3607_v56  ;;  %v5944_v56 = vld [vmem:[%s10074_s3 + $0x474] sm:$0xf] }
 0x47d   : > { %v9067_v27 = vadd.f32 %v3585_v34, %v3497_v62  ;;  %3811 = vmatmul.bf16.gmra.mxu0 %v10467_v20  ;;  %v9083_v62 = vadd.f32 %v3698_v8, %v3610_v19 }
 0x47e   : > { %3900 = vmatmul.bf16.gmra.mxu1 %v10346_v6  ;;  %v10469_v6 = vld [vmem:[#allocation37_spill] sm:$0xff] }
 0x481   : > { %v3703_v55 = vpop.f32.mrf.mxu3 }
 0x482   : > { %v3611_v50 = vpop.f32.mrf.mxu2  ;;  %v3498_v12 = vpop.f32.mrf.mxu0 }
 0x483   : > { %v3612_v23 = vadd.f32 %v3611_v50, %v10468_v41  ;;  %v3587_v14 = vpop.f32.mrf.mxu1  ;;  %v3499_v15 = vadd.f32 %v3498_v12, %v3410_v52  ;;  %v10471_v52 = vld [vmem:[#allocation40_spill] sm:$0xff]  ;;  %v5942_v12 = vld [vmem:[%s10074_s3 + $0x464] sm:$0xf] }
 0x485   : > { %v9073_v36 = vadd.f32 %v3587_v14, %v3499_v15  ;;  %v5690_v14 = vld [vmem:[%s10074_s3 + $0x468] sm:$0xf0] }
 0x487   : > { %3653 = vmatmul.bf16.gmra.mxu2 %v10469_v6 }
 0x489   : > { %v9078_v49 = vpop.f32.mrf.mxu3 }
 0x48a   : > { %v3614_v34 = vpop.f32.mrf.mxu2  ;;  %v3777_v38 = vpop.f32.mrf.mxu0 }
 0x48b   : > { %v3615_v28 = vadd.f32 %v3614_v34, %v8705_v30  ;;  %v3866_v53 = vpop.f32.mrf.mxu1  ;;  %3747 = vmatmul.bf16.gmra.mxu3 %v10433_v47  ;;  %v3778_v54 = vadd.f32 %v3777_v38, %v3689_v21  ;;  %v5698_v30 = vld [vmem:[%s10074_s3 + $0x478] sm:$0xf0]  ;;  %v10472_v21 = vld [vmem:[#allocation62_spill] sm:$0xff]  ;;  %v5693_v38 = vor.u32 %v5942_v12, %v5690_v14  ;;  %v10475_v14 = vld [vmem:[#allocation63_spill] sm:$0xff] }
 0x48c   : > { %v5701_v16 = vor.u32 %v5944_v56, %v5698_v30  ;;  %v5928_v56 = vld [vmem:[%s10074_s3 + $0x3f4] sm:$0xf]  ;;  %v5634_v30 = vld [vmem:[%s10074_s3 + $0x3f8] sm:$0xf0] }
 0x48d   : > { %v9085_v15 = vadd.f32 %v3866_v53, %v3778_v54  ;;  %3816 = vmatmul.bf16.gmra.mxu0 %v10471_v52  ;;  %v10474_v54 = vld [vmem:[#allocation41_spill] sm:$0xff] }
 0x48e   : > { %3905 = vmatmul.bf16.gmra.mxu1 %v10347_v61  ;;  %4035 = vmatpush.bf16.msrb.mxu3 %v5701_v16  ;;  %v9114_v16 = vadd.f32 %v3700_v37, %v3612_v23  ;;  %v5926_v23 = vld [vmem:[%s10074_s3 + $0x3e4] sm:$0xf] }
 0x48f   : > { %10470 = vst [vmem:[#allocation21_spill] sm:$0xff] %v9085_v15  ;;  %v5914_v15 = vld [vmem:[%s10074_s3 + $0x384] sm:$0xf] }
 0x491   : > { %v9094_v50 = vpop.f32.mrf.mxu3 }
 0x492   : > { %v3616_v61 = vpop.f32.mrf.mxu2  ;;  %v3779_v19 = vpop.f32.mrf.mxu0  ;;  %4036 = vmatpush.bf16.msrb.mxu3 %v5693_v38 }
 0x493   : > { %v9097_v8 = vadd.f32 %v3616_v61, %v10472_v21  ;;  %v3868_v41 = vpop.f32.mrf.mxu1  ;;  %v3780_v34 = vadd.f32 %v3779_v19, %v3691_v45  ;;  %v5940_v45 = vld [vmem:[%s10074_s3 + $0x454] sm:$0xf]  ;;  %v5637_v61 = vor.u32 %v5928_v56, %v5634_v30  ;;  %v5682_v21 = vld [vmem:[%s10074_s3 + $0x458] sm:$0xf0]  ;;  %v5626_v56 = vld [vmem:[%s10074_s3 + $0x3e8] sm:$0xf0] }
 0x494   : > { %v5685_v19 = vor.u32 %v5940_v45, %v5682_v21  ;;  %v5938_v30 = vld [vmem:[%s10074_s3 + $0x444] sm:$0xf]  ;;  %v5924_v21 = vld [vmem:[%s10074_s3 + $0x3d4] sm:$0xf] }
 0x495   : > { %v9105_v53 = vadd.f32 %v3868_v41, %v3780_v34  ;;  %3946 = vmatpush.bf16.msrb.mxu2 %v5637_v61  ;;  %v5629_v61 = vor.u32 %v5926_v23, %v5626_v56  ;;  %v5666_v23 = vld [vmem:[%s10074_s3 + $0x438] sm:$0xf0] }
 0x496   : > { %4037 = vmatpush.bf16.msrb.mxu3 %v5685_v19  ;;  %v5618_v19 = vld [vmem:[%s10074_s3 + $0x3d8] sm:$0xf0] }
 0x497   : > { %10473 = vst [vmem:[#allocation33_spill] sm:$0xff] %v9105_v53  ;;  %3658 = vmatmul.bf16.gmra.mxu2 %v10474_v54 }
 0x499   : > { %v9122_v12 = vpop.f32.mrf.mxu3  ;;  %3947 = vmatpush.bf16.msrb.mxu2 %v5629_v61  ;;  %v5922_v61 = vld [vmem:[%s10074_s3 + $0x3c4] sm:$0xf] }
 0x49a   : > { %v3619_v41 = vpop.f32.mrf.mxu2  ;;  %v3782_v38 = vpop.f32.mrf.mxu0 }
 0x49b   : > { %v9125_v34 = vadd.f32 %v3619_v41, %v10475_v14  ;;  %v3871_v37 = vpop.f32.mrf.mxu1  ;;  %3752 = vmatmul.bf16.gmra.mxu3 %v10438_v42  ;;  %v3783_v45 = vadd.f32 %v3782_v38, %v3694_v43  ;;  %v9147_v41 = vadd.f32 %v3703_v55, %v3615_v28  ;;  %v10477_v42 = vld [vmem:[#allocation43_spill] sm:$0xff]  ;;  %v5621_v43 = vor.u32 %v5924_v21, %v5618_v19  ;;  %v5936_v38 = vld [vmem:[%s10074_s3 + $0x434] sm:$0xf]  ;;  %v5934_v21 = vld [vmem:[%s10074_s3 + $0x424] sm:$0xf] }
 0x49c   : > { %v5669_v56 = vor.u32 %v5936_v38, %v5666_v23  ;;  %v10478_v28 = vld [vmem:[#allocation64_spill] sm:$0xff] }
 0x49d   : > { %v9149_v47 = vadd.f32 %v3871_v37, %v3783_v45  ;;  %3821 = vmatmul.bf16.gmra.mxu0 %v10477_v42  ;;  %3948 = vmatpush.bf16.msrb.mxu2 %v5621_v43  ;;  %v10480_v23 = vld [vmem:[#allocation44_spill] sm:$0xff] }
 0x49e   : > { %3910 = vmatmul.bf16.gmra.mxu1 %v10465_v57  ;;  %v5674_v57 = vld [vmem:[%s10074_s3 + $0x448] sm:$0xf0] }
 0x49f   : > { %v5677_v14 = vor.u32 %v5938_v30, %v5674_v57  ;;  %10476 = vst [vmem:[#allocation60_spill] sm:$0xff] %v9149_v47  ;;  %v5610_v57 = vld [vmem:[%s10074_s3 + $0x3c8] sm:$0xf0] }
 0x4a1   : > { %4038 = vmatpush.bf16.msrb.mxu3 %v5677_v14  ;;  %v9158_v55 = vpop.f32.mrf.mxu3  ;;  %v5613_v14 = vor.u32 %v5922_v61, %v5610_v57  ;;  %v5650_v61 = vld [vmem:[%s10074_s3 + $0x418] sm:$0xf0] }
 0x4a2   : > { %v3621_v48 = vpop.f32.mrf.mxu2  ;;  %v3784_v30 = vpop.f32.mrf.mxu0 }
 0x4a3   : > { %v3622_v37 = vadd.f32 %v3621_v48, %v10478_v28  ;;  %v3873_v45 = vpop.f32.mrf.mxu1  ;;  %v3785_v19 = vadd.f32 %v3784_v30, %v9076_v11  ;;  %v5658_v48 = vld [vmem:[%s10074_s3 + $0x428] sm:$0xf0]  ;;  %3949 = vmatpush.bf16.msrb.mxu2 %v5613_v14  ;;  %v5602_v11 = vld [vmem:[%s10074_s3 + $0x3b8] sm:$0xf0]  ;;  %v3706_v28 = vadd.f32 %v9078_v49, %v9097_v8  ;;  %v5932_v30 = vld [vmem:[%s10074_s3 + $0x414] sm:$0xf] }
 0x4a4   : > { %v5661_v43 = vor.u32 %v5934_v21, %v5658_v48  ;;  %v5653_v57 = vor.u32 %v5932_v30, %v5650_v61  ;;  %v10481_v14 = vld [vmem:[#allocation55_spill] sm:$0xff]  ;;  %v5918_v49 = vld [vmem:[%s10074_s3 + $0x3a4] sm:$0xf]  ;;  %v5586_v61 = vld [vmem:[%s10074_s3 + $0x398] sm:$0xf0] }
 0x4a5   : > { %4039 = vmatpush.bf16.msrb.mxu3 %v5669_v56  ;;  %v9174_v38 = vadd.f32 %v3873_v45, %v3785_v19  ;;  %v5920_v56 = vld [vmem:[%s10074_s3 + $0x3b4] sm:$0xf]  ;;  %v5594_v8 = vld [vmem:[%s10074_s3 + $0x3a8] sm:$0xf0] }
 0x4a6   : > { %v5605_v45 = vor.u32 %v5920_v56, %v5602_v11  ;;  %v5930_v56 = vld [vmem:[%s10074_s3 + $0x404] sm:$0xf]  ;;  %v5597_v30 = vor.u32 %v5918_v49, %v5594_v8 }
 0x4a7   : > { %10479 = vst [vmem:[#allocation35_spill] sm:$0xff] %v9174_v38  ;;  %3663 = vmatmul.bf16.gmra.mxu2 %v10480_v23 }
 0x4a8   : > { %3950 = vmatpush.bf16.msrb.mxu2 %v5605_v45  ;;  %v5916_v45 = vld [vmem:[%s10074_s3 + $0x394] sm:$0xf] }
 0x4a9   : > { %4040 = vmatpush.bf16.msrb.mxu3 %v5661_v43  ;;  %v3715_v19 = vpop.f32.mrf.mxu3 }
 0x4aa   : > { %v3624_v21 = vpop.f32.mrf.mxu2  ;;  %v3787_v43 = vpop.f32.mrf.mxu0 }
 0x4ab   : > { %v3625_v48 = vadd.f32 %v3624_v21, %v10481_v14  ;;  %v3876_v38 = vpop.f32.mrf.mxu1  ;;  %3757 = vmatmul.bf16.gmra.mxu3 %v10444_v9  ;;  %v3788_v11 = vadd.f32 %v3787_v43, %v9083_v62  ;;  %v10482_v62 = vld [vmem:[#allocation46_spill] sm:$0xff]  ;;  %v5589_v43 = vor.u32 %v5916_v45, %v5586_v61 }
 0x4ac   : > { %3951 = vmatpush.bf16.msrb.mxu2 %v5597_v30 }
 0x4ad   : > { %4041 = vmatpush.bf16.msrb.mxu3 %v5653_v57  ;;  %v3709_v57 = vadd.f32 %v9094_v50, %v9125_v34  ;;  %v9215_v14 = vadd.f32 %v3876_v38, %v3788_v11  ;;  %3826 = vmatmul.bf16.gmra.mxu0 %v10482_v62  ;;  %v5578_v50 = vld [vmem:[%s10074_s3 + $0x388] sm:$0xf0] }
 0x4ae   : > { %3915 = vmatmul.bf16.gmra.mxu1 %v10469_v6  ;;  %v5642_v6 = vld [vmem:[%s10074_s3 + $0x408] sm:$0xf0]  ;;  %v5581_v38 = vor.u32 %v5914_v15, %v5578_v50  ;;  %v9237_v15 = vadd.f32 %v9158_v55, %v3625_v48  ;;  %v10487_v48 = vld [vmem:[#allocation65_spill] sm:$0xff] }
 0x4af   : > { %v5645_v21 = vor.u32 %v5930_v56, %v5642_v6  ;;  %v10483_v11 = vld [vmem:[#allocation47_spill] sm:$0xff] }
 0x4b0   : > { %3952 = vmatpush.bf16.msrb.mxu2 %v5589_v43  ;;  %v10484_v43 = vld [vmem:[#allocation27_spill] sm:$0xff] }
 0x4b1   : > { %4042 = vmatpush.bf16.msrb.mxu3 %v5645_v21  ;;  %v3718_v8 = vpop.f32.mrf.mxu3 }
 0x4b2   : > { %v3626_v49 = vpop.f32.mrf.mxu2  ;;  %v3789_v47 = vpop.f32.mrf.mxu0 }
 0x4b3   : > { %v3627_v9 = vadd.f32 %v3626_v49, %v8807_v32  ;;  %v3878_v53 = vpop.f32.mrf.mxu1  ;;  %v3790_v34 = vadd.f32 %v3789_v47, %v9114_v16  ;;  %v9230_v32 = vadd.f32 %v9122_v12, %v3622_v37  ;;  %v10485_v16 = vld [vmem:[#allocation48_spill] sm:$0xff] }
 0x4b4   : > { %3953 = vmatpush.bf16.msrb.mxu2 %v5581_v38 }
 0x4b5   : > { %v9226_v56 = vadd.f32 %v3878_v53, %v3790_v34 }
 0x4b7   : > { %3668 = vmatmul.bf16.gmra.mxu2 %v10483_v11 }
 0x4b9   : > { %v3720_v6 = vpop.f32.mrf.mxu3 }
 0x4ba   : > { %v3629_v30 = vpop.f32.mrf.mxu2  ;;  %v3792_v61 = vpop.f32.mrf.mxu0 }
 0x4bb   : > { %v3630_v45 = vadd.f32 %v3629_v30, %v8819_v59  ;;  %v3881_v21 = vpop.f32.mrf.mxu1  ;;  %3762 = vmatmul.bf16.gmra.mxu3 %v10484_v43  ;;  %v3793_v47 = vadd.f32 %v3792_v61, %v9147_v41  ;;  %v9246_v30 = vadd.f32 %v3715_v19, %v3627_v9 }
 0x4bd   : > { %v9239_v53 = vadd.f32 %v3881_v21, %v3793_v47  ;;  %3831 = vmatmul.bf16.gmra.mxu0 %v10485_v16 }
 0x4be   : > { %3920 = vmatmul.bf16.gmra.mxu1 %v10474_v54  ;;  %v10486_v54 = vld [vmem:[#allocation51_spill] sm:$0xff] }
 0x4c1   : > { %v3723_v37 = vpop.f32.mrf.mxu3 }
 0x4c2   : > { %v3631_v12 = vpop.f32.mrf.mxu2  ;;  %v3794_v59 = vpop.f32.mrf.mxu0 }
 0x4c3   : > { %v3632_v49 = vadd.f32 %v3631_v12, %v8865_v60  ;;  %v3883_v50 = vpop.f32.mrf.mxu1  ;;  %v3795_v34 = vadd.f32 %v3794_v59, %v3706_v28  ;;  %v9251_v12 = vadd.f32 %v3718_v8, %v3630_v45  ;;  %v10489_v59 = vld [vmem:[#allocation49_spill] sm:$0xff] }
 0x4c5   : > { %v9243_v38 = vadd.f32 %v3883_v50, %v3795_v34  ;;  %10488 = vst [vmem:[#allocation61_spill] sm:$0xff] %v9251_v12 }
 0x4c7   : > { %3673 = vmatmul.bf16.gmra.mxu2 %v10486_v54 }
 0x4c9   : > { %v3725_v55 = vpop.f32.mrf.mxu3 }
 0x4ca   : > { %v3634_v41 = vpop.f32.mrf.mxu2  ;;  %v3797_v21 = vpop.f32.mrf.mxu0 }
 0x4cb   : > { %v3635_v61 = vadd.f32 %v3634_v41, %v10487_v48  ;;  %v3886_v47 = vpop.f32.mrf.mxu1  ;;  %4043 = vmatmul.bf16.vlgmr.msrb.gmra.mxu3 %v10452_v51  ;;  %v3798_v60 = vadd.f32 %v3797_v21, %v3709_v57  ;;  %v10490_v48 = vld [vmem:[#allocation5_spill] sm:$0xff] }
 0x4cd   : > { %v9253_v28 = vadd.f32 %v3886_v47, %v3798_v60  ;;  %3836 = vmatmul.bf16.gmra.mxu0 %v10489_v59  ;;  %v10493_v47 = vld [vmem:[#allocation50_spill] sm:$0xff] }
 0x4ce   : > { %3925 = vmatmul.bf16.gmra.mxu1 %v10480_v23  ;;  %v9262_v23 = vadd.f32 %v3720_v6, %v3632_v49 }
 0x4d0   : > { %10491 = vst [vmem:[#allocation37_spill] sm:$0xff] %v9262_v23 }
 0x4d1   : > { %v3728_v9 = vpop.f32.mrf.mxu3 }
 0x4d2   : > { %v3636_v50 = vpop.f32.mrf.mxu2  ;;  %v9257_v34 = vpop.f32.mrf.mxu0 }
 0x4d3   : > { %v3637_v19 = vadd.f32 %v3636_v50, %v8923_v29  ;;  %v9259_v41 = vpop.f32.mrf.mxu1  ;;  %v9271_v29 = vadd.f32 %v3723_v37, %v3635_v61 }
 0x4d5   : > { %10492 = vst [vmem:[#allocation40_spill] sm:$0xff] %v9271_v29 }
 0x4d7   : > { %3954 = vmatmul.bf16.vlgmr.msrb.gmra.mxu2 %v10490_v48 }
 0x4d9   : > { %v3730_v57 = vpop.f32.mrf.mxu3 }
 0x4da   : > { %v3639_v51 = vpop.f32.mrf.mxu2  ;;  %v9265_v45 = vpop.f32.mrf.mxu0 }
 0x4db   : > { %v3640_v8 = vadd.f32 %v3639_v51, %v8935_v13  ;;  %v9267_v21 = vpop.f32.mrf.mxu1  ;;  %4048 = vmatmul.bf16.gmra.mxu3 %v10456_v3  ;;  %v10494_v13 = vld [vmem:[#allocation7_spill] sm:$0xff]  ;;  %v9280_v51 = vadd.f32 %v3725_v55, %v3637_v19 }
 0x4dd   : > { %3841 = vmatmul.bf16.gmra.mxu0 %v10493_v47  ;;  %10495 = vst [vmem:[#allocation62_spill] sm:$0xff] %v9280_v51 }
 0x4de   : > { %3930 = vmatmul.bf16.gmra.mxu1 %v10483_v11 }
 0x4e1   : > { %v3733_v50 = vpop.f32.mrf.mxu3 }
 0x4e2   : > { %v3641_v60 = vpop.f32.mrf.mxu2  ;;  %v9275_v49 = vpop.f32.mrf.mxu0 }
 0x4e3   : > { %v3642_v6 = vadd.f32 %v3641_v60, %v8945_v44  ;;  %v9277_v48 = vpop.f32.mrf.mxu1  ;;  %v3729_v44 = vadd.f32 %v3728_v9, %v3640_v8  ;;  %v10498_v60 = vld [vmem:[#allocation52_spill] sm:$0xff]  ;;  %v10504_v9 = vld [vmem:[#allocation2_spill] sm:$0xff] }
 0x4e4   : > { %v10505_v8 = vld [vmem:[#allocation36_spill] sm:$0xff] }
 0x4e7   : > { %3959 = vmatmul.bf16.gmra.mxu2 %v10494_v13 }
 0x4e9   : > { %v3735_v11 = vpop.f32.mrf.mxu3 }
 0x4ea   : > { %v3644_v23 = vpop.f32.mrf.mxu2  ;;  %v9283_v37 = vpop.f32.mrf.mxu0 }
 0x4eb   : > { %v3645_v3 = vadd.f32 %v3644_v23, %v8957_v33  ;;  %10496 = vst [vmem:[#allocation41_spill] sm:$0xff] %v9283_v37  ;;  %v9285_v61 = vpop.f32.mrf.mxu1  ;;  %4053 = vmatmul.bf16.gmra.mxu3 %v10365_v46  ;;  %v10501_v33 = vld [vmem:[#allocation9_spill] sm:$0xff]  ;;  %v3731_v23 = vadd.f32 %v3730_v57, %v3642_v6 }
 0x4ec   : > { %10497 = vst [vmem:[#allocation63_spill] sm:$0xff] %v9285_v61 }
 0x4ed   : > { %3846 = vmatmul.bf16.gmra.mxu0 %v10498_v60 }
 0x4ee   : > { %3935 = vmatmul.bf16.gmra.mxu1 %v10486_v54 }
 0x4f1   : > { %v3738_v43 = vpop.f32.mrf.mxu3 }
 0x4f2   : > { %v3646_v29 = vpop.f32.mrf.mxu2  ;;  %v9291_v19 = vpop.f32.mrf.mxu0 }
 0x4f3   : > { %v3647_v55 = vadd.f32 %v3646_v29, %v8967_v58  ;;  %10499 = vst [vmem:[#allocation43_spill] sm:$0xff] %v9291_v19  ;;  %v9293_v13 = vpop.f32.mrf.mxu1  ;;  %v3734_v58 = vadd.f32 %v3733_v50, %v3645_v3 }
 0x4f4   : > { %10500 = vst [vmem:[#allocation64_spill] sm:$0xff] %v9293_v13 }
 0x4f7   : > { %3964 = vmatmul.bf16.gmra.mxu2 %v10501_v33 }
 0x4f9   : > { %v3740_v61 = vpop.f32.mrf.mxu3 }
 0x4fa   : > { %v3649_v51 = vpop.f32.mrf.mxu2  ;;  %v9297_v37 = vpop.f32.mrf.mxu0 }
 0x4fb   : > { %v3650_v54 = vadd.f32 %v3649_v51, %v8979_v22  ;;  %10502 = vst [vmem:[#allocation44_spill] sm:$0xff] %v9297_v37  ;;  %v9299_v46 = vpop.f32.mrf.mxu1  ;;  %4058 = vmatmul.bf16.gmra.mxu3 %v10372_v31  ;;  %v3736_v22 = vadd.f32 %v3735_v11, %v3647_v55 }
 0x4fc   : > { %10503 = vst [vmem:[#allocation55_spill] sm:$0xff] %v9299_v46 }
 0x4fd   : > { %3851 = vmatmul.bf16.gmra.mxu0 %v10505_v8  ;;  %v3739_v3 = vadd.f32 %v3738_v43, %v3650_v54 }
 0x4fe   : > { %3940 = vmatmul.bf16.gmra.mxu1 %v10504_v9 }
 0x501   : > { %v3743_v13 = vpop.f32.mrf.mxu3 }
 0x502   : > { %v3651_v29 = vpop.f32.mrf.mxu2  ;;  %v9305_v57 = vpop.f32.mrf.mxu0 }
 0x503   : > { %v3652_v33 = vadd.f32 %v3651_v29, %v8989_v63  ;;  %10506 = vst [vmem:[#allocation46_spill] sm:$0xff] %v9305_v57  ;;  %v9307_v6 = vpop.f32.mrf.mxu1 }
 0x504   : > { %10507 = vst [vmem:[#allocation47_spill] sm:$0xff] %v9307_v6 }
 0x507   : > { %3969 = vmatmul.bf16.gmra.mxu2 %v10391_v2 }
 0x509   : > { %v3745_v46 = vpop.f32.mrf.mxu3 }
 0x50a   : > { %v3654_v51 = vpop.f32.mrf.mxu2  ;;  %v3817_v37 = vpop.f32.mrf.mxu0 }
 0x50b   : > { %v3655_v9 = vadd.f32 %v3654_v51, %v9001_v26  ;;  %v3906_v31 = vpop.f32.mrf.mxu1  ;;  %4063 = vmatmul.bf16.gmra.mxu3 %v10376_v40  ;;  %v3818_v50 = vadd.f32 %v3817_v37, %v3729_v44  ;;  %v3741_v26 = vadd.f32 %v3740_v61, %v3652_v33 }
 0x50d   : > { %v9312_v19 = vadd.f32 %v3906_v31, %v3818_v50  ;;  %v3744_v54 = vadd.f32 %v3743_v13, %v3655_v9 }
 0x511   : > { %v3748_v29 = vpop.f32.mrf.mxu3 }
 0x512   : > { %v3656_v63 = vpop.f32.mrf.mxu2  ;;  %v3819_v6 = vpop.f32.mrf.mxu0 }
 0x513   : > { %v3657_v57 = vadd.f32 %v3656_v63, %v9011_v10  ;;  %v3908_v12 = vpop.f32.mrf.mxu1  ;;  %v3820_v2 = vadd.f32 %v3819_v6, %v3731_v23 }
 0x515   : > { %v9315_v11 = vadd.f32 %v3908_v12, %v3820_v2 }
 0x517   : > { %3974 = vmatmul.bf16.gmra.mxu2 %v10394_v1 }
 0x519   : > { %v3750_v51 = vpop.f32.mrf.mxu3 }
 0x51a   : > { %v3659_v55 = vpop.f32.mrf.mxu2  ;;  %v3822_v37 = vpop.f32.mrf.mxu0 }
 0x51b   : > { %v3660_v40 = vadd.f32 %v3659_v55, %v9023_v35  ;;  %v3911_v43 = vpop.f32.mrf.mxu1  ;;  %4068 = vmatmul.bf16.gmra.mxu3 %v10383_v5  ;;  %v3823_v44 = vadd.f32 %v3822_v37, %v3734_v58  ;;  %v3746_v35 = vadd.f32 %v3745_v46, %v3657_v57 }
 0x51d   : > { %v9320_v31 = vadd.f32 %v3911_v43, %v3823_v44  ;;  %v3749_v2 = vadd.f32 %v3748_v29, %v3660_v40 }
 0x521   : > { %v3753_v50 = vpop.f32.mrf.mxu3 }
 0x522   : > { %v3661_v10 = vpop.f32.mrf.mxu2  ;;  %v3824_v23 = vpop.f32.mrf.mxu0 }
 0x523   : > { %v3662_v12 = vadd.f32 %v3661_v10, %v9031_v7  ;;  %v3913_v6 = vpop.f32.mrf.mxu1  ;;  %v3825_v1 = vadd.f32 %v3824_v23, %v3736_v22  ;;  %v10508_v7 = vld [vmem:[#allocation57_spill] sm:$0xff] }
 0x524   : > { %v5702_v37 = vmul.f32 -1.442695, %v10508_v7 }
 0x525   : > { %v9323_v61 = vadd.f32 %v3913_v6, %v3825_v1 }
 0x526   : > { %6130 = vpow2.f32 %v5702_v37 }
 0x527   : > { %3979 = vmatmul.bf16.gmra.mxu2 %v10397_v4 }
 0x529   : > { %v3755_v63 = vpop.f32.mrf.mxu3 }
 0x52a   : > { %v3664_v33 = vpop.f32.mrf.mxu2  ;;  %v3827_v58 = vpop.f32.mrf.mxu0 }
 0x52b   : > { %v3665_v5 = vadd.f32 %v3664_v33, %v9039_v17  ;;  %v3916_v13 = vpop.f32.mrf.mxu1  ;;  %4073 = vmatmul.bf16.gmra.mxu3 %v10467_v20  ;;  %v3828_v9 = vadd.f32 %v3827_v58, %v3739_v3  ;;  %v9335_v17 = vadd.f32 %v3750_v51, %v3662_v12  ;;  %v10509_v20 = vld [vmem:[#allocation24_spill] sm:$0xff] }
 0x52c   : > { %v5703_v3 = vmul.f32 -1.442695, %v10509_v20  ;;  %v6131_v23 = vpop.eup %6130  ;;  %v10510_v51 = vld [vmem:[#allocation28_spill] sm:$0xff] }
 0x52d   : > { %v9328_v55 = vadd.f32 %v3916_v13, %v3828_v9  ;;  %v5704_v12 = vmul.f32 -1.442695, %v10510_v51 }
 0x52e   : > { %6132 = vpow2.f32 %v5703_v3 }
 0x531   : > { %v3758_v43 = vpop.f32.mrf.mxu3 }
 0x532   : > { %v3666_v22 = vpop.f32.mrf.mxu2  ;;  %v3829_v4 = vpop.f32.mrf.mxu0 }
 0x533   : > { %v3667_v44 = vadd.f32 %v3666_v22, %v9045_v24  ;;  %v3918_v46 = vpop.f32.mrf.mxu1  ;;  %v3830_v57 = vadd.f32 %v3829_v4, %v3741_v26  ;;  %v9340_v26 = vadd.f32 1.0, %v6131_v23 }
 0x535   : > { %v9332_v10 = vadd.f32 %v3918_v46, %v3830_v57  ;;  %6134 = vrcp.f32 %v9340_v26  ;;  %v10511_v46 = vld [vmem:[#allocation58_spill] sm:$0xff]  ;;  %vm4257_vm9 = vweird.f32 %v9340_v26 }
 0x536   : > { %6136 = vpow2.f32 %v5704_v12  ;;  %v5705_v57 = vmul.f32 -1.442695, %v10511_v46  ;;  %v10512_v12 = vld [vmem:[#allocation3_spill] sm:$0xff] }
 0x537   : > { %3984 = vmatmul.bf16.gmra.mxu2 %v10400_v0  ;;  %v9344_v0 = vadd.f32 %v3753_v50, %v3665_v5  ;;  %v9356_v50 = vadd.f32 %v3755_v63, %v3667_v44 }
 0x539   : > { %v3760_v40 = vpop.f32.mrf.mxu3 }
 0x53a   : > { %v3669_v29 = vpop.f32.mrf.mxu2  ;;  %v3832_v1 = vpop.f32.mrf.mxu0 }
 0x53b   : > { %v3670_v6 = vadd.f32 %v3669_v29, %v9053_v18  ;;  %v3921_v33 = vpop.f32.mrf.mxu1  ;;  %4078 = vmatmul.bf16.gmra.mxu3 %v10471_v52  ;;  %v3833_v24 = vadd.f32 %v3832_v1, %v3744_v54  ;;  %v6133_v18 = vpop.eup %6132 }
 0x53c   : > { %v9351_v22 = vadd.f32 1.0, %v6133_v18  ;;  %v6135_v5 = vpop.eup %6134 }
 0x53d   : > { %v9342_v58 = vadd.f32 %v3921_v33, %v3833_v24  ;;  %v9369_v24 = vadd.f32 %v3758_v43, %v3670_v6  ;;  %v10513_v43 = vld [vmem:[#allocation26_spill] sm:$0xff]  ;;  %vm4258_vm13 = vweird.f32 %v6135_v5 }
 0x53e   : > { %6138 = vrcp.f32 %v9351_v22  ;;  %vm4259_vm0 = vmor %vm4257_vm9, %vm4258_vm13  ;;  %vm4272_vm3 = vweird.f32 %v9351_v22 }
 0x53f   : > { %6140 = vpow2.f32 %v5705_v57 }
 0x541   : > { %v9348_v9 = vpop.f32.mrf.mxu3 }
 0x542   : > { %v3671_v13 = vpop.f32.mrf.mxu2  ;;  %v3834_v37 = vpop.f32.mrf.mxu0 }
 0x543   : > { %v3672_v7 = vadd.f32 %v3671_v13, %v9059_v39  ;;  %v3923_v52 = vpop.f32.mrf.mxu1  ;;  %v3835_v54 = vadd.f32 %v3834_v37, %v3746_v35  ;;  %v6137_v39 = vpop.eup %6136  ;;  %v4253_v35 = vmul.f32 %v6135_v5, %v9340_v26  ;;  %v5706_v13 = vmul.f32 -1.442695, %v10512_v12 }
 0x544   : > { %v9365_v63 = vadd.f32 1.0, %v6137_v39  ;;  %v9371_v51 = vpop.eup %6138  ;;  %v4263_v39 = vand.u32 2147483648, %v9340_v26 }
 0x545   : > { %v9353_v4 = vadd.f32 %v3923_v52, %v3835_v54  ;;  %v4254_v33 = vsub.f32 1.0, %v4253_v35  ;;  %v6141_v37 = vpop.eup %6140  ;;  %v9381_v57 = vadd.f32 %v3760_v40, %v3672_v7  ;;  %v10515_v35 = vld [vmem:[#allocation59_spill] sm:$0xff]  ;;  %v10516_v7 = vld [vmem:[#allocation21_spill] sm:$0xff]  ;;  %vm4273_vm2 = vweird.f32 %v9371_v51 }
 0x546   : > { %6142 = vrcp.f32 %v9365_v63  ;;  %v9378_v54 = vadd.f32 1.0, %v6141_v37  ;;  %v4264_v37 = vor.u32 1.1754944e-38, %v4263_v39  ;;  %v4276_v39 = vand.u32 2147483647, %v9351_v22  ;;  %vm4274_vm4 = vmor %vm4272_vm3, %vm4273_vm2 }
 0x547   : > { %3989 = vmatmul.bf16.gmra.mxu2 %v7226_v25  ;;  %v4255_v52 = vmul.f32 %v6135_v5, %v4254_v33  ;;  %6144 = vpow2.f32 %v5706_v13  ;;  %10514 = vst [vmem:[#allocation48_spill] sm:$0xff] %v9381_v57  ;;  %vm4287_vm7 = vweird.f32 %v9365_v63 }
 0x548   : > { %6146 = vrcp.f32 %v9378_v54  ;;  %vm4277_vm5 = vcmp.eq.f32.partialorder %v4276_v39, 8.507059e+37  ;;  %vm4302_vm12 = vweird.f32 %v9378_v54 }
 0x549   : > { %v9360_v3 = vpop.f32.mrf.mxu3  ;;  %v4256_v6 = vadd.f32 %v6135_v5, %v4255_v52 }
 0x54a   : > { %v3674_v20 = vpop.f32.mrf.mxu2  ;;  %v3837_v23 = vpop.f32.mrf.mxu0 }
 0x54b   : > { %v3675_v29 = vadd.f32 %v3674_v20, %v9067_v27  ;;  %4083 = vmatmul.bf16.gmra.mxu3 %v10477_v42  ;;  %v3838_v1 = vadd.f32 %v3837_v23, %v3749_v2  ;;  %v3926_v25 = vpop.f32.mrf.mxu1  ;;  %v4268_v42 = vmul.f32 %v9371_v51, %v9351_v22  ;;  %v5707_v23 = vmul.f32 -1.442695, %v10515_v35 }
 0x54c   : > { %v9383_v20 = vpop.eup %6142  ;;  %v4260_v13 = vsel %vm4259_vm0, %v6135_v5, %v4256_v6 }
 0x54d   : > { %v9367_v44 = vadd.f32 %v3926_v25, %v3838_v1  ;;  %v4269_v46 = vsub.f32 1.0, %v4268_v42  ;;  %v6145_v33 = vpop.eup %6144  ;;  %v4283_v40 = vmul.f32 %v9383_v20, %v9365_v63  ;;  %6148 = vpow2.f32 %v5707_v23 }
 0x54e   : > { %v9402_v5 = vadd.f32 %v9348_v9, %v3675_v29  ;;  %v9404_v6 = vpop.eup %6146  ;;  %v10518_v29 = vld [vmem:[#allocation33_spill] sm:$0xff]  ;;  %vm4288_vm6 = vweird.f32 %v9383_v20 }
 0x54f   : > { %v4284_v57 = vsub.f32 1.0, %v4283_v40  ;;  %v4298_v9 = vmul.f32 %v9404_v6, %v9378_v54  ;;  %vm4289_vm8 = vmor %vm4287_vm7, %vm4288_vm6  ;;  %vm4303_vm11 = vweird.f32 %v9404_v6 }
 0x550   : > { %vm4304_vm14 = vmor %vm4302_vm12, %vm4303_vm11 }
 0x551   : > { %v4044_v18 = vpop.f32.mrf.mxu3 }
 0x552   : > { %v3676_v27 = vpop.f32.mrf.mxu2 }
 0x553   : > { %v3677_v2 = vadd.f32 %v3676_v27, %v9073_v36  ;;  %v4261_v36 = vand.u32 2147483647, %v9340_v26  ;;  %v4270_v27 = vmul.f32 %v9371_v51, %v4269_v46  ;;  %v9395_v26 = vadd.f32 1.0, %v6145_v33  ;;  %v10517_v46 = vld [vmem:[#allocation32_spill] sm:$0xff] }
 0x555   : > { %vm4262_vm1 = vcmp.eq.f32.partialorder %v4261_v36, 8.507059e+37  ;;  %v4271_v35 = vadd.f32 %v9371_v51, %v4270_v27  ;;  %6150 = vrcp.f32 %v9395_v26  ;;  %vm4317_vm9 = vweird.f32 %v9395_v26 }
 0x556   : > { %v4265_v52 = vsel %vm4262_vm1, %v4264_v37, %v4260_v13 }
 0x557   : > { %3994 = vmatmul.bf16.gmra.mxu2 %v10513_v43  ;;  %v4275_v40 = vsel %vm4274_vm4, %v9371_v51, %v4271_v35  ;;  %v9424_v51 = vadd.f32 %v9360_v3, %v3677_v2  ;;  %v10520_v35 = vld [vmem:[#allocation13_spill] sm:$0xff]  ;;  %v10521_v2 = vld [vmem:[#allocation60_spill] sm:$0xff] }
 0x559   : > { %v4046_v25 = vpop.f32.mrf.mxu3 }
 0x55a   : > { %v3955_v1 = vpop.f32.mrf.mxu2 }
 0x55b   : > { %v3956_v12 = vadd.f32 %v3955_v1, %v10516_v7  ;;  %4088 = vmatmul.bf16.gmra.mxu3 %v10482_v62  ;;  %v4278_v62 = vand.u32 2147483648, %v9351_v22  ;;  %v6149_v1 = vpop.eup %6148  ;;  %v4285_v7 = vmul.f32 %v9383_v20, %v4284_v57 }
 0x55c   : > { %v9416_v22 = vadd.f32 1.0, %v6149_v1  ;;  %v9426_v57 = vpop.eup %6150 }
 0x55d   : > { %v4045_v42 = vadd.f32 %v4044_v18, %v3956_v12  ;;  %v5708_v18 = vmul.f32 -1.442695, %v10517_v46  ;;  %v4279_v12 = vor.u32 1.1754944e-38, %v4278_v62  ;;  %v4299_v46 = vsub.f32 1.0, %v4298_v9 }
 0x55e   : > { %v5709_v62 = vmul.f32 -1.442695, %v10520_v35  ;;  %v4313_v3 = vmul.f32 %v9426_v57, %v9395_v26  ;;  %vm4318_vm13 = vweird.f32 %v9426_v57  ;;  %vm4332_vm3 = vweird.f32 %v9416_v22 }
 0x55f   : > { %v9398_v43 = vmul.f32 %v4265_v52, %v4045_v42  ;;  %6152 = vpow2.f32 %v5708_v18  ;;  %v4280_v27 = vsel %vm4277_vm5, %v4279_v12, %v4275_v40  ;;  %v10519_v42 = vld [vmem:[#allocation31_spill] sm:$0xff]  ;;  %v4286_v52 = vadd.f32 %v9383_v20, %v4285_v7  ;;  %vm4319_vm0 = vmor %vm4317_vm9, %vm4318_vm13 }
 0x560   : > { %v4291_v18 = vand.u32 2147483647, %v9365_v63  ;;  %6154 = vrcp.f32 %v9416_v22 }
 0x561   : > { %v4049_v36 = vpop.f32.mrf.mxu3  ;;  %6156 = vpow2.f32 %v5709_v62 }
 0x562   : > { %v3957_v23 = vpop.f32.mrf.mxu2  ;;  %vm4292_vm10 = vcmp.eq.f32.partialorder %v4291_v18, 8.507059e+37 }
 0x563   : > { %v3958_v33 = vadd.f32 %v3957_v23, %v10518_v29  ;;  %v4290_v29 = vsel %vm4289_vm8, %v9383_v20, %v4286_v52  ;;  %v4308_v20 = vand.u32 2147483648, %v9378_v54  ;;  %v10522_v52 = vld [vmem:[#allocation15_spill] sm:$0xff] }
 0x565   : > { %v4047_v13 = vadd.f32 %v4046_v25, %v3958_v33  ;;  %v4293_v25 = vand.u32 2147483648, %v9365_v63  ;;  %v6153_v1 = vpop.eup %6152  ;;  %v4300_v33 = vmul.f32 %v9404_v6, %v4299_v46  ;;  %v5710_v46 = vmul.f32 -1.442695, %v10522_v52 }
 0x566   : > { %v9439_v7 = vadd.f32 1.0, %v6153_v1  ;;  %v9445_v35 = vpop.eup %6154 }
 0x567   : > { %v9419_v37 = vmul.f32 %v4280_v27, %v4047_v13  ;;  %3999 = vmatmul.bf16.gmra.mxu2 %v10519_v42  ;;  %v4294_v40 = vor.u32 1.1754944e-38, %v4293_v25  ;;  %v4301_v27 = vadd.f32 %v9404_v6, %v4300_v33  ;;  %v4314_v42 = vsub.f32 1.0, %v4313_v3  ;;  %v6157_v62 = vpop.eup %6156 }
 0x568   : > { %6158 = vrcp.f32 %v9439_v7  ;;  %v4328_v18 = vmul.f32 %v9445_v35, %v9416_v22  ;;  %vm4333_vm2 = vweird.f32 %v9445_v35  ;;  %vm4347_vm7 = vweird.f32 %v9439_v7 }
 0x569   : > { %v4051_v23 = vpop.f32.mrf.mxu3  ;;  %v4295_v12 = vsel %vm4292_vm10, %v4294_v40, %v4290_v29  ;;  %v4305_v3 = vsel %vm4304_vm14, %v9404_v6, %v4301_v27  ;;  %6160 = vpow2.f32 %v5710_v46  ;;  %v4323_v6 = vand.u32 2147483648, %v9395_v26  ;;  %v10525_v27 = vld [vmem:[#allocation18_spill] sm:$0xff]  ;;  %vm4334_vm4 = vmor %vm4332_vm3, %vm4333_vm2 }
 0x56a   : > { %v3960_v39 = vpop.f32.mrf.mxu2  ;;  %v4329_v52 = vsub.f32 1.0, %v4328_v18 }
 0x56b   : > { %v3961_v9 = vadd.f32 %v3960_v39, %v10521_v2  ;;  %4093 = vmatmul.bf16.gmra.mxu3 %v10485_v16  ;;  %v4306_v16 = vand.u32 2147483647, %v9378_v54  ;;  %v10523_v39 = vld [vmem:[#allocation35_spill] sm:$0xff]  ;;  %v4315_v2 = vmul.f32 %v9426_v57, %v4314_v42  ;;  %v9457_v54 = vadd.f32 1.0, %v6157_v62 }
 0x56c   : > { %v5711_v42 = vmul.f32 -1.442695, %v10525_v27 }
 0x56d   : > { %v4050_v63 = vadd.f32 %v4049_v36, %v3961_v9  ;;  %v4309_v9 = vor.u32 1.1754944e-38, %v4308_v20  ;;  %vm4307_vm15 = vcmp.eq.f32.partialorder %v4306_v16, 8.507059e+37  ;;  %6162 = vrcp.f32 %v9457_v54 }
 0x56e   : > { %6164 = vpow2.f32 %v5711_v42  ;;  %vm4362_vm12 = vweird.f32 %v9457_v54 }
 0x56f   : > { %v9441_v13 = vmul.f32 %v4295_v12, %v4050_v63  ;;  %v4310_v33 = vsel %vm4307_vm15, %v4309_v9, %v4305_v3  ;;  %v10524_v63 = vld [vmem:[#allocation34_spill] sm:$0xff]  ;;  %v4316_v12 = vadd.f32 %v9426_v57, %v4315_v2  ;;  %v4324_v3 = vor.u32 1.1754944e-38, %v4323_v6 }
 0x571   : > { %v4054_v25 = vpop.f32.mrf.mxu3 }
 0x572   : > { %v3962_v36 = vpop.f32.mrf.mxu2 }
 0x573   : > { %v3963_v1 = vadd.f32 %v3962_v36, %v10523_v39  ;;  %v9464_v36 = vpop.eup %6158  ;;  %v4320_v39 = vsel %vm4319_vm0, %v9426_v57, %v4316_v12  ;;  %v4338_v57 = vand.u32 2147483648, %v9416_v22  ;;  %v10526_v12 = vld [vmem:[#allocation38_spill] sm:$0xff] }
 0x574   : > { %v6161_v16 = vpop.eup %6160  ;;  %v4343_v62 = vmul.f32 %v9464_v36, %v9439_v7  ;;  %vm4348_vm6 = vweird.f32 %v9464_v36 }
 0x575   : > { %v4052_v29 = vadd.f32 %v4051_v23, %v3963_v1  ;;  %v4321_v23 = vand.u32 2147483647, %v9395_v26  ;;  %v4330_v1 = vmul.f32 %v9445_v35, %v4329_v52  ;;  %v9477_v2 = vadd.f32 1.0, %v6161_v16  ;;  %vm4349_vm8 = vmor %vm4347_vm7, %vm4348_vm6 }
 0x576   : > { %v4336_v52 = vand.u32 2147483647, %v9416_v22 }
 0x577   : > { %v9459_v40 = vmul.f32 %v4310_v33, %v4052_v29  ;;  %4004 = vmatmul.bf16.gmra.mxu2 %v10524_v63  ;;  %vm4322_vm1 = vcmp.eq.f32.partialorder %v4321_v23, 8.507059e+37  ;;  %v4331_v33 = vadd.f32 %v9445_v35, %v4330_v1  ;;  %v9483_v63 = vpop.eup %6162  ;;  %6166 = vrcp.f32 %v9477_v2 }
 0x578   : > { %v4325_v9 = vsel %vm4322_vm1, %v4324_v3, %v4320_v39  ;;  %v6165_v42 = vpop.eup %6164  ;;  %v4358_v23 = vmul.f32 %v9483_v63, %v9457_v54  ;;  %vm4337_vm5 = vcmp.eq.f32.partialorder %v4336_v52, 8.507059e+37  ;;  %vm4363_vm11 = vweird.f32 %v9483_v63 }
 0x579   : > { %v4056_v46 = vpop.f32.mrf.mxu3  ;;  %v4335_v16 = vsel %vm4334_vm4, %v9445_v35, %v4331_v33  ;;  %v9497_v22 = vadd.f32 1.0, %v6165_v42  ;;  %v4353_v35 = vand.u32 2147483648, %v9439_v7  ;;  %v10528_v33 = vld [vmem:[#allocation25_spill] sm:$0xff]  ;;  %vm4364_vm14 = vmor %vm4362_vm12, %vm4363_vm11  ;;  %vm4377_vm9 = vweird.f32 %v9477_v2 }
 0x57a   : > { %v3965_v20 = vpop.f32.mrf.mxu2 }
 0x57b   : > { %v3966_v18 = vadd.f32 %v3965_v20, %v9215_v14  ;;  %4098 = vmatmul.bf16.gmra.mxu3 %v10489_v59  ;;  %v4344_v14 = vsub.f32 1.0, %v4343_v62  ;;  %vm4392_vm3 = vweird.f32 %v9497_v22 }
 0x57d   : > { %v4055_v26 = vadd.f32 %v4054_v25, %v3966_v18  ;;  %v5712_v25 = vmul.f32 -1.442695, %v10526_v12  ;;  %v4345_v62 = vmul.f32 %v9464_v36, %v4344_v14  ;;  %v4339_v18 = vor.u32 1.1754944e-38, %v4338_v57  ;;  %v9504_v12 = vpop.eup %6166 }
 0x57e   : > { %v5713_v14 = vmul.f32 -1.442695, %v10528_v33  ;;  %vm4378_vm13 = vweird.f32 %v9504_v12 }
 0x57f   : > { %v9479_v29 = vmul.f32 %v4325_v9, %v4055_v26  ;;  %6168 = vpow2.f32 %v5712_v25  ;;  %v4340_v1 = vsel %vm4337_vm5, %v4339_v18, %v4335_v16  ;;  %v10527_v26 = vld [vmem:[#allocation39_spill] sm:$0xff]  ;;  %v4346_v9 = vadd.f32 %v9464_v36, %v4345_v62  ;;  %vm4379_vm0 = vmor %vm4377_vm9, %vm4378_vm13 }
 0x580   : > { %6170 = vrcp.f32 %v9497_v22  ;;  %v4354_v16 = vor.u32 1.1754944e-38, %v4353_v35 }
 0x581   : > { %v4059_v27 = vpop.f32.mrf.mxu3  ;;  %6172 = vpow2.f32 %v5713_v14 }
 0x582   : > { %v3967_v6 = vpop.f32.mrf.mxu2 }
 0x583   : > { %v3968_v20 = vadd.f32 %v3967_v6, %v9226_v56  ;;  %v4359_v56 = vsub.f32 1.0, %v4358_v23  ;;  %v4373_v6 = vmul.f32 %v9504_v12, %v9477_v2  ;;  %v4350_v23 = vsel %vm4349_vm8, %v9464_v36, %v4346_v9  ;;  %v10529_v9 = vld [vmem:[#allocation29_spill] sm:$0xff] }
 0x584   : > { %v4368_v36 = vand.u32 2147483648, %v9457_v54 }
 0x585   : > { %v4057_v39 = vadd.f32 %v4056_v46, %v3968_v20  ;;  %v4351_v46 = vand.u32 2147483647, %v9439_v7  ;;  %v6169_v52 = vpop.eup %6168  ;;  %v4360_v20 = vmul.f32 %v9483_v63, %v4359_v56  ;;  %v4366_v56 = vand.u32 2147483647, %v9457_v54 }
 0x586   : > { %v9517_v62 = vadd.f32 1.0, %v6169_v52 }
 0x587   : > { %v9499_v3 = vmul.f32 %v4340_v1, %v4057_v39  ;;  %4009 = vmatmul.bf16.gmra.mxu2 %v10527_v26  ;;  %vm4352_vm10 = vcmp.eq.f32.partialorder %v4351_v46, 8.507059e+37  ;;  %v4361_v1 = vadd.f32 %v9483_v63, %v4360_v20  ;;  %v9523_v26 = vpop.eup %6170  ;;  %vm4367_vm15 = vcmp.eq.f32.partialorder %v4366_v56, 8.507059e+37 }
 0x588   : > { %v4355_v18 = vsel %vm4352_vm10, %v4354_v16, %v4350_v23  ;;  %6174 = vrcp.f32 %v9517_v62  ;;  %v6173_v14 = vpop.eup %6172  ;;  %vm4393_vm2 = vweird.f32 %v9523_v26  ;;  %vm4407_vm7 = vweird.f32 %v9517_v62 }
 0x589   : > { %v4061_v25 = vpop.f32.mrf.mxu3  ;;  %v9537_v54 = vadd.f32 1.0, %v6173_v14  ;;  %vm4394_vm4 = vmor %vm4392_vm3, %vm4393_vm2 }
 0x58a   : > { %v3970_v57 = vpop.f32.mrf.mxu2 }
 0x58b   : > { %v3971_v42 = vadd.f32 %v3970_v57, %v9239_v53  ;;  %4103 = vmatmul.bf16.gmra.mxu3 %v10493_v47  ;;  %v4374_v53 = vsub.f32 1.0, %v4373_v6  ;;  %v4765_v47 = vpack.c.bf16 %v9459_v40, %v9441_v13  ;;  %v4365_v57 = vsel %vm4364_vm14, %v9483_v63, %v4361_v1 }
 0x58c   : > { %v4388_v6 = vmul.f32 %v9523_v26, %v9497_v22  ;;  %v4383_v1 = vand.u32 2147483648, %v9477_v2  ;;  %vm4422_vm12 = vweird.f32 %v9537_v54 }
 0x58d   : > { %v4060_v7 = vadd.f32 %v4059_v27, %v3971_v42  ;;  %v5714_v27 = vmul.f32 -1.442695, %v10529_v9  ;;  %v4375_v52 = vmul.f32 %v9504_v12, %v4374_v53  ;;  %v4369_v42 = vor.u32 1.1754944e-38, %v4368_v36  ;;  %v10531_v53 = vld [vmem:[#allocation30_spill] sm:$0xff] }
 0x58e   : > { %v4389_v63 = vsub.f32 1.0, %v4388_v6  ;;  %v5715_v36 = vmul.f32 -1.442695, %v10531_v53 }
 0x58f   : > { %v9519_v39 = vmul.f32 %v4355_v18, %v4060_v7  ;;  %6176 = vpow2.f32 %v5714_v27  ;;  %v4370_v20 = vsel %vm4367_vm15, %v4369_v42, %v4365_v57  ;;  %v10530_v7 = vld [vmem:[#allocation42_spill] sm:$0xff]  ;;  %v9544_v18 = vpop.eup %6174 }
 0x590   : > { %6178 = vrcp.f32 %v9537_v54  ;;  %v4390_v57 = vmul.f32 %v9523_v26, %v4389_v63  ;;  %v4396_v63 = vand.u32 2147483647, %v9497_v22  ;;  %vm4408_vm6 = vweird.f32 %v9544_v18 }
 0x591   : > { %v4064_v33 = vpop.f32.mrf.mxu3  ;;  %6180 = vpow2.f32 %v5715_v36  ;;  %vm4409_vm8 = vmor %vm4407_vm7, %vm4408_vm6 }
 0x592   : > { %v3972_v35 = vpop.f32.mrf.mxu2  ;;  %vm4397_vm5 = vcmp.eq.f32.partialorder %v4396_v63, 8.507059e+37 }
 0x593   : > { %v3973_v46 = vadd.f32 %v3972_v35, %v9243_v38  ;;  %v4376_v38 = vadd.f32 %v9504_v12, %v4375_v52  ;;  %v4403_v35 = vmul.f32 %v9544_v18, %v9517_v62  ;;  %v4384_v52 = vor.u32 1.1754944e-38, %v4383_v1 }
 0x595   : > { %v4062_v23 = vadd.f32 %v4061_v25, %v3973_v46  ;;  %v4381_v25 = vand.u32 2147483647, %v9477_v2  ;;  %v6177_v56 = vpop.eup %6176  ;;  %v4380_v46 = vsel %vm4379_vm0, %v9504_v12, %v4376_v38  ;;  %v3800_v2 = vadd.f32 %v9257_v34, %v9230_v32  ;;  %v10532_v32 = vld [vmem:[#allocation53_spill] sm:$0xff] }
 0x596   : > { %v9559_v42 = vadd.f32 1.0, %v6177_v56  ;;  %v4404_v12 = vsub.f32 1.0, %v4403_v35  ;;  %v4766_v38 = vpack.c.bf16 %v9499_v3, %v9479_v29  ;;  %v5716_v34 = vmul.f32 -1.442695, %v10532_v32 }
 0x597   : > { %v9539_v16 = vmul.f32 %v4370_v20, %v4062_v23  ;;  %4014 = vmatmul.bf16.gmra.mxu2 %v10530_v7  ;;  %vm4382_vm1 = vcmp.eq.f32.partialorder %v4381_v25, 8.507059e+37  ;;  %v9565_v7 = vpop.eup %6178 }
 0x598   : > { %v4385_v23 = vsel %vm4382_vm1, %v4384_v52, %v4380_v46  ;;  %6182 = vrcp.f32 %v9559_v42  ;;  %v6181_v36 = vpop.eup %6180  ;;  %v4405_v56 = vmul.f32 %v9544_v18, %v4404_v12  ;;  %v4418_v35 = vmul.f32 %v9565_v7, %v9537_v54  ;;  %v10534_v12 = vld [vmem:[#allocation54_spill] sm:$0xff] }
 0x599   : > { %v4066_v27 = vpop.f32.mrf.mxu3  ;;  %6184 = vpow2.f32 %v5716_v34  ;;  %v9581_v46 = vadd.f32 1.0, %v6181_v36  ;;  %vm4423_vm11 = vweird.f32 %v9565_v7  ;;  %vm4437_vm9 = vweird.f32 %v9559_v42 }
 0x59a   : > { %v3975_v9 = vpop.f32.mrf.mxu2  ;;  %vm4424_vm14 = vmor %vm4422_vm12, %vm4423_vm11 }
 0x59b   : > { %v3976_v14 = vadd.f32 %v3975_v9, %v9253_v28  ;;  %4108 = vmatmul.bf16.gmra.mxu3 %v10498_v60  ;;  %v4391_v28 = vadd.f32 %v9523_v26, %v4390_v57  ;;  %v4398_v60 = vand.u32 2147483648, %v9497_v22  ;;  %6186 = vrcp.f32 %v9581_v46 }
 0x59c   : > { %vm4452_vm3 = vweird.f32 %v9581_v46 }
 0x59d   : > { %v4065_v6 = vadd.f32 %v4064_v33, %v3976_v14  ;;  %v3889_v33 = vadd.f32 %v9259_v41, %v3800_v2  ;;  %v4395_v9 = vsel %vm4394_vm4, %v9523_v26, %v4391_v28  ;;  %v4399_v14 = vor.u32 1.1754944e-38, %v4398_v60  ;;  %v10533_v2 = vld [vmem:[#allocation45_spill] sm:$0xff] }
 0x59e   : > { %v3803_v41 = vadd.f32 %v9265_v45, %v9237_v15  ;;  %v4406_v26 = vadd.f32 %v9544_v18, %v4405_v56  ;;  %v4413_v28 = vand.u32 2147483648, %v9517_v62  ;;  %v5717_v15 = vmul.f32 -1.442695, %v10534_v12 }
 0x59f   : > { %v9561_v20 = vmul.f32 %v4385_v23, %v4065_v6  ;;  %v4400_v57 = vsel %vm4397_vm5, %v4399_v14, %v4395_v9  ;;  %v4419_v6 = vsub.f32 1.0, %v4418_v35  ;;  %v9588_v23 = vpop.eup %6182 }
 0x5a0   : > { %v3892_v45 = vadd.f32 %v9267_v21, %v3803_v41  ;;  %v6185_v34 = vpop.eup %6184  ;;  %6188 = vpow2.f32 %v5717_v15  ;;  %v3805_v21 = vadd.f32 %v9275_v49, %v9246_v30  ;;  %v10535_v30 = vld [vmem:[#allocation4_spill] sm:$0xff]  ;;  %vm4438_vm13 = vweird.f32 %v9588_v23 }
 0x5a1   : > { %v4069_v53 = vpop.f32.mrf.mxu3  ;;  %v4420_v36 = vmul.f32 %v9565_v7, %v4419_v6  ;;  %v9603_v9 = vadd.f32 1.0, %v6185_v34  ;;  %v9609_v41 = vpop.eup %6186  ;;  %v5718_v49 = vmul.f32 -1.442695, %v10535_v30  ;;  %vm4439_vm0 = vmor %vm4437_vm9, %vm4438_vm13 }
 0x5a2   : > { %v3977_v1 = vpop.f32.mrf.mxu2  ;;  %vm4453_vm2 = vweird.f32 %v9609_v41 }
 0x5a3   : > { %v3978_v25 = vadd.f32 %v3977_v1, %v3889_v33  ;;  %v4433_v33 = vmul.f32 %v9588_v23, %v9559_v42  ;;  %v4410_v1 = vsel %vm4409_vm8, %v9544_v18, %v4406_v26  ;;  %v4421_v14 = vadd.f32 %v9565_v7, %v4420_v36  ;;  %v10538_v36 = vld [vmem:[#allocation27_spill] sm:$0xff]  ;;  %vm4454_vm4 = vmor %vm4452_vm3, %vm4453_vm2 }
 0x5a4   : > { %6190 = vrcp.f32 %v9603_v9  ;;  %vm4467_vm7 = vweird.f32 %v9603_v9 }
 0x5a5   : > { %v4067_v22 = vadd.f32 %v4066_v27, %v3978_v25  ;;  %v4411_v27 = vand.u32 2147483647, %v9517_v62  ;;  %v4414_v25 = vor.u32 1.1754944e-38, %v4413_v28  ;;  %v4434_v18 = vsub.f32 1.0, %v4433_v33 }
 0x5a6   : > { %v6189_v6 = vpop.eup %6188  ;;  %v4425_v12 = vsel %vm4424_vm14, %v9565_v7, %v4421_v14  ;;  %6192 = vpow2.f32 %v5718_v49 }
 0x5a7   : > { %v9583_v52 = vmul.f32 %v4400_v57, %v4067_v22  ;;  %4019 = vmatmul.bf16.gmra.mxu2 %v10533_v2  ;;  %vm4412_vm10 = vcmp.eq.f32.partialorder %v4411_v27, 8.507059e+37  ;;  %v4767_v22 = vpack.c.bf16 %v9539_v16, %v9519_v39  ;;  %v4426_v57 = vand.u32 2147483647, %v9537_v54 }
 0x5a8   : > { %v4415_v56 = vsel %vm4412_vm10, %v4414_v25, %v4410_v1  ;;  %v4435_v15 = vmul.f32 %v9588_v23, %v4434_v18  ;;  %v9625_v33 = vadd.f32 1.0, %v6189_v6 }
 0x5a9   : > { %v4071_v32 = vpop.f32.mrf.mxu3  ;;  %vm4427_vm15 = vcmp.eq.f32.partialorder %v4426_v57, 8.507059e+37 }
 0x5aa   : > { %v3980_v60 = vpop.f32.mrf.mxu2  ;;  %v4436_v7 = vadd.f32 %v9588_v23, %v4435_v15  ;;  %6194 = vrcp.f32 %v9625_v33  ;;  %v10541_v15 = vld [vmem:[#allocation10_spill] sm:$0xff]  ;;  %vm4482_vm12 = vweird.f32 %v9625_v33 }
 0x5ab   : > { %v3981_v63 = vadd.f32 %v3980_v60, %v3892_v45  ;;  %4113 = vmatmul.bf16.gmra.mxu3 %v10505_v8  ;;  %v4428_v8 = vand.u32 2147483648, %v9537_v54  ;;  %v4448_v45 = vmul.f32 %v9609_v41, %v9581_v46  ;;  %v10537_v60 = vld [vmem:[#allocation41_spill] sm:$0xff] }
 0x5ac   : > { %v4440_v6 = vsel %vm4439_vm0, %v9588_v23, %v4436_v7  ;;  %v4458_v7 = vand.u32 2147483648, %v9581_v46 }
 0x5ad   : > { %v4070_v62 = vadd.f32 %v4069_v53, %v3981_v63  ;;  %v3894_v53 = vadd.f32 %v9277_v48, %v3805_v21  ;;  %v4429_v27 = vor.u32 1.1754944e-38, %v4428_v8  ;;  %v10536_v48 = vld [vmem:[#allocation61_spill] sm:$0xff]  ;;  %v4449_v25 = vsub.f32 1.0, %v4448_v45  ;;  %v9632_v21 = vpop.eup %6190 }
 0x5ae   : > { %v3808_v34 = vadd.f32 %v10537_v60, %v10536_v48  ;;  %v4441_v8 = vand.u32 2147483647, %v9559_v42  ;;  %v4463_v57 = vmul.f32 %v9632_v21, %v9603_v9  ;;  %v10542_v45 = vld [vmem:[#allocation37_spill] sm:$0xff]  ;;  %vm4468_vm6 = vweird.f32 %v9632_v21 }
 0x5af   : > { %v9605_v35 = vmul.f32 %v4415_v56, %v4070_v62  ;;  %v4430_v63 = vsel %vm4427_vm15, %v4429_v27, %v4425_v12  ;;  %v4443_v62 = vand.u32 2147483648, %v9559_v42  ;;  %v10539_v56 = vld [vmem:[#allocation22_spill] sm:$0xff]  ;;  %v10543_v42 = vld [vmem:[#allocation43_spill] sm:$0xff]  ;;  %vm4469_vm8 = vmor %vm4467_vm7, %vm4468_vm6 }
 0x5b0   : > { %v5719_v14 = vmul.f32 -1.442695, %v10539_v56  ;;  %v3810_v27 = vadd.f32 %v10543_v42, %v10542_v45  ;;  %vm4442_vm1 = vcmp.eq.f32.partialorder %v4441_v8, 8.507059e+37  ;;  %v4464_v23 = vsub.f32 1.0, %v4463_v57  ;;  %v10545_v56 = vld [vmem:[#allocation64_spill] sm:$0xff] }
 0x5b1   : > { %v4074_v26 = vpop.f32.mrf.mxu3  ;;  %v4444_v12 = vor.u32 1.1754944e-38, %v4443_v62  ;;  %v10544_v62 = vld [vmem:[#allocation6_spill] sm:$0xff] }
 0x5b2   : > { %v3982_v2 = vpop.f32.mrf.mxu2  ;;  %6196 = vpow2.f32 %v5719_v14  ;;  %v3899_v14 = vadd.f32 %v10545_v56, %v3810_v27  ;;  %v10550_v56 = vld [vmem:[#allocation55_spill] sm:$0xff] }
 0x5b3   : > { %v3983_v28 = vadd.f32 %v3982_v2, %v3894_v53  ;;  %v6193_v53 = vpop.eup %6192 }
 0x5b4   : > { %v9647_v60 = vadd.f32 1.0, %v6193_v53 }
 0x5b5   : > { %v4072_v54 = vadd.f32 %v4071_v32, %v3983_v28  ;;  %v10540_v32 = vld [vmem:[#allocation63_spill] sm:$0xff]  ;;  %v4450_v28 = vmul.f32 %v9609_v41, %v4449_v25  ;;  %v4768_v25 = vpack.c.bf16 %v9583_v52, %v9561_v20 }
 0x5b6   : > { %v3897_v18 = vadd.f32 %v10540_v32, %v3808_v34  ;;  %v4445_v34 = vsel %vm4442_vm1, %v4444_v12, %v4440_v6  ;;  %v4456_v32 = vand.u32 2147483647, %v9581_v46  ;;  %6198 = vrcp.f32 %v9647_v60  ;;  %v10546_v12 = vld [vmem:[#allocation40_spill] sm:$0xff] }
 0x5b7   : > { %v9627_v1 = vmul.f32 %v4430_v63, %v4072_v54  ;;  %4024 = vmatmul.bf16.gmra.mxu2 %v10538_v36  ;;  %v4451_v63 = vadd.f32 %v9609_v41, %v4450_v28  ;;  %v9653_v36 = vpop.eup %6194  ;;  %v4459_v28 = vor.u32 1.1754944e-38, %v4458_v7  ;;  %vm4497_vm9 = vweird.f32 %v9647_v60 }
 0x5b8   : > { %v4478_v6 = vmul.f32 %v9653_v36, %v9625_v33  ;;  %vm4457_vm5 = vcmp.eq.f32.partialorder %v4456_v32, 8.507059e+37  ;;  %v4471_v32 = vand.u32 2147483647, %v9603_v9  ;;  %vm4483_vm11 = vweird.f32 %v9653_v36 }
 0x5b9   : > { %v4076_v49 = vpop.f32.mrf.mxu3  ;;  %v4455_v57 = vsel %vm4454_vm4, %v9609_v41, %v4451_v63  ;;  %v10548_v41 = vmov 0   ;;  %vm4484_vm14 = vmor %vm4482_vm12, %vm4483_vm11 }
 0x5ba   : > { %v3985_v30 = vpop.f32.mrf.mxu2  ;;  %v4460_v27 = vsel %vm4457_vm5, %v4459_v28, %v4455_v57  ;;  %v4479_v63 = vsub.f32 1.0, %v4478_v6  ;;  %vm4472_vm10 = vcmp.eq.f32.partialorder %v4471_v32, 8.507059e+37 }
 0x5bb   : > { %v3986_v2 = vadd.f32 %v3985_v30, %v3897_v18  ;;  %4118 = vmatmul.bf16.gmra.mxu3 %v10541_v15  ;;  %v6197_v30 = vpop.eup %6196  ;;  %v10547_v15 = vld [vmem:[#allocation44_spill] sm:$0xff] }
 0x5bc   : > { %v3813_v45 = vadd.f32 %v10547_v15, %v10546_v12  ;;  %v9669_v42 = vadd.f32 1.0, %v6197_v30  ;;  %v9678_v7 = vpop.eup %6198  ;;  %v4480_v12 = vmul.f32 %v9653_v36, %v4479_v63  ;;  %v10551_v15 = vld [vmem:[#allocation62_spill] sm:$0xff] }
 0x5bd   : > { %v4075_v48 = vadd.f32 %v4074_v26, %v3986_v2  ;;  %v5720_v26 = vmul.f32 -1.442695, %v10544_v62  ;;  %v4465_v2 = vmul.f32 %v9632_v21, %v4464_v23  ;;  %v4769_v23 = vpack.c.bf16 %v9627_v1, %v9605_v35  ;;  %v10549_v62 = vld [vmem:[#allocation56_spill] sm:$0xff] }
 0x5be   : > { %v4481_v59 = vadd.f32 %v9653_v36, %v4480_v12  ;;  %vm4498_vm13 = vweird.f32 %v9678_v7  ;;  %vm4512_vm3 = vweird.f32 %v9669_v42 }
 0x5bf   : > { %v9649_v54 = vmul.f32 %v4445_v34, %v4075_v48  ;;  %6200 = vpow2.f32 %v5720_v26  ;;  %v4466_v34 = vadd.f32 %v9632_v21, %v4465_v2  ;;  %v5721_v26 = vmul.f32 -1.442695, %v10549_v62  ;;  %vm4499_vm0 = vmor %vm4497_vm9, %vm4498_vm13 }
 0x5c0   : > { %6202 = vrcp.f32 %v9669_v42  ;;  %v4493_v2 = vmul.f32 %v9678_v7, %v9647_v60 }
 0x5c1   : > { %v4079_v8 = vpop.f32.mrf.mxu3  ;;  %v4470_v28 = vsel %vm4469_vm8, %v9632_v21, %v4466_v34  ;;  %6204 = vpow2.f32 %v5721_v26  ;;  %v4488_v21 = vand.u32 2147483648, %v9625_v33  ;;  %v10553_v34 = vld [vmem:[#allocation8_spill] sm:$0xff] }
 0x5c2   : > { %v3987_v18 = vpop.f32.mrf.mxu2  ;;  %v5722_v63 = vmul.f32 -1.442695, %v10553_v34 }
 0x5c3   : > { %v3988_v53 = vadd.f32 %v3987_v18, %v3899_v14  ;;  %v3902_v14 = vadd.f32 %v10550_v56, %v3813_v45  ;;  %v10552_v45 = vld [vmem:[#allocation46_spill] sm:$0xff] }
 0x5c5   : > { %v4077_v46 = vadd.f32 %v4076_v49, %v3988_v53  ;;  %v4473_v49 = vand.u32 2147483648, %v9603_v9  ;;  %v6201_v57 = vpop.eup %6200 }
 0x5c7   : > { %v9672_v48 = vmul.f32 %v4460_v27, %v4077_v46  ;;  %4029 = vmatmul.bf16.gmra.mxu2 %v10548_v41  ;;  %v4474_v9 = vor.u32 1.1754944e-38, %v4473_v49  ;;  %v3815_v46 = vadd.f32 %v10552_v45, %v10551_v15  ;;  %v9696_v41 = vadd.f32 1.0, %v6201_v57  ;;  %v10554_v49 = vld [vmem:[#allocation47_spill] sm:$0xff] }
 0x5c8   : > { %v4489_v15 = vor.u32 1.1754944e-38, %v4488_v21 }
 0x5c9   : > { %v4770_v18 = vpack.c.bf16 %v9672_v48, %v9649_v54  ;;  %v4081_v53 = vpop.f32.mrf.mxu3  ;;  %v4475_v62 = vsel %vm4472_vm10, %v4474_v9, %v4470_v28  ;;  %v3904_v26 = vadd.f32 %v10554_v49, %v3815_v46  ;;  %6206 = vrcp.f32 %v9696_v41 }
 0x5ca   : > { %v3990_v30 = vpop.f32.mrf.mxu2  ;;  %6208 = vpow2.f32 %v5722_v63  ;;  %vm4527_vm7 = vweird.f32 %v9696_v41 }
 0x5cb   : > { %v3991_v6 = vadd.f32 %v3990_v30, %v3902_v14  ;;  %v4494_v14 = vsub.f32 1.0, %v4493_v2  ;;  %v9700_v30 = vpop.eup %6202  ;;  %v4485_v2 = vsel %vm4484_vm14, %v9653_v36, %v4481_v59  ;;  %v4503_v59 = vand.u32 2147483648, %v9647_v60  ;;  %v10555_v36 = vld [vmem:[#allocation66_spill] sm:$0xff] }
 0x5cc   : > { %v4508_v9 = vmul.f32 %v9700_v30, %v9669_v42  ;;  %vm4513_vm2 = vweird.f32 %v9700_v30 }
 0x5cd   : > { %v4080_v27 = vadd.f32 %v4079_v8, %v3991_v6  ;;  %v4486_v8 = vand.u32 2147483647, %v9625_v33  ;;  %v6205_v6 = vpop.eup %6204  ;;  %v4495_v12 = vmul.f32 %v9678_v7, %v4494_v14  ;;  %v5723_v14 = vmul.f32 -1.442695, %v10555_v36  ;;  %vm4514_vm4 = vmor %vm4512_vm3, %vm4513_vm2 }
 0x5ce   : > { %v9712_v46 = vadd.f32 1.0, %v6205_v6  ;;  %v4509_v34 = vsub.f32 1.0, %v4508_v9 }
 0x5cf   : > { %v4746_v56 = vmul.f32 %v4475_v62, %v4080_v27  ;;  %vm4487_vm15 = vcmp.eq.f32.partialorder %v4486_v8, 8.507059e+37  ;;  %v4496_v62 = vadd.f32 %v9678_v7, %v4495_v12  ;;  %v9716_v49 = vpop.eup %6206 }
 0x5d0   : > { %v4490_v33 = vsel %vm4487_vm15, %v4489_v15, %v4485_v2  ;;  %6210 = vrcp.f32 %v9712_v46  ;;  %v6209_v8 = vpop.eup %6208  ;;  %v4504_v2 = vor.u32 1.1754944e-38, %v4503_v59  ;;  %vm4528_vm6 = vweird.f32 %v9716_v49 }
 0x5d1   : > { %v4084_v57 = vpop.f32.mrf.mxu3  ;;  %6212 = vpow2.f32 %v5723_v14  ;;  %vm4529_vm8 = vmor %vm4527_vm7, %vm4528_vm6  ;;  %vm4542_vm12 = vweird.f32 %v9712_v46 }
 0x5d2   : > { %v3992_v32 = vpop.f32.mrf.mxu2 }
 0x5d3   : > { %v3993_v28 = vadd.f32 %v3992_v32, %v3904_v26  ;;  %v4523_v32 = vmul.f32 %v9716_v49, %v9696_v41 }
 0x5d5   : > { %v4082_v45 = vadd.f32 %v4081_v53, %v3993_v28  ;;  %v4501_v53 = vand.u32 2147483647, %v9647_v60  ;;  %v4500_v28 = vsel %vm4499_vm0, %v9678_v7, %v4496_v62  ;;  %v9728_v60 = vadd.f32 1.0, %v6209_v8 }
 0x5d6   : > { %v4524_v7 = vsub.f32 1.0, %v4523_v32  ;;  %v4516_v62 = vand.u32 2147483647, %v9669_v42  ;;  %v4531_v32 = vand.u32 2147483647, %v9696_v41 }
 0x5d7   : > { %v4747_v27 = vmul.f32 %v4490_v33, %v4082_v45  ;;  %vm4502_vm1 = vcmp.eq.f32.partialorder %v4501_v53, 8.507059e+37  ;;  %v9737_v45 = vpop.eup %6210  ;;  %v4518_v33 = vand.u32 2147483648, %v9669_v42  ;;  %6214 = vrcp.f32 %v9728_v60 }
 0x5d8   : > { %v4505_v9 = vsel %vm4502_vm1, %v4504_v2, %v4500_v28  ;;  %v6213_v48 = vpop.eup %6212  ;;  %v4525_v36 = vmul.f32 %v9716_v49, %v4524_v7  ;;  %v4538_v14 = vmul.f32 %v9737_v45, %v9712_v46  ;;  %vm4517_vm5 = vcmp.eq.f32.partialorder %v4516_v62, 8.507059e+37 }
 0x5d9   : > { %v4771_v26 = vpack.c.bf16 %v4747_v27, %v4746_v56  ;;  %v4086_v63 = vpop.f32.mrf.mxu3  ;;  %v4510_v56 = vmul.f32 %v9700_v30, %v4509_v34  ;;  %v4519_v42 = vor.u32 1.1754944e-38, %v4518_v33  ;;  %v9752_v53 = vadd.f32 1.0, %v6213_v48 }
 0x5da   : > { %v3995_v21 = vpop.f32.mrf.mxu2  ;;  %v4539_v35 = vsub.f32 1.0, %v4538_v14  ;;  %vm4532_vm10 = vcmp.eq.f32.partialorder %v4531_v32, 8.507059e+37  ;;  %vm4543_vm11 = vweird.f32 %v9737_v45  ;;  %v10560_v14 = vld [vmem:[#allocation16_spill] sm:$0xff]  ;;  %vm4557_vm9 = vweird.f32 %v9728_v60 }
 0x5db   : > { %v3996_v6 = vadd.f32 %v3995_v21, %v9312_v19  ;;  %4828 = vmatpush.bf16.msrb.mxu0 %v4771_v26  ;;  %v4511_v19 = vadd.f32 %v9700_v30, %v4510_v56  ;;  %vm4544_vm14 = vmor %vm4542_vm12, %vm4543_vm11  ;;  %vm4572_vm3 = vweird.f32 %v9752_v53 }
 0x5dc   : > { %v4540_v2 = vmul.f32 %v9737_v45, %v4539_v35 }
 0x5dd   : > { %v4085_v12 = vadd.f32 %v4084_v57, %v3996_v6  ;;  %v10556_v57 = vld [vmem:[#allocation11_spill] sm:$0xff]  ;;  %v4515_v59 = vsel %vm4514_vm4, %v9700_v30, %v4511_v19  ;;  %v9761_v1 = vpop.eup %6214  ;;  %v10557_v30 = vld [vmem:[#allocation12_spill] sm:$0xff] }
 0x5de   : > { %v5724_v27 = vmul.f32 -1.442695, %v10556_v57  ;;  %v4520_v21 = vsel %vm4517_vm5, %v4519_v42, %v4515_v59  ;;  %v4546_v57 = vand.u32 2147483647, %v9712_v46  ;;  %vm4558_vm13 = vweird.f32 %v9761_v1 }
 0x5df   : > { %v9730_v15 = vmul.f32 %v4505_v9, %v4085_v12  ;;  %4829 = vmatpush.bf16.msrb.mxu0 %v4770_v18  ;;  %v5727_v42 = vmul.f32 -1.442695, %v10560_v14  ;;  %vm4559_vm0 = vmor %vm4557_vm9, %vm4558_vm13 }
 0x5e0   : > { %6216 = vpow2.f32 %v5724_v27  ;;  %vm4547_vm15 = vcmp.eq.f32.partialorder %v4546_v57, 8.507059e+37 }
 0x5e1   : > { %v4089_v54 = vpop.f32.mrf.mxu3  ;;  %6218 = vrcp.f32 %v9752_v53 }
 0x5e2   : > { %v3997_v34 = vpop.f32.mrf.mxu2 }
 0x5e3   : > { %v3998_v18 = vadd.f32 %v3997_v34, %v9315_v11  ;;  %4830 = vmatpush.bf16.msrb.mxu0 %v4769_v23  ;;  %v4526_v11 = vadd.f32 %v9716_v49, %v4525_v36  ;;  %v4533_v23 = vand.u32 2147483648, %v9696_v41 }
 0x5e5   : > { %v4087_v26 = vadd.f32 %v4086_v63, %v3998_v18  ;;  %v5725_v63 = vmul.f32 -1.442695, %v10557_v30  ;;  %v4530_v56 = vsel %vm4529_vm8, %v9716_v49, %v4526_v11  ;;  %v4534_v41 = vor.u32 1.1754944e-38, %v4533_v23  ;;  %v10558_v49 = vld [vmem:[#allocation14_spill] sm:$0xff] }
 0x5e6   : > { %v6217_v52 = vpop.eup %6216  ;;  %v5726_v33 = vmul.f32 -1.442695, %v10558_v49 }
 0x5e7   : > { %v9754_v8 = vmul.f32 %v4520_v21, %v4087_v26  ;;  %4831 = vmatpush.bf16.msrb.mxu0 %v4768_v25  ;;  %v4553_v25 = vmul.f32 %v9761_v1, %v9728_v60  ;;  %6220 = vpow2.f32 %v5725_v63  ;;  %v9776_v9 = vadd.f32 1.0, %v6217_v52  ;;  %v9785_v16 = vpop.eup %6218 }
 0x5e8   : > { %v4535_v19 = vsel %vm4532_vm10, %v4534_v41, %v4530_v56  ;;  %v4561_v26 = vand.u32 2147483647, %v9728_v60  ;;  %vm4573_vm2 = vweird.f32 %v9785_v16  ;;  %v10561_v56 = vld [vmem:[#allocation17_spill] sm:$0xff]  ;;  %v4576_v41 = vand.u32 2147483647, %v9752_v53 }
 0x5e9   : > { %v4091_v20 = vpop.f32.mrf.mxu3  ;;  %v4554_v39 = vsub.f32 1.0, %v4553_v25  ;;  %6222 = vrcp.f32 %v9776_v9  ;;  %vm4574_vm4 = vmor %vm4572_vm3, %vm4573_vm2  ;;  %vm4587_vm7 = vweird.f32 %v9776_v9 }
 0x5ea   : > { %v4000_v6 = vpop.f32.mrf.mxu2  ;;  %6224 = vpow2.f32 %v5726_v33  ;;  %vm4562_vm1 = vcmp.eq.f32.partialorder %v4561_v26, 8.507059e+37  ;;  %vm4577_vm5 = vcmp.eq.f32.partialorder %v4576_v41, 8.507059e+37  ;;  %v3839_v26 = vpop.f32.mrf.mxu0 }
 0x5eb   : > { %v4001_v28 = vadd.f32 %v4000_v6, %v9320_v31  ;;  %4832 = vmatpush.bf16.msrb.mxu0 %v4767_v22  ;;  %v4541_v31 = vadd.f32 %v9737_v45, %v4540_v2  ;;  %v4548_v22 = vand.u32 2147483648, %v9712_v46  ;;  %v4555_v34 = vmul.f32 %v9761_v1, %v4554_v39 }
 0x5ec   : > { %v5728_v2 = vmul.f32 -1.442695, %v10561_v56 }
 0x5ed   : > { %v4090_v12 = vadd.f32 %v4089_v54, %v4001_v28  ;;  %v6221_v3 = vpop.eup %6220  ;;  %v4545_v62 = vsel %vm4544_vm14, %v9737_v45, %v4541_v31  ;;  %v4568_v54 = vmul.f32 %v9785_v16, %v9752_v53  ;;  %v4549_v46 = vor.u32 1.1754944e-38, %v4548_v22 }
 0x5ee   : > { %v9800_v18 = vadd.f32 1.0, %v6221_v3  ;;  %v4556_v13 = vadd.f32 %v9761_v1, %v4555_v34  ;;  %v4563_v45 = vand.u32 2147483648, %v9728_v60  ;;  %v10562_v34 = vld [vmem:[#allocation19_spill] sm:$0xff] }
 0x5ef   : > { %v9778_v7 = vmul.f32 %v4535_v19, %v4090_v12  ;;  %4833 = vmatpush.bf16.msrb.mxu0 %v4766_v38  ;;  %v4550_v59 = vsel %vm4547_vm15, %v4549_v46, %v4545_v62  ;;  %v4569_v40 = vsub.f32 1.0, %v4568_v54  ;;  %v4593_v62 = vand.u32 2147483648, %v9776_v9 }
 0x5f0   : > { %6226 = vrcp.f32 %v9800_v18  ;;  %v4560_v23 = vsel %vm4559_vm0, %v9761_v1, %v4556_v13  ;;  %v4564_v63 = vor.u32 1.1754944e-38, %v4563_v45  ;;  %v4772_v1 = vpack.c.bf16 %v9754_v8, %v9730_v15 }
 0x5f1   : > { %v4094_v29 = vpop.f32.mrf.mxu3  ;;  %v4570_v30 = vmul.f32 %v9785_v16, %v4569_v40  ;;  %6228 = vpow2.f32 %v5727_v42  ;;  %v5729_v54 = vmul.f32 -1.442695, %v10562_v34  ;;  %v4591_v46 = vand.u32 2147483647, %v9776_v9 }
 0x5f2   : > { %v4002_v27 = vpop.f32.mrf.mxu2  ;;  %v4565_v6 = vsel %vm4562_vm1, %v4564_v63, %v4560_v23  ;;  %v4594_v42 = vor.u32 1.1754944e-38, %v4593_v62  ;;  %vm4602_vm12 = vweird.f32 %v9800_v18 }
 0x5f3   : > { %v4003_v38 = vadd.f32 %v4002_v27, %v9323_v61  ;;  %4834 = vmatpush.bf16.msrb.mxu0 %v4765_v47  ;;  %v10559_v61 = vpack.c.bf16 %v9419_v37, %v9398_v43  ;;  %v9809_v47 = vpop.eup %6222  ;;  %v4571_v52 = vadd.f32 %v9785_v16, %v4570_v30  ;;  %vm4592_vm10 = vcmp.eq.f32.partialorder %v4591_v46, 8.507059e+37  ;;  %v10563_v30 = vld [vmem:[#allocation20_spill] sm:$0xff] }
 0x5f4   : > { %v6225_v37 = vpop.eup %6224  ;;  %v4583_v11 = vmul.f32 %v9809_v47, %v9776_v9  ;;  %vm4588_vm6 = vweird.f32 %v9809_v47  ;;  %v5730_v63 = vmul.f32 -1.442695, %v10563_v30 }
 0x5f5   : > { %v4092_v48 = vadd.f32 %v4091_v20, %v4003_v38  ;;  %v9821_v60 = vadd.f32 1.0, %v6225_v37  ;;  %v4575_v22 = vsel %vm4574_vm4, %v9785_v16, %v4571_v52  ;;  %vm4589_vm8 = vmor %vm4587_vm7, %vm4588_vm6 }
 0x5f6   : > { %v4584_v25 = vsub.f32 1.0, %v4583_v11  ;;  %v9827_v28 = vpop.eup %6226 }
 0x5f7   : > { %v9802_v36 = vmul.f32 %v4550_v59, %v4092_v48  ;;  %4835 = vmatpush.bf16.msrb.mxu0 %v10559_v61  ;;  %6230 = vrcp.f32 %v9821_v60  ;;  %v6229_v31 = vpop.eup %6228  ;;  %v4598_v33 = vmul.f32 %v9827_v28, %v9800_v18  ;;  %vm4603_vm11 = vweird.f32 %v9827_v28 }
 0x5f8   : > { %v4585_v49 = vmul.f32 %v9809_v47, %v4584_v25  ;;  %6232 = vpow2.f32 %v5728_v2  ;;  %vm4604_vm14 = vmor %vm4602_vm12, %vm4603_vm11  ;;  %vm4617_vm9 = vweird.f32 %v9821_v60 }
 0x5f9   : > { %v4096_v43 = vpop.f32.mrf.mxu3  ;;  %v4773_v23 = vpack.c.bf16 %v9802_v36, %v9778_v7  ;;  %v5948_v7 = vld [vmem:[%s10076_s5 + $0x14] sm:$0xf]  ;;  %v5746_v36 = vld [vmem:[%s10076_s5 + $0x18] sm:$0xf0] }
 0x5fa   : > { %v4005_v21 = vpop.f32.mrf.mxu2  ;;  %v4586_v38 = vadd.f32 %v9809_v47, %v4585_v49  ;;  %v5749_v15 = vor.u32 %v5948_v7, %v5746_v36 }
 0x5fb   : > { %v4006_v35 = vadd.f32 %v4005_v21, %v9328_v55  ;;  %v4578_v55 = vand.u32 2147483648, %v9752_v53  ;;  %v9841_v53 = vadd.f32 1.0, %v6229_v31 }
 0x5fc   : > { %v4590_v45 = vsel %vm4589_vm8, %v9809_v47, %v4586_v38  ;;  %v4608_v47 = vand.u32 2147483648, %v9800_v18  ;;  %v4621_v38 = vand.u32 2147483647, %v9821_v60 }
 0x5fd   : > { %v4095_v32 = vadd.f32 %v4094_v29, %v4006_v35  ;;  %v4579_v57 = vor.u32 1.1754944e-38, %v4578_v55  ;;  %v9847_v16 = vpop.eup %6230  ;;  %6234 = vrcp.f32 %v9841_v53  ;;  %vm4632_vm3 = vweird.f32 %v9841_v53 }
 0x5fe   : > { %v6233_v61 = vpop.eup %6232  ;;  %v4613_v13 = vmul.f32 %v9847_v16, %v9821_v60  ;;  %6236 = vpow2.f32 %v5729_v54  ;;  %vm4618_vm13 = vweird.f32 %v9847_v16  ;;  %vm4622_vm1 = vcmp.eq.f32.partialorder %v4621_v38, 8.507059e+37 }
 0x5ff   : > { %v9823_v20 = vmul.f32 %v4565_v6, %v4095_v32  ;;  %v4580_v29 = vsel %vm4577_vm5, %v4579_v57, %v4575_v22  ;;  %v9859_v9 = vadd.f32 1.0, %v6233_v61  ;;  %v4606_v32 = vand.u32 2147483647, %v9800_v18  ;;  %v3842_v22 = vpop.f32.mrf.mxu0  ;;  %vm4619_vm0 = vmor %vm4617_vm9, %vm4618_vm13 }
 0x600   : > { %v4614_v35 = vsub.f32 1.0, %v4613_v13  ;;  %v4623_v57 = vand.u32 2147483648, %v9821_v60  ;;  %v3840_v13 = vadd.f32 %v3839_v26, %v9335_v17  ;;  %v10565_v26 = vld [vmem:[#allocation23_spill] sm:$0xff]  ;;  %v4636_v30 = vand.u32 2147483647, %v9841_v53 }
 0x601   : > { %v4099_v19 = vpop.f32.mrf.mxu3  ;;  %6238 = vrcp.f32 %v9859_v9  ;;  %vm4607_vm15 = vcmp.eq.f32.partialorder %v4606_v32, 8.507059e+37  ;;  %vm4647_vm7 = vweird.f32 %v9859_v9 }
 0x602   : > { %v4007_v12 = vpop.f32.mrf.mxu2  ;;  %v4615_v2 = vmul.f32 %v9847_v16, %v4614_v35  ;;  %6240 = vpow2.f32 %v5730_v63  ;;  %v4624_v61 = vor.u32 1.1754944e-38, %v4623_v57  ;;  %vm4637_vm5 = vcmp.eq.f32.partialorder %v4636_v30, 8.507059e+37 }
 0x603   : > { %v4008_v39 = vadd.f32 %v4007_v12, %v9332_v10  ;;  %v4599_v10 = vsub.f32 1.0, %v4598_v33  ;;  %v3928_v12 = vpop.f32.mrf.mxu1  ;;  %v4653_v57 = vand.u32 2147483648, %v9859_v9 }
 0x604   : > { %v3929_v35 = vadd.f32 %v3928_v12, %v3840_v13 }
 0x605   : > { %v4097_v27 = vadd.f32 %v4096_v43, %v4008_v39  ;;  %v4600_v14 = vmul.f32 %v9827_v28, %v4599_v10  ;;  %v4595_v43 = vsel %vm4592_vm10, %v4594_v42, %v4590_v45 }
 0x607   : > { %v9843_v3 = vmul.f32 %v4580_v29, %v4097_v27  ;;  %v4601_v11 = vadd.f32 %v9827_v28, %v4600_v14  ;;  %v10564_v27 = vld [vmem:[#allocation67_spill] sm:$0xff] }
 0x608   : > { %v5731_v29 = vmul.f32 -1.442695, %v10564_v27  ;;  %v10566_v27 = vld [vmem:[#allocation68_spill] sm:$0xff] }
 0x609   : > { %v4101_v59 = vpop.f32.mrf.mxu3  ;;  %v4605_v56 = vsel %vm4604_vm14, %v9827_v28, %v4601_v11  ;;  %v4774_v17 = vpack.c.bf16 %v9843_v3, %v9823_v20  ;;  %v5732_v11 = vmul.f32 -1.442695, %v10565_v26  ;;  %v5951_v20 = vld [vmem:[%s10076_s5 + $0x24] sm:$0xf0] }
 0x60a   : > { %v4010_v48 = vpop.f32.mrf.mxu2 }
 0x60b   : > { %v4011_v40 = vadd.f32 %v4010_v48, %v9342_v58  ;;  %v9865_v58 = vpop.eup %6234  ;;  %v3931_v45 = vpop.f32.mrf.mxu1 }
 0x60c   : > { %v6237_v25 = vpop.eup %6236  ;;  %v4628_v41 = vmul.f32 %v9865_v58, %v9841_v53  ;;  %vm4633_vm2 = vweird.f32 %v9865_v58 }
 0x60d   : > { %v4100_v21 = vadd.f32 %v4099_v19, %v4011_v40  ;;  %v4609_v19 = vor.u32 1.1754944e-38, %v4608_v47  ;;  %v9879_v18 = vadd.f32 1.0, %v6237_v25  ;;  %v9885_v33 = vpop.eup %6238  ;;  %v3844_v47 = vpop.f32.mrf.mxu0  ;;  %vm4634_vm4 = vmor %vm4632_vm3, %vm4633_vm2 }
 0x60e   : > { %v4629_v28 = vsub.f32 1.0, %v4628_v41  ;;  %v6241_v34 = vpop.eup %6240  ;;  %v4643_v54 = vmul.f32 %v9885_v33, %v9859_v9  ;;  %v3843_v41 = vadd.f32 %v3842_v22, %v9344_v0  ;;  %vm4648_vm6 = vweird.f32 %v9885_v33 }
 0x60f   : > { %v9861_v37 = vmul.f32 %v4595_v43, %v4100_v21  ;;  %v4610_v39 = vsel %vm4607_vm15, %v4609_v19, %v4605_v56  ;;  %6242 = vrcp.f32 %v9879_v18  ;;  %v9898_v40 = vadd.f32 1.0, %v6241_v34  ;;  %vm4649_vm8 = vmor %vm4647_vm7, %vm4648_vm6 }
 0x610   : > { %6244 = vpow2.f32 %v5731_v29  ;;  %v4638_v43 = vand.u32 2147483648, %v9841_v53  ;;  %v5733_v29 = vmul.f32 -1.442695, %v10566_v27  ;;  %v3932_v0 = vadd.f32 %v3931_v45, %v3843_v41 }
 0x611   : > { %v4104_v52 = vpop.f32.mrf.mxu3  ;;  %6246 = vrcp.f32 %v9898_v40  ;;  %v4651_v22 = vand.u32 2147483647, %v9859_v9  ;;  %v3845_v13 = vadd.f32 %v3844_v47, %v9356_v50  ;;  %vm4662_vm12 = vweird.f32 %v9879_v18 }
 0x612   : > { %v4012_v6 = vpop.f32.mrf.mxu2  ;;  %6248 = vpow2.f32 %v5732_v11  ;;  %v4666_v11 = vand.u32 2147483647, %v9879_v18  ;;  %vm4677_vm9 = vweird.f32 %v9898_v40 }
 0x613   : > { %v4013_v55 = vadd.f32 %v4012_v6, %v9353_v4  ;;  %v4616_v4 = vadd.f32 %v9847_v16, %v4615_v2  ;;  %v4639_v2 = vor.u32 1.1754944e-38, %v4638_v43  ;;  %vm4652_vm10 = vcmp.eq.f32.partialorder %v4651_v22, 8.507059e+37 }
 0x614   : > { %v4668_v43 = vand.u32 2147483648, %v9879_v18  ;;  %vm4667_vm15 = vcmp.eq.f32.partialorder %v4666_v11, 8.507059e+37 }
 0x615   : > { %v4102_v31 = vadd.f32 %v4101_v59, %v4013_v55  ;;  %v4620_v48 = vsel %vm4619_vm0, %v9847_v16, %v4616_v4  ;;  %v4630_v59 = vmul.f32 %v9865_v58, %v4629_v28  ;;  %v9904_v16 = vpop.eup %6242  ;;  %v3933_v28 = vpop.f32.mrf.mxu1 }
 0x616   : > { %v4625_v14 = vsel %vm4622_vm1, %v4624_v61, %v4620_v48  ;;  %v6245_v6 = vpop.eup %6244  ;;  %v4658_v56 = vmul.f32 %v9904_v16, %v9879_v18  ;;  %v3847_v34 = vpop.f32.mrf.mxu0  ;;  %vm4663_vm11 = vweird.f32 %v9904_v16  ;;  %v3934_v50 = vadd.f32 %v3933_v28, %v3845_v13 }
 0x617   : > { %v9881_v49 = vmul.f32 %v4610_v39, %v4102_v31  ;;  %v4631_v21 = vadd.f32 %v9865_v58, %v4630_v59  ;;  %v9918_v53 = vadd.f32 1.0, %v6245_v6  ;;  %v9924_v4 = vpop.eup %6246  ;;  %v4654_v59 = vor.u32 1.1754944e-38, %v4653_v57  ;;  %vm4664_vm14 = vmor %vm4662_vm12, %vm4663_vm11 }
 0x618   : > { %vm4678_vm13 = vweird.f32 %v9924_v4  ;;  %v4683_v28 = vand.u32 2147483648, %v9898_v40 }
 0x619   : > { %v4106_v62 = vpop.f32.mrf.mxu3  ;;  %v4635_v25 = vsel %vm4634_vm4, %v9865_v58, %v4631_v21  ;;  %v4659_v58 = vsub.f32 1.0, %v4658_v56  ;;  %6250 = vrcp.f32 %v9918_v53  ;;  %v4775_v26 = vpack.c.bf16 %v9881_v49, %v9861_v37  ;;  %vm4679_vm0 = vmor %vm4677_vm9, %vm4678_vm13  ;;  %v5752_v37 = vld [vmem:[%s10076_s5 + $0x20] sm:$0xf] }
 0x61a   : > { %v4015_v10 = vpop.f32.mrf.mxu2  ;;  %v4640_v19 = vsel %vm4637_vm5, %v4639_v2, %v4635_v25  ;;  %6252 = vpow2.f32 %v5733_v29  ;;  %v4669_v25 = vor.u32 1.1754944e-38, %v4668_v43  ;;  %vm4692_vm3 = vweird.f32 %v9918_v53 }
 0x61b   : > { %v4016_v46 = vadd.f32 %v4015_v10, %v9367_v44  ;;  %v4644_v44 = vsub.f32 1.0, %v4643_v54  ;;  %v6249_v10 = vpop.eup %6248  ;;  %v4660_v48 = vmul.f32 %v9904_v16, %v4659_v58  ;;  %v5753_v49 = vor.u32 %v5951_v20, %v5752_v37 }
 0x61d   : > { %v4105_v60 = vadd.f32 %v4104_v52, %v4016_v46  ;;  %v4645_v55 = vmul.f32 %v9885_v33, %v4644_v44  ;;  %v4661_v21 = vadd.f32 %v9904_v16, %v4660_v48 }
 0x61e   : > { %v3849_v56 = vpop.f32.mrf.mxu0 }
 0x61f   : > { %v9900_v42 = vmul.f32 %v4625_v14, %v4105_v60  ;;  %v4646_v39 = vadd.f32 %v9885_v33, %v4645_v55  ;;  %v9936_v60 = vadd.f32 1.0, %v6249_v10  ;;  %v3848_v55 = vadd.f32 %v3847_v34, %v9369_v24  ;;  %v10567_v34 = vld [vmem:[#allocation48_spill] sm:$0xff] }
 0x620   : > { %v4681_v24 = vand.u32 2147483647, %v9898_v40 }
 0x621   : > { %v4109_v32 = vpop.f32.mrf.mxu3  ;;  %v4650_v46 = vsel %vm4649_vm8, %v9885_v33, %v4646_v39  ;;  %v9942_v33 = vpop.eup %6250  ;;  %6254 = vrcp.f32 %v9936_v60  ;;  %vm4707_vm7 = vweird.f32 %v9936_v60 }
 0x622   : > { %v4017_v63 = vpop.f32.mrf.mxu2  ;;  %v4655_v45 = vsel %vm4652_vm10, %v4654_v59, %v4650_v46  ;;  %v6253_v30 = vpop.eup %6252  ;;  %vm4682_vm1 = vcmp.eq.f32.partialorder %v4681_v24, 8.507059e+37  ;;  %vm4693_vm2 = vweird.f32 %v9942_v33 }
 0x623   : > { %v4018_v52 = vadd.f32 %v4017_v63, %v3929_v35  ;;  %v3936_v35 = vpop.f32.mrf.mxu1  ;;  %v9955_v18 = vadd.f32 1.0, %v6253_v30  ;;  %vm4694_vm4 = vmor %vm4692_vm3, %vm4693_vm2 }
 0x624   : > { %v3937_v57 = vadd.f32 %v3936_v35, %v3848_v55 }
 0x625   : > { %v4107_v12 = vadd.f32 %v4106_v62, %v4018_v52  ;;  %v4673_v62 = vmul.f32 %v9924_v4, %v9898_v40  ;;  %v4688_v52 = vmul.f32 %v9942_v33, %v9918_v53  ;;  %6256 = vrcp.f32 %v9955_v18 }
 0x626   : > { %v3852_v40 = vpop.f32.mrf.mxu0  ;;  %vm4722_vm12 = vweird.f32 %v9955_v18 }
 0x627   : > { %v9920_v31 = vmul.f32 %v4640_v19, %v4107_v12  ;;  %v4674_v44 = vsub.f32 1.0, %v4673_v62  ;;  %v9961_v58 = vpop.eup %6254  ;;  %v4684_v62 = vor.u32 1.1754944e-38, %v4683_v28 }
 0x628   : > { %v4703_v29 = vmul.f32 %v9961_v58, %v9936_v60  ;;  %vm4708_vm6 = vweird.f32 %v9961_v58 }
 0x629   : > { %v4111_v61 = vpop.f32.mrf.mxu3  ;;  %v4675_v6 = vmul.f32 %v9924_v4, %v4674_v44  ;;  %v4776_v44 = vpack.c.bf16 %v9920_v31, %v9900_v42  ;;  %vm4709_vm8 = vmor %vm4707_vm7, %vm4708_vm6  ;;  %v5738_v42 = vld [vmem:[%s10076_s5 + $0x8] sm:$0xf0] }
 0x62a   : > { %v4020_v38 = vpop.f32.mrf.mxu2  ;;  %v4704_v13 = vsub.f32 1.0, %v4703_v29  ;;  %v5754_v31 = vld [vmem:[%s10076_s5 + $0x28] sm:$0xf0] }
 0x62b   : > { %v4021_v54 = vadd.f32 %v4020_v38, %v3932_v0  ;;  %v4676_v39 = vadd.f32 %v9924_v4, %v4675_v6  ;;  %v3938_v10 = vpop.f32.mrf.mxu1 }
 0x62c   : > { %v4705_v30 = vmul.f32 %v9961_v58, %v4704_v13 }
 0x62d   : > { %v4110_v9 = vadd.f32 %v4109_v32, %v4021_v54  ;;  %v4665_v32 = vsel %vm4664_vm14, %v9904_v16, %v4661_v21  ;;  %v4689_v16 = vsub.f32 1.0, %v4688_v52  ;;  %v4680_v22 = vsel %vm4679_vm0, %v9924_v4, %v4676_v39 }
 0x62e   : > { %v4670_v41 = vsel %vm4667_vm15, %v4669_v25, %v4665_v32  ;;  %v3850_v54 = vadd.f32 %v3849_v56, %v10567_v34  ;;  %v4685_v48 = vsel %vm4682_vm1, %v4684_v62, %v4680_v22  ;;  %v4698_v21 = vand.u32 2147483648, %v9918_v53 }
 0x62f   : > { %v9938_v14 = vmul.f32 %v4655_v45, %v4110_v9  ;;  %v4690_v38 = vmul.f32 %v9942_v33, %v4689_v16  ;;  %v6257_v9 = vpop.eup %6256  ;;  %v3853_v52 = vadd.f32 %v3852_v40, %v9402_v5  ;;  %v4711_v39 = vand.u32 2147483647, %v9936_v60 }
 0x630   : > { %v3939_v43 = vadd.f32 %v3938_v10, %v3850_v54  ;;  %v4699_v6 = vor.u32 1.1754944e-38, %v4698_v21  ;;  %vm4723_vm11 = vweird.f32 %v6257_v9  ;;  %v5736_v21 = vld [vmem:[%s10076_s5] sm:$0xf] }
 0x631   : > { %v4114_v12 = vpop.f32.mrf.mxu3  ;;  %vm4712_vm10 = vcmp.eq.f32.partialorder %v4711_v39, 8.507059e+37  ;;  %vm4724_vm14 = vmor %vm4722_vm12, %vm4723_vm11 }
 0x632   : > { %v4022_v47 = vpop.f32.mrf.mxu2 }
 0x633   : > { %v4023_v63 = vadd.f32 %v4022_v47, %v3934_v50  ;;  %v4696_v50 = vand.u32 2147483647, %v9918_v53  ;;  %v3941_v32 = vpop.f32.mrf.mxu1 }
 0x635   : > { %v4112_v2 = vadd.f32 %v4111_v61, %v4023_v63  ;;  %v4691_v61 = vadd.f32 %v9942_v33, %v4690_v38  ;;  %v4718_v63 = vmul.f32 %v6257_v9, %v9955_v18  ;;  %vm4697_vm5 = vcmp.eq.f32.partialorder %v4696_v50, 8.507059e+37 }
 0x637   : > { %v9957_v19 = vmul.f32 %v4670_v41, %v4112_v2  ;;  %v4695_v47 = vsel %vm4694_vm4, %v9942_v33, %v4691_v61  ;;  %v4706_v2 = vadd.f32 %v9961_v58, %v4705_v30  ;;  %v4719_v53 = vsub.f32 1.0, %v4718_v63 }
 0x638   : > { %v4700_v55 = vsel %vm4697_vm5, %v4699_v6, %v4695_v47  ;;  %v4713_v41 = vand.u32 2147483648, %v9936_v60  ;;  %v3942_v33 = vadd.f32 %v3941_v32, %v3853_v52  ;;  %v4728_v60 = vand.u32 2147483648, %v9955_v18 }
 0x639   : > { %v4777_v4 = vpack.c.bf16 %v9957_v19, %v9938_v14  ;;  %v4116_v45 = vpop.f32.mrf.mxu3  ;;  %v4710_v24 = vsel %vm4709_vm8, %v9961_v58, %v4706_v2  ;;  %v5946_v14 = vld [vmem:[%s10076_s5 + $0x4] sm:$0xf]  ;;  %v5952_v19 = vld [vmem:[%s10076_s5 + $0x34] sm:$0xf] }
 0x63a   : > { %v4025_v27 = vpop.f32.mrf.mxu2  ;;  %v4714_v29 = vor.u32 1.1754944e-38, %v4713_v41  ;;  %v5741_v3 = vor.u32 %v5946_v14, %v5738_v42 }
 0x63b   : > { %v4026_v0 = vadd.f32 %v4025_v27, %v3937_v57  ;;  %v4720_v27 = vmul.f32 %v6257_v9, %v4719_v53  ;;  %v3943_v38 = vpop.f32.mrf.mxu1 }
 0x63c   : > { %v4715_v10 = vsel %vm4712_vm10, %v4714_v29, %v4710_v24 }
 0x63d   : > { %v4115_v46 = vadd.f32 %v4114_v12, %v4026_v0  ;;  %v3854_v12 = vpop.f32.mrf.mxu0  ;;  %v4721_v34 = vadd.f32 %v6257_v9, %v4720_v27 }
 0x63e   : > { %v3855_v0 = vadd.f32 %v3854_v12, %v9424_v51  ;;  %v4729_v51 = vor.u32 1.1754944e-38, %v4728_v60 }
 0x63f   : > { %v9973_v59 = vmul.f32 %v4685_v48, %v4115_v46  ;;  %v4726_v46 = vand.u32 2147483647, %v9955_v18  ;;  %v4725_v40 = vsel %vm4724_vm14, %v6257_v9, %v4721_v34  ;;  %v5744_v9 = vld [vmem:[%s10076_s5 + $0x10] sm:$0xf] }
 0x640   : > { %v3944_v54 = vadd.f32 %v3943_v38, %v3855_v0 }
 0x641   : > { %v4119_v5 = vpop.f32.mrf.mxu3  ;;  %vm4727_vm15 = vcmp.eq.f32.partialorder %v4726_v46, 8.507059e+37 }
 0x642   : > { %v4027_v11 = vpop.f32.mrf.mxu2  ;;  %v4730_v13 = vsel %vm4727_vm15, %v4729_v51, %v4725_v40 }
 0x643   : > { %v4028_v35 = vadd.f32 %v4027_v11, %v3939_v43  ;;  %v5947_v43 = vld [vmem:[%s10076_s5 + $0x4] sm:$0xf0]  ;;  %v5949_v11 = vld [vmem:[%s10076_s5 + $0x14] sm:$0xf0] }
 0x644   : > { %v5737_v50 = vor.u32 %v5947_v43, %v5736_v21 }
 0x645   : > { %v4117_v25 = vadd.f32 %v4116_v45, %v4028_v35  ;;  %v5745_v35 = vor.u32 %v5949_v11, %v5744_v9 }
 0x646   : > { %4836 = vmatmul.bf16.vlgmr.msrb.gmra.mxu0 %v5737_v50 }
 0x647   : > { %v4761_v56 = vmul.f32 %v4700_v55, %v4117_v25 }
 0x649   : > { %v4778_v16 = vpack.c.bf16 %v4761_v56, %v9973_v59  ;;  %v4121_v59 = vpop.f32.mrf.mxu3 }
 0x64a   : > { %v4030_v28 = vpop.f32.mrf.mxu2 }
 0x64b   : > { %v4031_v57 = vadd.f32 %v4030_v28, %v3942_v33 }
 0x64d   : > { %v4120_v22 = vadd.f32 %v4119_v5, %v4031_v57 }
 0x64f   : > { %v4762_v62 = vmul.f32 %v4715_v10, %v4120_v22 }
 0x652   : > { %v4032_v48 = vpop.f32.mrf.mxu2 }
 0x653   : > { %v4033_v58 = vadd.f32 %v4032_v48, %v3944_v54 }
 0x655   : > { %v4122_v61 = vadd.f32 %v4121_v59, %v4033_v58 }
 0x656   : > { %4841 = vmatmul.bf16.gmra.mxu0 %v5745_v35 }
 0x657   : > { %v4763_v45 = vmul.f32 %v4730_v13, %v4122_v61 }
 0x659   : > { %v4779_v18 = vpack.c.bf16 %v4763_v45, %v4762_v62 }
 0x65b   : > { %4857 = vmatpush.bf16.msrb.mxu1 %v4779_v18 }
 0x65f   : > { %4858 = vmatpush.bf16.msrb.mxu1 %v4778_v16 }
 0x663   : > { %4859 = vmatpush.bf16.msrb.mxu1 %v4777_v4  ;;  %v5762_v4 = vld [vmem:[%s10076_s5 + $0x38] sm:$0xf0] }
 0x666   : > { %4846 = vmatmul.bf16.gmra.mxu0 %v5753_v49 }
 0x667   : > { %4860 = vmatpush.bf16.msrb.mxu1 %v4776_v44  ;;  %v5765_v44 = vor.u32 %v5952_v19, %v5762_v4 }
 0x66b   : > { %4861 = vmatpush.bf16.msrb.mxu1 %v4775_v26 }
 0x66f   : > { %4862 = vmatpush.bf16.msrb.mxu1 %v4774_v17  ;;  %v5953_v17 = vld [vmem:[%s10076_s5 + $0x34] sm:$0xf0] }
 0x673   : > { %4863 = vmatpush.bf16.msrb.mxu1 %v4773_v23  ;;  %v5760_v23 = vld [vmem:[%s10076_s5 + $0x30] sm:$0xf] }
 0x674   : > { %v5761_v8 = vor.u32 %v5953_v17, %v5760_v23 }
 0x676   : > { %4851 = vmatmul.bf16.gmra.mxu0 %v5761_v8 }
 0x677   : > { %4864 = vmatpush.bf16.msrb.mxu1 %v4772_v1  ;;  %v5950_v1 = vld [vmem:[%s10076_s5 + $0x24] sm:$0xf] }
 0x678   : > { %v5757_v26 = vor.u32 %v5950_v1, %v5754_v31 }
 0x67a   : > { %4865 = vmatmul.bf16.vlgmr.msrb.gmra.mxu1 %v5741_v3 }
 0x68a   : > { %4870 = vmatmul.bf16.gmra.mxu1 %v5749_v15 }
 0x69a   : > { %4875 = vmatmul.bf16.gmra.mxu1 %v5757_v26 }
 0x6aa   : > { %4880 = vmatmul.bf16.gmra.mxu1 %v5765_v44 }
 0x6c3   : > { %v4837_v47 = vpop.f32.mrf.mxu0 }
 0x6cb   : > { %v4839_v30 = vpop.f32.mrf.mxu0 }
 0x6d3   : > { %v4842_v32 = vpop.f32.mrf.mxu0 }
 0x6db   : > { %v4844_v2 = vpop.f32.mrf.mxu0 }
 0x6e3   : > { %v4847_v12 = vpop.f32.mrf.mxu0 }
 0x6eb   : > { %v4849_v5 = vpop.f32.mrf.mxu0 }
 0x6f3   : > { %v4852_v29 = vpop.f32.mrf.mxu0 }
 0x6f7   : > { %v4866_v63 = vpop.f32.mrf.mxu1 }
 0x6f8   : > { %v4867_v52 = vadd.f32 %v4866_v63, %v4837_v47 }
 0x6fb   : > { %v4854_v22 = vpop.f32.mrf.mxu0 }
 0x6ff   : > { %v4868_v6 = vpop.f32.mrf.mxu1 }
 0x700   : > { %v4869_v25 = vadd.f32 %v4868_v6, %v4839_v30 }
 0x702   : > { %v5957_v55 = vpack.c.bf16 %v4869_v25, %v4867_v52 }
 0x704   : > { %5958 = vst [vmem:[%s251_s7] sm:$0xff] %v5957_v55  }
 0x707   : > { %v4871_v56 = vpop.f32.mrf.mxu1 }
 0x708   : > { %v4872_v41 = vadd.f32 %v4871_v56, %v4842_v32 }
 0x70f   : > { %v4873_v53 = vpop.f32.mrf.mxu1 }
 0x710   : > { %v4874_v33 = vadd.f32 %v4873_v53, %v4844_v2 }
 0x712   : > { %v5962_v39 = vpack.c.bf16 %v4874_v33, %v4872_v41 }
 0x714   : > { %5974 = vst [vmem:[%s251_s7 + $0x8] sm:$0xff] %v5962_v39  }
 0x717   : > { %v4876_v16 = vpop.f32.mrf.mxu1 }
 0x718   : > { %v4877_v57 = vadd.f32 %v4876_v16, %v4847_v12 }
 0x71f   : > { %v4878_v28 = vpop.f32.mrf.mxu1 }
 0x720   : > { %v4879_v24 = vadd.f32 %v4878_v28, %v4849_v5 }
 0x722   : > { %v5967_v27 = vpack.c.bf16 %v4879_v24, %v4877_v57 }
 0x724   : > { %5975 = vst [vmem:[%s251_s7 + $0x10] sm:$0xff] %v5967_v27  }
 0x727   : > { %v4881_v0 = vpop.f32.mrf.mxu1 }
 0x728   : > { %v4882_v10 = vadd.f32 %v4881_v0, %v4852_v29 }
 0x72f   : > { %v4883_v38 = vpop.f32.mrf.mxu1 }
 0x730   : > { %v4884_v62 = vadd.f32 %v4883_v38, %v4854_v22 }
 0x732   : > { %v5972_v34 = vpack.c.bf16 %v4884_v62, %v4882_v10 }
 0x734   : > { %5976 = vst [vmem:[%s251_s7 + $0x18] sm:$0xff] %v5972_v34  }
 0x735 PF: > { %s16_s21 = sadd.s32 1, %s6265_s21  }
 0x736   : > { %p13_p4 = scmp.ge.s32.totalorder %s16_s21, 4  }
 0x738   :  { %15 = sbr.rel (!%p13_p4) target bundleno = 1 (0x1), region = 74 }

</bundles_post_ra>
